<compile_context>
chip_gen: v5e
topology: v5e:2x2
jax: 0.10.0
libtpu: 0.0.40
codegen_flags: <defaults>
</compile_context>

<pallas_src>
import functools

import jax
import jax.numpy as jnp
from jax import lax
from jax.experimental import pallas as pl
from jax.experimental.pallas import tpu as pltpu


# ---------------------------------------------------------------------------
# Pallas kernel: `nl` residual attention blocks applied to one batch block
# ---------------------------------------------------------------------------
def _transformer_kernel(x_ref, wqkv_ref, bqkv_ref, wo_ref, bo_ref,
                        ln1w_ref, ln1b_ref, ln2w_ref, ln2b_ref,
                        wfc_ref, bfc_ref, wpr_ref, bpr_ref, out_ref,
                        *, num_heads, nl, streaming, mlp_chunks, eps):
    Bt, S, D = x_ref.shape
    H = num_heads
    dh = D // H
    N = Bt * S
    F = wfc_ref.shape[-1]                      # 4 * D
    fchunk = F // mlp_chunks

    if streaming:
        # The residual lives in the (revisited) output block across the layer grid axis.
        # NOTE: for bf16 inputs this rounds the residual to bf16 between layers.
        @pl.when(pl.program_id(1) == 0)
        def _init():
            out_ref[...] = x_ref[...].astype(out_ref.dtype)
        x2 = out_ref[...].astype(jnp.float32).reshape(N, D)
    else:
        x2 = x_ref[...].astype(jnp.float32).reshape(N, D)

    def layernorm(v, w, b):
        # Single pass: mean and mean-of-squares together (halves VPU sweeps / XLU reductions).
        m = jnp.mean(v, axis=-1, keepdims=True)
        m2 = jnp.mean(v * v, axis=-1, keepdims=True)
        var = jnp.maximum(m2 - m * m, 0.0)
        return w * ((v - m) * lax.rsqrt(var + eps)) + b

    for li in range(nl):
        # ----- multi-head self-attention -------------------------------------
        h_bf = layernorm(x2, ln1w_ref[li], ln1b_ref[li]).astype(jnp.bfloat16)
        # Fused QKV projection: one lane-dense (N, D) x (D, 3D) MXU matmul.
        # 1/sqrt(dh) is pre-folded into the Q columns of wqkv / bqkv.
        qkv = jnp.dot(h_bf, wqkv_ref[li],
                      preferred_element_type=jnp.float32) + bqkv_ref[li]

        # Per-head score / PV matmuls, batched over the Bt batch rows (flash-style einsums).
        heads = []
        for hi in range(H):
            q = qkv[:, hi * dh:(hi + 1) * dh].reshape(Bt, S, dh).astype(jnp.bfloat16)
            k = qkv[:, D + hi * dh:D + (hi + 1) * dh].reshape(Bt, S, dh).astype(jnp.bfloat16)
            v = qkv[:, 2 * D + hi * dh:2 * D + (hi + 1) * dh].reshape(Bt, S, dh).astype(jnp.bfloat16)
            sc = jnp.einsum('bqd,bkd->bqk', q, k,
                            preferred_element_type=jnp.float32)          # (Bt, S, S)
            sc = sc - jnp.max(sc, axis=-1, keepdims=True)
            p = jnp.exp(sc)                                              # f32 softmax
            p = p * pl.reciprocal(jnp.sum(p, axis=-1, keepdims=True), approx=True)
            o = jnp.einsum('bqk,bkd->bqd', p.astype(jnp.bfloat16), v,
                           preferred_element_type=jnp.float32)           # (Bt, S, dh)
            heads.append(o.reshape(N, dh))
        o = heads[0] if H == 1 else jnp.concatenate(heads, axis=-1)      # (N, D), head-major

        # Merged-head output projection: ONE (N, D) x (D, D) matmul (full contraction depth).
        attn = jnp.dot(o.astype(jnp.bfloat16), wo_ref[li],
                       preferred_element_type=jnp.float32) + bo_ref[li]
        x2 = x2 + attn

        # ----- MLP -------------------------------------------------------------
        h2_bf = layernorm(x2, ln2w_ref[li], ln2b_ref[li]).astype(jnp.bfloat16)
        wfc, bfc, wpr = wfc_ref[li], bfc_ref[li], wpr_ref[li]
        if mlp_chunks == 1:
            f = jnp.dot(h2_bf, wfc, preferred_element_type=jnp.float32) + bfc
            f = f * jax.nn.sigmoid(1.702 * f)                            # QuickGELU, f32
            mlp = jnp.dot(f.astype(jnp.bfloat16), wpr,
                          preferred_element_type=jnp.float32)
        else:
            # Chunk the 4D hidden dim to cap the live (N, 4D) f32 intermediate.
            mlp = jnp.zeros((N, D), jnp.float32)
            for c in range(mlp_chunks):
                c0, c1 = c * fchunk, (c + 1) * fchunk
                f = jnp.dot(h2_bf, wfc[:, c0:c1],
                            preferred_element_type=jnp.float32) + bfc[:, c0:c1]
                f = f * jax.nn.sigmoid(1.702 * f)
                mlp = mlp + jnp.dot(f.astype(jnp.bfloat16), wpr[c0:c1, :],
                                    preferred_element_type=jnp.float32)
        x2 = x2 + mlp + bpr_ref[li]

    out_ref[...] = x2.reshape(Bt, S, D).astype(out_ref.dtype)


# ---------------------------------------------------------------------------
# Parameter prep: PyTorch-shaped params -> kernel layout, stacked over layers
# ---------------------------------------------------------------------------
def _prep_layer(p, num_heads):
    (ln1_w, ln1_b, in_proj_w, in_proj_b, out_w, out_b,
     ln2_w, ln2_b, fc_w, fc_b, proj_w, proj_b) = p
    D = ln1_w.shape[0]
    dh = D // num_heads
    scale = 1.0 / (dh ** 0.5)
    f32, bf16 = jnp.float32, jnp.bfloat16

    wqkv = in_proj_w.T.astype(f32)                   # (D, 3D), columns = [q | k | v]
    wqkv = wqkv.at[:, :D].multiply(scale)            # fold 1/sqrt(dh) into Q weights
    bqkv = in_proj_b.astype(f32).at[:D].multiply(scale)

    return (
        wqkv.astype(bf16),                           # (D, 3D)
        bqkv.reshape(1, 3 * D),                      # (1, 3D) f32
        out_w.T.astype(bf16),                        # (D, D)
        out_b.reshape(1, D).astype(f32),             # (1, D)
        ln1_w.reshape(1, D).astype(f32), ln1_b.reshape(1, D).astype(f32),
        ln2_w.reshape(1, D).astype(f32), ln2_b.reshape(1, D).astype(f32),
        fc_w.T.astype(bf16),                         # (D, 4D)
        fc_b.reshape(1, 4 * D).astype(f32),          # (1, 4D)
        proj_w.T.astype(bf16),                       # (4D, D)
        proj_b.reshape(1, D).astype(f32),            # (1, D)
    )


def _prep_params(layer_params, num_heads):
    per_layer = [_prep_layer(p, num_heads) for p in layer_params]
    n = len(per_layer[0])
    return [jnp.stack([lp[i] for lp in per_layer], axis=0) for i in range(n)]


def _pick_block_b(B, S, target_rows=512):
    """Largest batch block with Bt*S <= target_rows, keeping >= 2 grid steps when
    possible so the 'parallel' batch axis can split across v7x's two TensorCores."""
    best = 1
    for cand in range(1, B + 1):
        if B % cand == 0 and cand * S <= target_rows:
            best = cand
    if best == B and B > 1:
        for cand in range(B // 2, 0, -1):
            if B % cand == 0:
                return cand
    return best


def _resident_w_spec(w):
    zeros = (0,) * w.ndim
    # Constant index map -> no re-DMA across grid steps; single-buffer to halve VMEM.
    return pl.BlockSpec(w.shape, lambda b, _z=zeros: _z,
                        pipeline_mode=pl.Buffered(1))


def _stream_w_spec(w):
    tail = (0,) * (w.ndim - 1)
    # One layer slab per grid step, default double-buffered -> next layer prefetched.
    return pl.BlockSpec((1,) + w.shape[1:], lambda b, l, _t=tail: (l,) + _t)


def temporal_transformer_pallas(x_sbd, layer_params, num_heads, *,
                                block_b=None, stream_layers=None,
                                mlp_chunks=None, target_rows=512):
    # TODO(synk): attn_mask is not implemented (TemporalTransformer default is None).
    S, B, D = x_sbd.shape
    L = len(layer_params)
    assert D % num_heads == 0
    out_dtype = x_sbd.dtype

    x = jnp.transpose(x_sbd, (1, 0, 2))                        # (B, S, D)
    stacked = _prep_params(layer_params, num_heads)            # 12 arrays, leading dim L

    Bt = _pick_block_b(B, S, target_rows) if block_b is None else block_b
    assert B % Bt == 0
    nb = B // Bt
    N = Bt * S
    F = 4 * D

    if mlp_chunks is None:
        mlp_chunks = 2 if (N * F * 4 > (4 << 20) and F % 256 == 0) else 1
    assert F % mlp_chunks == 0

    weight_bytes = sum(int(w.size) * w.dtype.itemsize for w in stacked)
    if stream_layers is None:
        # All-resident weights only when they comfortably fit in VMEM; otherwise stream
        # one layer per grid step (prefetched under the previous layer's compute).
        stream_layers = weight_bytes > (40 << 20)

    if stream_layers:
        grid = (nb, L)
        x_spec = pl.BlockSpec((Bt, S, D), lambda b, l: (b, 0, 0))
        out_spec = pl.BlockSpec((Bt, S, D), lambda b, l: (b, 0, 0))
        w_specs = [_stream_w_spec(w) for w in stacked]
        dim_sem = ("parallel", "arbitrary")
        nl = 1
        resident_w = 2 * (weight_bytes // L)                   # double-buffered layer slabs
    else:
        grid = (nb,)
        x_spec = pl.BlockSpec((Bt, S, D), lambda b: (b, 0, 0))
        out_spec = pl.BlockSpec((Bt, S, D), lambda b: (b, 0, 0))
        w_specs = [_resident_w_spec(w) for w in stacked]
        dim_sem = ("parallel",)
        nl = L
        resident_w = weight_bytes                              # single-buffered

    # Explicit VMEM budget: resident weights + in/out blocks + f32 intermediates.
    io_bytes = 2 * Bt * S * D * (x.dtype.itemsize + jnp.dtype(out_dtype).itemsize)
    act_bytes = N * (3 * D + F // mlp_chunks + 6 * D) * 4
    need = resident_w + io_bytes + act_bytes
    try:
        phys = int(pltpu.get_tpu_info().vmem_capacity_bytes)
    except Exception:
        phys = 64 << 20                                        # v7x floor
    vmem_limit = int(min(max(need * 3 // 2 + (4 << 20), 32 << 20), phys * 7 // 8))

    kernel = functools.partial(
        _transformer_kernel, num_heads=num_heads, nl=nl,
        streaming=stream_layers, mlp_chunks=mlp_chunks, eps=1e-12)

    out = pl.pallas_call(
        kernel,
        out_shape=jax.ShapeDtypeStruct((B, S, D), out_dtype),
        grid=grid,
        in_specs=[x_spec] + w_specs,
        out_specs=out_spec,
        compiler_params=pltpu.CompilerParams(
            dimension_semantics=dim_sem,
            vmem_limit_bytes=vmem_limit),
    )(x, *stacked)
    return jnp.transpose(out, (1, 0, 2))                       # back to (S, B, D)


# ---------------------------------------------------------------------------
# Pure-JAX f32 reference (mirrors the PyTorch module exactly)
# ---------------------------------------------------------------------------
def _ref_layernorm(x, w, b, eps=1e-12):
    u = jnp.mean(x, axis=-1, keepdims=True)
    s = jnp.mean((x - u) ** 2, axis=-1, keepdims=True)
    return w * ((x - u) / jnp.sqrt(s + eps)) + b


def _ref_block(x_sbd, p, num_heads):
    (ln1_w, ln1_b, in_proj_w, in_proj_b, out_w, out_b,
     ln2_w, ln2_b, fc_w, fc_b, proj_w, proj_b) = p
    S, B, D = x_sbd.shape
    dh = D // num_heads
    h = _ref_layernorm(x_sbd, ln1_w, ln1_b)
    qkv = h @ in_proj_w.T + in_proj_b
    q, k, v = jnp.split(qkv, 3, axis=-1)             # each (S, B, D)

    def split_heads(t):                              # -> (B, H, S, dh)
        return jnp.transpose(t.reshape(S, B, num_heads, dh), (1, 2, 0, 3))

    qh, kh, vh = split_heads(q), split_heads(k), split_heads(v)
    sc = jnp.einsum('bhsd,bhtd->bhst', qh * (dh ** -0.5), kh)
    pr = jax.nn.softmax(sc, axis=-1)
    o = jnp.einsum('bhst,bhtd->bhsd', pr, vh)
    o = jnp.transpose(o, (2, 0, 1, 3)).reshape(S, B, D)
    x = x_sbd + (o @ out_w.T + out_b)
    h2 = _ref_layernorm(x, ln2_w, ln2_b)
    f = h2 @ fc_w.T + fc_b
    f = f * jax.nn.sigmoid(1.702 * f)
    return x + (f @ proj_w.T + proj_b)


def temporal_transformer_ref(x_sbd, layer_params, num_heads):
    x = x_sbd
    for p in layer_params:
        x = _ref_block(x, p, num_heads)
    return x


# ---------------------------------------------------------------------------
# Deterministic parameter init (PyTorch-shaped, matches the nn.Module)
# ---------------------------------------------------------------------------
def make_layer_params(key, width):
    D = width
    ks = jax.random.split(key, 6)
    std = 0.02
    in_proj_w = jax.random.normal(ks[0], (3 * D, D), jnp.float32) * std
    in_proj_b = jax.random.normal(ks[1], (3 * D,), jnp.float32) * std
    out_w = jax.random.normal(ks[2], (D, D), jnp.float32) * std
    out_b = jnp.zeros((D,), jnp.float32)
    fc_w = jax.random.normal(ks[3], (4 * D, D), jnp.float32) * std
    fc_b = jax.random.normal(ks[4], (4 * D,), jnp.float32) * std
    proj_w = jax.random.normal(ks[5], (D, 4 * D), jnp.float32) * std
    proj_b = jnp.zeros((D,), jnp.float32)
    ln1_w, ln1_b = jnp.ones((D,), jnp.float32), jnp.zeros((D,), jnp.float32)
    ln2_w, ln2_b = jnp.ones((D,), jnp.float32), jnp.zeros((D,), jnp.float32)
    return (ln1_w, ln1_b, in_proj_w, in_proj_b, out_w, out_b,
            ln2_w, ln2_b, fc_w, fc_b, proj_w, proj_b)


if __name__ == "__main__":
    WIDTH, LAYERS, HEADS = 32, 2, 4
    SEQ, BATCH = 8, 8

    root = jax.random.PRNGKey(0)
    kx, *kls = jax.random.split(root, LAYERS + 1)
    x = jax.random.normal(kx, (SEQ, BATCH, WIDTH), jnp.float32)   # (S, B, D)
    layer_params = [make_layer_params(k, WIDTH) for k in kls]

    ref = temporal_transformer_ref(x, layer_params, HEADS)

    # Mode 1: all layers' weights resident in VMEM (single-buffered constant blocks).
    out = jax.block_until_ready(
        temporal_transformer_pallas(x, layer_params, HEADS, stream_layers=False))
    assert out.shape == (SEQ, BATCH, WIDTH)
    err = float(jnp.max(jnp.abs(out - ref)))
    assert jnp.allclose(out, ref, atol=2e-2, rtol=2e-2), f"resident max err {err}"

    # Mode 2: layer-streaming grid (production-size path); residual stays in VMEM.
    out_s = jax.block_until_ready(
        temporal_transformer_pallas(x, layer_params, HEADS, stream_layers=True))
    err_s = float(jnp.max(jnp.abs(out_s - ref)))
    assert jnp.allclose(out_s, ref, atol=2e-2, rtol=2e-2), f"streaming max err {err_s}"

    # Mode 3: chunked-MLP path (for VMEM-tight configurations).
    out_c = jax.block_until_ready(
        temporal_transformer_pallas(x, layer_params, HEADS,
                                    stream_layers=False, mlp_chunks=2))
    err_c = float(jnp.max(jnp.abs(out_c - ref)))
    assert jnp.allclose(out_c, ref, atol=2e-2, rtol=2e-2), f"chunked-mlp max err {err_c}"

    print("KERNEL_OK")
</pallas_src>

<mosaic_0001>
module attributes {stable_mosaic.version = 11 : i64} {
  func.func @_transformer_kernel(%arg0: i32, %arg1: memref<4x8x32xf32, #tpu.memory_space<vmem>>, %arg2: memref<2x32x96xbf16, #tpu.memory_space<vmem>>, %arg3: memref<2x1x96xf32, #tpu.memory_space<vmem>>, %arg4: memref<2x32x32xbf16, #tpu.memory_space<vmem>>, %arg5: memref<2x1x32xf32, #tpu.memory_space<vmem>>, %arg6: memref<2x1x32xf32, #tpu.memory_space<vmem>>, %arg7: memref<2x1x32xf32, #tpu.memory_space<vmem>>, %arg8: memref<2x1x32xf32, #tpu.memory_space<vmem>>, %arg9: memref<2x1x32xf32, #tpu.memory_space<vmem>>, %arg10: memref<2x32x128xbf16, #tpu.memory_space<vmem>>, %arg11: memref<2x1x128xf32, #tpu.memory_space<vmem>>, %arg12: memref<2x128x32xbf16, #tpu.memory_space<vmem>>, %arg13: memref<2x1x32xf32, #tpu.memory_space<vmem>>, %arg14: memref<4x8x32xf32, #tpu.memory_space<vmem>>) attributes {dimension_semantics = [#tpu.dimension_semantics<parallel>], iteration_bounds = array<i64: 2>, scalar_prefetch = 0 : i64, scratch_operands = 0 : i64, tpu.core_type = #tpu.core_type<tc>, window_params = [{transform_indices = @transform_0, window_bounds = array<i64: 4, 8, 32>}, {pipeline_mode = #tpu.pipeline_mode<synchronous>, transform_indices = @transform_1, window_bounds = array<i64: 2, 32, 96>}, {pipeline_mode = #tpu.pipeline_mode<synchronous>, transform_indices = @transform_2, window_bounds = array<i64: 2, 1, 96>}, {pipeline_mode = #tpu.pipeline_mode<synchronous>, transform_indices = @transform_3, window_bounds = array<i64: 2, 32, 32>}, {pipeline_mode = #tpu.pipeline_mode<synchronous>, transform_indices = @transform_4, window_bounds = array<i64: 2, 1, 32>}, {pipeline_mode = #tpu.pipeline_mode<synchronous>, transform_indices = @transform_5, window_bounds = array<i64: 2, 1, 32>}, {pipeline_mode = #tpu.pipeline_mode<synchronous>, transform_indices = @transform_6, window_bounds = array<i64: 2, 1, 32>}, {pipeline_mode = #tpu.pipeline_mode<synchronous>, transform_indices = @transform_7, window_bounds = array<i64: 2, 1, 32>}, {pipeline_mode = #tpu.pipeline_mode<synchronous>, transform_indices = @transform_8, window_bounds = array<i64: 2, 1, 32>}, {pipeline_mode = #tpu.pipeline_mode<synchronous>, transform_indices = @transform_9, window_bounds = array<i64: 2, 32, 128>}, {pipeline_mode = #tpu.pipeline_mode<synchronous>, transform_indices = @transform_10, window_bounds = array<i64: 2, 1, 128>}, {pipeline_mode = #tpu.pipeline_mode<synchronous>, transform_indices = @transform_11, window_bounds = array<i64: 2, 128, 32>}, {pipeline_mode = #tpu.pipeline_mode<synchronous>, transform_indices = @transform_12, window_bounds = array<i64: 2, 1, 32>}, {transform_indices = @transform_13, window_bounds = array<i64: 4, 8, 32>}]} {
    %c0 = arith.constant 0 : index
    %c0_0 = arith.constant 0 : index
    %c0_1 = arith.constant 0 : index
    %0 = vector.load %arg1[%c0, %c0_0, %c0_1] : memref<4x8x32xf32, #tpu.memory_space<vmem>>, vector<4x8x32xf32>
    %1 = vector.shape_cast %0 : vector<4x8x32xf32> to vector<32x32xf32>
    %c0_2 = arith.constant 0 : index
    %c0_3 = arith.constant 0 : index
    %c0_4 = arith.constant 0 : index
    %2 = vector.load %arg6[%c0_2, %c0_3, %c0_4] : memref<2x1x32xf32, #tpu.memory_space<vmem>>, vector<1x1x32xf32>
    %3 = vector.shape_cast %2 : vector<1x1x32xf32> to vector<1x32xf32>
    %c0_5 = arith.constant 0 : index
    %c0_6 = arith.constant 0 : index
    %c0_7 = arith.constant 0 : index
    %4 = vector.load %arg7[%c0_5, %c0_6, %c0_7] : memref<2x1x32xf32, #tpu.memory_space<vmem>>, vector<1x1x32xf32>
    %5 = vector.shape_cast %4 : vector<1x1x32xf32> to vector<1x32xf32>
    %cst = arith.constant dense<0.000000e+00> : vector<32xf32>
    %6 = vector.multi_reduction <add>, %1, %cst [1] : vector<32x32xf32> to vector<32xf32>
    %7 = vector.shape_cast %6 : vector<32xf32> to vector<32x1xf32>
    %cst_8 = arith.constant 3.200000e+01 : f32
    %8 = vector.broadcast %cst_8 : f32 to vector<32x1xf32>
    %9 = arith.divf %7, %8 : vector<32x1xf32>
    %10 = arith.mulf %1, %1 : vector<32x32xf32>
    %cst_9 = arith.constant dense<0.000000e+00> : vector<32xf32>
    %11 = vector.multi_reduction <add>, %10, %cst_9 [1] : vector<32x32xf32> to vector<32xf32>
    %12 = vector.shape_cast %11 : vector<32xf32> to vector<32x1xf32>
    %cst_10 = arith.constant 3.200000e+01 : f32
    %13 = vector.broadcast %cst_10 : f32 to vector<32x1xf32>
    %14 = arith.divf %12, %13 : vector<32x1xf32>
    %15 = arith.mulf %9, %9 : vector<32x1xf32>
    %16 = arith.subf %14, %15 : vector<32x1xf32>
    %cst_11 = arith.constant 0.000000e+00 : f32
    %17 = vector.broadcast %cst_11 : f32 to vector<32x1xf32>
    %18 = arith.maximumf %16, %17 : vector<32x1xf32>
    %19 = vector.broadcast %9 : vector<32x1xf32> to vector<32x32xf32>
    %20 = arith.subf %1, %19 : vector<32x32xf32>
    %cst_12 = arith.constant 9.99999996E-13 : f32
    %21 = vector.broadcast %cst_12 : f32 to vector<32x1xf32>
    %22 = arith.addf %18, %21 : vector<32x1xf32>
    %23 = math.rsqrt %22 : vector<32x1xf32>
    %24 = vector.broadcast %23 : vector<32x1xf32> to vector<32x32xf32>
    %25 = arith.mulf %20, %24 : vector<32x32xf32>
    %26 = vector.broadcast %3 : vector<1x32xf32> to vector<32x32xf32>
    %27 = arith.mulf %26, %25 : vector<32x32xf32>
    %28 = vector.broadcast %5 : vector<1x32xf32> to vector<32x32xf32>
    %29 = arith.addf %27, %28 : vector<32x32xf32>
    %30 = arith.truncf %29 : vector<32x32xf32> to vector<32x32xbf16>
    %c0_13 = arith.constant 0 : index
    %c0_14 = arith.constant 0 : index
    %c0_15 = arith.constant 0 : index
    %31 = vector.load %arg2[%c0_13, %c0_14, %c0_15] : memref<2x32x96xbf16, #tpu.memory_space<vmem>>, vector<1x32x96xbf16>
    %32 = vector.shape_cast %31 : vector<1x32x96xbf16> to vector<32x96xbf16>
    %cst_16 = arith.constant dense<0.000000e+00> : vector<32x96xf32>
    %33 = tpu.matmul %30, %32, %cst_16 {dimension_numbers = #tpu.dot_dimension_numbers<[1], [0], [0], [1], [0, 0, 1, 1], [], []>} : vector<32x32xbf16>, vector<32x96xbf16>, vector<32x96xf32> -> vector<32x96xf32>
    %c0_17 = arith.constant 0 : index
    %c0_18 = arith.constant 0 : index
    %c0_19 = arith.constant 0 : index
    %34 = vector.load %arg3[%c0_17, %c0_18, %c0_19] : memref<2x1x96xf32, #tpu.memory_space<vmem>>, vector<1x1x96xf32>
    %35 = vector.shape_cast %34 : vector<1x1x96xf32> to vector<1x96xf32>
    %36 = vector.broadcast %35 : vector<1x96xf32> to vector<32x96xf32>
    %37 = arith.addf %33, %36 : vector<32x96xf32>
    %38 = vector.extract_strided_slice %37 {offsets = [0, 0], sizes = [32, 8], strides = [1, 1]} : vector<32x96xf32> to vector<32x8xf32>
    %39 = vector.shape_cast %38 : vector<32x8xf32> to vector<4x8x8xf32>
    %40 = arith.truncf %39 : vector<4x8x8xf32> to vector<4x8x8xbf16>
    %41 = vector.extract_strided_slice %37 {offsets = [0, 32], sizes = [32, 8], strides = [1, 1]} : vector<32x96xf32> to vector<32x8xf32>
    %42 = vector.shape_cast %41 : vector<32x8xf32> to vector<4x8x8xf32>
    %43 = arith.truncf %42 : vector<4x8x8xf32> to vector<4x8x8xbf16>
    %44 = vector.extract_strided_slice %37 {offsets = [0, 64], sizes = [32, 8], strides = [1, 1]} : vector<32x96xf32> to vector<32x8xf32>
    %45 = vector.shape_cast %44 : vector<32x8xf32> to vector<4x8x8xf32>
    %46 = arith.truncf %45 : vector<4x8x8xf32> to vector<4x8x8xbf16>
    "tpu.trace_start"() <{level = 10 : i32, message = "bqd,bkd->bqk"}> : () -> ()
    %cst_20 = arith.constant dense<0.000000e+00> : vector<4x8x8xf32>
    %47 = tpu.matmul %40, %43, %cst_20 {dimension_numbers = #tpu.dot_dimension_numbers<[2], [2], [1], [1], [0, 0, 0, 1, 1, 1], [0], [0]>} : vector<4x8x8xbf16>, vector<4x8x8xbf16>, vector<4x8x8xf32> -> vector<4x8x8xf32>
    "tpu.trace_stop"() : () -> ()
    %cst_21 = arith.constant dense<0xFF800000> : vector<4x8xf32>
    %48 = vector.multi_reduction <maximumf>, %47, %cst_21 [2] : vector<4x8x8xf32> to vector<4x8xf32>
    %49 = vector.shape_cast %48 : vector<4x8xf32> to vector<4x8x1xf32>
    %50 = vector.broadcast %49 : vector<4x8x1xf32> to vector<4x8x8xf32>
    %51 = arith.subf %47, %50 : vector<4x8x8xf32>
    %52 = math.exp %51 : vector<4x8x8xf32>
    %cst_22 = arith.constant dense<0.000000e+00> : vector<4x8xf32>
    %53 = vector.multi_reduction <add>, %52, %cst_22 [2] : vector<4x8x8xf32> to vector<4x8xf32>
    %54 = vector.shape_cast %53 : vector<4x8xf32> to vector<4x8x1xf32>
    %55 = tpu.reciprocal %54 {approx = true} : vector<4x8x1xf32> -> vector<4x8x1xf32>
    %56 = vector.broadcast %55 : vector<4x8x1xf32> to vector<4x8x8xf32>
    %57 = arith.mulf %52, %56 : vector<4x8x8xf32>
    %58 = arith.truncf %57 : vector<4x8x8xf32> to vector<4x8x8xbf16>
    "tpu.trace_start"() <{level = 10 : i32, message = "bqk,bkd->bqd"}> : () -> ()
    %cst_23 = arith.constant dense<0.000000e+00> : vector<4x8x8xf32>
    %59 = tpu.matmul %58, %46, %cst_23 {dimension_numbers = #tpu.dot_dimension_numbers<[2], [1], [1], [2], [0, 0, 0, 1, 1, 2], [0], [0]>} : vector<4x8x8xbf16>, vector<4x8x8xbf16>, vector<4x8x8xf32> -> vector<4x8x8xf32>
    "tpu.trace_stop"() : () -> ()
    %60 = vector.shape_cast %59 : vector<4x8x8xf32> to vector<32x8xf32>
    %61 = vector.extract_strided_slice %37 {offsets = [0, 8], sizes = [32, 8], strides = [1, 1]} : vector<32x96xf32> to vector<32x8xf32>
    %62 = vector.shape_cast %61 : vector<32x8xf32> to vector<4x8x8xf32>
    %63 = arith.truncf %62 : vector<4x8x8xf32> to vector<4x8x8xbf16>
    %64 = vector.extract_strided_slice %37 {offsets = [0, 40], sizes = [32, 8], strides = [1, 1]} : vector<32x96xf32> to vector<32x8xf32>
    %65 = vector.shape_cast %64 : vector<32x8xf32> to vector<4x8x8xf32>
    %66 = arith.truncf %65 : vector<4x8x8xf32> to vector<4x8x8xbf16>
    %67 = vector.extract_strided_slice %37 {offsets = [0, 72], sizes = [32, 8], strides = [1, 1]} : vector<32x96xf32> to vector<32x8xf32>
    %68 = vector.shape_cast %67 : vector<32x8xf32> to vector<4x8x8xf32>
    %69 = arith.truncf %68 : vector<4x8x8xf32> to vector<4x8x8xbf16>
    "tpu.trace_start"() <{level = 10 : i32, message = "bqd,bkd->bqk"}> : () -> ()
    %cst_24 = arith.constant dense<0.000000e+00> : vector<4x8x8xf32>
    %70 = tpu.matmul %63, %66, %cst_24 {dimension_numbers = #tpu.dot_dimension_numbers<[2], [2], [1], [1], [0, 0, 0, 1, 1, 1], [0], [0]>} : vector<4x8x8xbf16>, vector<4x8x8xbf16>, vector<4x8x8xf32> -> vector<4x8x8xf32>
    "tpu.trace_stop"() : () -> ()
    %cst_25 = arith.constant dense<0xFF800000> : vector<4x8xf32>
    %71 = vector.multi_reduction <maximumf>, %70, %cst_25 [2] : vector<4x8x8xf32> to vector<4x8xf32>
    %72 = vector.shape_cast %71 : vector<4x8xf32> to vector<4x8x1xf32>
    %73 = vector.broadcast %72 : vector<4x8x1xf32> to vector<4x8x8xf32>
    %74 = arith.subf %70, %73 : vector<4x8x8xf32>
    %75 = math.exp %74 : vector<4x8x8xf32>
    %cst_26 = arith.constant dense<0.000000e+00> : vector<4x8xf32>
    %76 = vector.multi_reduction <add>, %75, %cst_26 [2] : vector<4x8x8xf32> to vector<4x8xf32>
    %77 = vector.shape_cast %76 : vector<4x8xf32> to vector<4x8x1xf32>
    %78 = tpu.reciprocal %77 {approx = true} : vector<4x8x1xf32> -> vector<4x8x1xf32>
    %79 = vector.broadcast %78 : vector<4x8x1xf32> to vector<4x8x8xf32>
    %80 = arith.mulf %75, %79 : vector<4x8x8xf32>
    %81 = arith.truncf %80 : vector<4x8x8xf32> to vector<4x8x8xbf16>
    "tpu.trace_start"() <{level = 10 : i32, message = "bqk,bkd->bqd"}> : () -> ()
    %cst_27 = arith.constant dense<0.000000e+00> : vector<4x8x8xf32>
    %82 = tpu.matmul %81, %69, %cst_27 {dimension_numbers = #tpu.dot_dimension_numbers<[2], [1], [1], [2], [0, 0, 0, 1, 1, 2], [0], [0]>} : vector<4x8x8xbf16>, vector<4x8x8xbf16>, vector<4x8x8xf32> -> vector<4x8x8xf32>
    "tpu.trace_stop"() : () -> ()
    %83 = vector.shape_cast %82 : vector<4x8x8xf32> to vector<32x8xf32>
    %84 = vector.extract_strided_slice %37 {offsets = [0, 16], sizes = [32, 8], strides = [1, 1]} : vector<32x96xf32> to vector<32x8xf32>
    %85 = vector.shape_cast %84 : vector<32x8xf32> to vector<4x8x8xf32>
    %86 = arith.truncf %85 : vector<4x8x8xf32> to vector<4x8x8xbf16>
    %87 = vector.extract_strided_slice %37 {offsets = [0, 48], sizes = [32, 8], strides = [1, 1]} : vector<32x96xf32> to vector<32x8xf32>
    %88 = vector.shape_cast %87 : vector<32x8xf32> to vector<4x8x8xf32>
    %89 = arith.truncf %88 : vector<4x8x8xf32> to vector<4x8x8xbf16>
    %90 = vector.extract_strided_slice %37 {offsets = [0, 80], sizes = [32, 8], strides = [1, 1]} : vector<32x96xf32> to vector<32x8xf32>
    %91 = vector.shape_cast %90 : vector<32x8xf32> to vector<4x8x8xf32>
    %92 = arith.truncf %91 : vector<4x8x8xf32> to vector<4x8x8xbf16>
    "tpu.trace_start"() <{level = 10 : i32, message = "bqd,bkd->bqk"}> : () -> ()
    %cst_28 = arith.constant dense<0.000000e+00> : vector<4x8x8xf32>
    %93 = tpu.matmul %86, %89, %cst_28 {dimension_numbers = #tpu.dot_dimension_numbers<[2], [2], [1], [1], [0, 0, 0, 1, 1, 1], [0], [0]>} : vector<4x8x8xbf16>, vector<4x8x8xbf16>, vector<4x8x8xf32> -> vector<4x8x8xf32>
    "tpu.trace_stop"() : () -> ()
    %cst_29 = arith.constant dense<0xFF800000> : vector<4x8xf32>
    %94 = vector.multi_reduction <maximumf>, %93, %cst_29 [2] : vector<4x8x8xf32> to vector<4x8xf32>
    %95 = vector.shape_cast %94 : vector<4x8xf32> to vector<4x8x1xf32>
    %96 = vector.broadcast %95 : vector<4x8x1xf32> to vector<4x8x8xf32>
    %97 = arith.subf %93, %96 : vector<4x8x8xf32>
    %98 = math.exp %97 : vector<4x8x8xf32>
    %cst_30 = arith.constant dense<0.000000e+00> : vector<4x8xf32>
    %99 = vector.multi_reduction <add>, %98, %cst_30 [2] : vector<4x8x8xf32> to vector<4x8xf32>
    %100 = vector.shape_cast %99 : vector<4x8xf32> to vector<4x8x1xf32>
    %101 = tpu.reciprocal %100 {approx = true} : vector<4x8x1xf32> -> vector<4x8x1xf32>
    %102 = vector.broadcast %101 : vector<4x8x1xf32> to vector<4x8x8xf32>
    %103 = arith.mulf %98, %102 : vector<4x8x8xf32>
    %104 = arith.truncf %103 : vector<4x8x8xf32> to vector<4x8x8xbf16>
    "tpu.trace_start"() <{level = 10 : i32, message = "bqk,bkd->bqd"}> : () -> ()
    %cst_31 = arith.constant dense<0.000000e+00> : vector<4x8x8xf32>
    %105 = tpu.matmul %104, %92, %cst_31 {dimension_numbers = #tpu.dot_dimension_numbers<[2], [1], [1], [2], [0, 0, 0, 1, 1, 2], [0], [0]>} : vector<4x8x8xbf16>, vector<4x8x8xbf16>, vector<4x8x8xf32> -> vector<4x8x8xf32>
    "tpu.trace_stop"() : () -> ()
    %106 = vector.shape_cast %105 : vector<4x8x8xf32> to vector<32x8xf32>
    %107 = vector.extract_strided_slice %37 {offsets = [0, 24], sizes = [32, 8], strides = [1, 1]} : vector<32x96xf32> to vector<32x8xf32>
    %108 = vector.shape_cast %107 : vector<32x8xf32> to vector<4x8x8xf32>
    %109 = arith.truncf %108 : vector<4x8x8xf32> to vector<4x8x8xbf16>
    %110 = vector.extract_strided_slice %37 {offsets = [0, 56], sizes = [32, 8], strides = [1, 1]} : vector<32x96xf32> to vector<32x8xf32>
    %111 = vector.shape_cast %110 : vector<32x8xf32> to vector<4x8x8xf32>
    %112 = arith.truncf %111 : vector<4x8x8xf32> to vector<4x8x8xbf16>
    %113 = vector.extract_strided_slice %37 {offsets = [0, 88], sizes = [32, 8], strides = [1, 1]} : vector<32x96xf32> to vector<32x8xf32>
    %114 = vector.shape_cast %113 : vector<32x8xf32> to vector<4x8x8xf32>
    %115 = arith.truncf %114 : vector<4x8x8xf32> to vector<4x8x8xbf16>
    "tpu.trace_start"() <{level = 10 : i32, message = "bqd,bkd->bqk"}> : () -> ()
    %cst_32 = arith.constant dense<0.000000e+00> : vector<4x8x8xf32>
    %116 = tpu.matmul %109, %112, %cst_32 {dimension_numbers = #tpu.dot_dimension_numbers<[2], [2], [1], [1], [0, 0, 0, 1, 1, 1], [0], [0]>} : vector<4x8x8xbf16>, vector<4x8x8xbf16>, vector<4x8x8xf32> -> vector<4x8x8xf32>
    "tpu.trace_stop"() : () -> ()
    %cst_33 = arith.constant dense<0xFF800000> : vector<4x8xf32>
    %117 = vector.multi_reduction <maximumf>, %116, %cst_33 [2] : vector<4x8x8xf32> to vector<4x8xf32>
    %118 = vector.shape_cast %117 : vector<4x8xf32> to vector<4x8x1xf32>
    %119 = vector.broadcast %118 : vector<4x8x1xf32> to vector<4x8x8xf32>
    %120 = arith.subf %116, %119 : vector<4x8x8xf32>
    %121 = math.exp %120 : vector<4x8x8xf32>
    %cst_34 = arith.constant dense<0.000000e+00> : vector<4x8xf32>
    %122 = vector.multi_reduction <add>, %121, %cst_34 [2] : vector<4x8x8xf32> to vector<4x8xf32>
    %123 = vector.shape_cast %122 : vector<4x8xf32> to vector<4x8x1xf32>
    %124 = tpu.reciprocal %123 {approx = true} : vector<4x8x1xf32> -> vector<4x8x1xf32>
    %125 = vector.broadcast %124 : vector<4x8x1xf32> to vector<4x8x8xf32>
    %126 = arith.mulf %121, %125 : vector<4x8x8xf32>
    %127 = arith.truncf %126 : vector<4x8x8xf32> to vector<4x8x8xbf16>
    "tpu.trace_start"() <{level = 10 : i32, message = "bqk,bkd->bqd"}> : () -> ()
    %cst_35 = arith.constant dense<0.000000e+00> : vector<4x8x8xf32>
    %128 = tpu.matmul %127, %115, %cst_35 {dimension_numbers = #tpu.dot_dimension_numbers<[2], [1], [1], [2], [0, 0, 0, 1, 1, 2], [0], [0]>} : vector<4x8x8xbf16>, vector<4x8x8xbf16>, vector<4x8x8xf32> -> vector<4x8x8xf32>
    "tpu.trace_stop"() : () -> ()
    %129 = vector.shape_cast %128 : vector<4x8x8xf32> to vector<32x8xf32>
    %130 = tpu.concatenate %60, %83, %106, %129 in 1 : vector<32x8xf32>, vector<32x8xf32>, vector<32x8xf32>, vector<32x8xf32> -> vector<32x32xf32>
    %131 = arith.truncf %130 : vector<32x32xf32> to vector<32x32xbf16>
    %c0_36 = arith.constant 0 : index
    %c0_37 = arith.constant 0 : index
    %c0_38 = arith.constant 0 : index
    %132 = vector.load %arg4[%c0_36, %c0_37, %c0_38] : memref<2x32x32xbf16, #tpu.memory_space<vmem>>, vector<1x32x32xbf16>
    %133 = vector.shape_cast %132 : vector<1x32x32xbf16> to vector<32x32xbf16>
    %cst_39 = arith.constant dense<0.000000e+00> : vector<32x32xf32>
    %134 = tpu.matmul %131, %133, %cst_39 {dimension_numbers = #tpu.dot_dimension_numbers<[1], [0], [0], [1], [0, 0, 1, 1], [], []>} : vector<32x32xbf16>, vector<32x32xbf16>, vector<32x32xf32> -> vector<32x32xf32>
    %c0_40 = arith.constant 0 : index
    %c0_41 = arith.constant 0 : index
    %c0_42 = arith.constant 0 : index
    %135 = vector.load %arg5[%c0_40, %c0_41, %c0_42] : memref<2x1x32xf32, #tpu.memory_space<vmem>>, vector<1x1x32xf32>
    %136 = vector.shape_cast %135 : vector<1x1x32xf32> to vector<1x32xf32>
    %137 = vector.broadcast %136 : vector<1x32xf32> to vector<32x32xf32>
    %138 = arith.addf %134, %137 : vector<32x32xf32>
    %139 = arith.addf %1, %138 : vector<32x32xf32>
    %c0_43 = arith.constant 0 : index
    %c0_44 = arith.constant 0 : index
    %c0_45 = arith.constant 0 : index
    %140 = vector.load %arg8[%c0_43, %c0_44, %c0_45] : memref<2x1x32xf32, #tpu.memory_space<vmem>>, vector<1x1x32xf32>
    %141 = vector.shape_cast %140 : vector<1x1x32xf32> to vector<1x32xf32>
    %c0_46 = arith.constant 0 : index
    %c0_47 = arith.constant 0 : index
    %c0_48 = arith.constant 0 : index
    %142 = vector.load %arg9[%c0_46, %c0_47, %c0_48] : memref<2x1x32xf32, #tpu.memory_space<vmem>>, vector<1x1x32xf32>
    %143 = vector.shape_cast %142 : vector<1x1x32xf32> to vector<1x32xf32>
    %cst_49 = arith.constant dense<0.000000e+00> : vector<32xf32>
    %144 = vector.multi_reduction <add>, %139, %cst_49 [1] : vector<32x32xf32> to vector<32xf32>
    %145 = vector.shape_cast %144 : vector<32xf32> to vector<32x1xf32>
    %cst_50 = arith.constant 3.200000e+01 : f32
    %146 = vector.broadcast %cst_50 : f32 to vector<32x1xf32>
    %147 = arith.divf %145, %146 : vector<32x1xf32>
    %148 = arith.mulf %139, %139 : vector<32x32xf32>
    %cst_51 = arith.constant dense<0.000000e+00> : vector<32xf32>
    %149 = vector.multi_reduction <add>, %148, %cst_51 [1] : vector<32x32xf32> to vector<32xf32>
    %150 = vector.shape_cast %149 : vector<32xf32> to vector<32x1xf32>
    %cst_52 = arith.constant 3.200000e+01 : f32
    %151 = vector.broadcast %cst_52 : f32 to vector<32x1xf32>
    %152 = arith.divf %150, %151 : vector<32x1xf32>
    %153 = arith.mulf %147, %147 : vector<32x1xf32>
    %154 = arith.subf %152, %153 : vector<32x1xf32>
    %cst_53 = arith.constant 0.000000e+00 : f32
    %155 = vector.broadcast %cst_53 : f32 to vector<32x1xf32>
    %156 = arith.maximumf %154, %155 : vector<32x1xf32>
    %157 = vector.broadcast %147 : vector<32x1xf32> to vector<32x32xf32>
    %158 = arith.subf %139, %157 : vector<32x32xf32>
    %cst_54 = arith.constant 9.99999996E-13 : f32
    %159 = vector.broadcast %cst_54 : f32 to vector<32x1xf32>
    %160 = arith.addf %156, %159 : vector<32x1xf32>
    %161 = math.rsqrt %160 : vector<32x1xf32>
    %162 = vector.broadcast %161 : vector<32x1xf32> to vector<32x32xf32>
    %163 = arith.mulf %158, %162 : vector<32x32xf32>
    %164 = vector.broadcast %141 : vector<1x32xf32> to vector<32x32xf32>
    %165 = arith.mulf %164, %163 : vector<32x32xf32>
    %166 = vector.broadcast %143 : vector<1x32xf32> to vector<32x32xf32>
    %167 = arith.addf %165, %166 : vector<32x32xf32>
    %168 = arith.truncf %167 : vector<32x32xf32> to vector<32x32xbf16>
    %c0_55 = arith.constant 0 : index
    %c0_56 = arith.constant 0 : index
    %c0_57 = arith.constant 0 : index
    %169 = vector.load %arg10[%c0_55, %c0_56, %c0_57] : memref<2x32x128xbf16, #tpu.memory_space<vmem>>, vector<1x32x128xbf16>
    %170 = vector.shape_cast %169 : vector<1x32x128xbf16> to vector<32x128xbf16>
    %c0_58 = arith.constant 0 : index
    %c0_59 = arith.constant 0 : index
    %c0_60 = arith.constant 0 : index
    %171 = vector.load %arg11[%c0_58, %c0_59, %c0_60] : memref<2x1x128xf32, #tpu.memory_space<vmem>>, vector<1x1x128xf32>
    %172 = vector.shape_cast %171 : vector<1x1x128xf32> to vector<1x128xf32>
    %c0_61 = arith.constant 0 : index
    %c0_62 = arith.constant 0 : index
    %c0_63 = arith.constant 0 : index
    %173 = vector.load %arg12[%c0_61, %c0_62, %c0_63] : memref<2x128x32xbf16, #tpu.memory_space<vmem>>, vector<1x128x32xbf16>
    %174 = vector.shape_cast %173 : vector<1x128x32xbf16> to vector<128x32xbf16>
    %cst_64 = arith.constant dense<0.000000e+00> : vector<32x128xf32>
    %175 = tpu.matmul %168, %170, %cst_64 {dimension_numbers = #tpu.dot_dimension_numbers<[1], [0], [0], [1], [0, 0, 1, 1], [], []>} : vector<32x32xbf16>, vector<32x128xbf16>, vector<32x128xf32> -> vector<32x128xf32>
    %176 = vector.broadcast %172 : vector<1x128xf32> to vector<32x128xf32>
    %177 = arith.addf %175, %176 : vector<32x128xf32>
    %cst_65 = arith.constant 1.702000e+00 : f32
    %178 = vector.broadcast %cst_65 : f32 to vector<32x128xf32>
    %179 = arith.mulf %178, %177 : vector<32x128xf32>
    %180 = arith.negf %179 : vector<32x128xf32>
    %181 = math.exp %180 : vector<32x128xf32>
    %cst_66 = arith.constant 1.000000e+00 : f32
    %182 = vector.broadcast %cst_66 : f32 to vector<32x128xf32>
    %183 = arith.addf %182, %181 : vector<32x128xf32>
    %184 = arith.divf %182, %183 : vector<32x128xf32>
    %185 = arith.mulf %177, %184 : vector<32x128xf32>
    %186 = arith.truncf %185 : vector<32x128xf32> to vector<32x128xbf16>
    %cst_67 = arith.constant dense<0.000000e+00> : vector<32x32xf32>
    %187 = tpu.matmul %186, %174, %cst_67 {dimension_numbers = #tpu.dot_dimension_numbers<[1], [0], [0], [1], [0, 0, 1, 1], [], []>} : vector<32x128xbf16>, vector<128x32xbf16>, vector<32x32xf32> -> vector<32x32xf32>
    %188 = arith.addf %139, %187 : vector<32x32xf32>
    %c0_68 = arith.constant 0 : index
    %c0_69 = arith.constant 0 : index
    %c0_70 = arith.constant 0 : index
    %189 = vector.load %arg13[%c0_68, %c0_69, %c0_70] : memref<2x1x32xf32, #tpu.memory_space<vmem>>, vector<1x1x32xf32>
    %190 = vector.shape_cast %189 : vector<1x1x32xf32> to vector<1x32xf32>
    %191 = vector.broadcast %190 : vector<1x32xf32> to vector<32x32xf32>
    %192 = arith.addf %188, %191 : vector<32x32xf32>
    %c1 = arith.constant 1 : index
    %c0_71 = arith.constant 0 : index
    %c0_72 = arith.constant 0 : index
    %193 = vector.load %arg6[%c1, %c0_71, %c0_72] : memref<2x1x32xf32, #tpu.memory_space<vmem>>, vector<1x1x32xf32>
    %194 = vector.shape_cast %193 : vector<1x1x32xf32> to vector<1x32xf32>
    %c1_73 = arith.constant 1 : index
    %c0_74 = arith.constant 0 : index
    %c0_75 = arith.constant 0 : index
    %195 = vector.load %arg7[%c1_73, %c0_74, %c0_75] : memref<2x1x32xf32, #tpu.memory_space<vmem>>, vector<1x1x32xf32>
    %196 = vector.shape_cast %195 : vector<1x1x32xf32> to vector<1x32xf32>
    %cst_76 = arith.constant dense<0.000000e+00> : vector<32xf32>
    %197 = vector.multi_reduction <add>, %192, %cst_76 [1] : vector<32x32xf32> to vector<32xf32>
    %198 = vector.shape_cast %197 : vector<32xf32> to vector<32x1xf32>
    %cst_77 = arith.constant 3.200000e+01 : f32
    %199 = vector.broadcast %cst_77 : f32 to vector<32x1xf32>
    %200 = arith.divf %198, %199 : vector<32x1xf32>
    %201 = arith.mulf %192, %192 : vector<32x32xf32>
    %cst_78 = arith.constant dense<0.000000e+00> : vector<32xf32>
    %202 = vector.multi_reduction <add>, %201, %cst_78 [1] : vector<32x32xf32> to vector<32xf32>
    %203 = vector.shape_cast %202 : vector<32xf32> to vector<32x1xf32>
    %cst_79 = arith.constant 3.200000e+01 : f32
    %204 = vector.broadcast %cst_79 : f32 to vector<32x1xf32>
    %205 = arith.divf %203, %204 : vector<32x1xf32>
    %206 = arith.mulf %200, %200 : vector<32x1xf32>
    %207 = arith.subf %205, %206 : vector<32x1xf32>
    %cst_80 = arith.constant 0.000000e+00 : f32
    %208 = vector.broadcast %cst_80 : f32 to vector<32x1xf32>
    %209 = arith.maximumf %207, %208 : vector<32x1xf32>
    %210 = vector.broadcast %200 : vector<32x1xf32> to vector<32x32xf32>
    %211 = arith.subf %192, %210 : vector<32x32xf32>
    %cst_81 = arith.constant 9.99999996E-13 : f32
    %212 = vector.broadcast %cst_81 : f32 to vector<32x1xf32>
    %213 = arith.addf %209, %212 : vector<32x1xf32>
    %214 = math.rsqrt %213 : vector<32x1xf32>
    %215 = vector.broadcast %214 : vector<32x1xf32> to vector<32x32xf32>
    %216 = arith.mulf %211, %215 : vector<32x32xf32>
    %217 = vector.broadcast %194 : vector<1x32xf32> to vector<32x32xf32>
    %218 = arith.mulf %217, %216 : vector<32x32xf32>
    %219 = vector.broadcast %196 : vector<1x32xf32> to vector<32x32xf32>
    %220 = arith.addf %218, %219 : vector<32x32xf32>
    %221 = arith.truncf %220 : vector<32x32xf32> to vector<32x32xbf16>
    %c1_82 = arith.constant 1 : index
    %c0_83 = arith.constant 0 : index
    %c0_84 = arith.constant 0 : index
    %222 = vector.load %arg2[%c1_82, %c0_83, %c0_84] : memref<2x32x96xbf16, #tpu.memory_space<vmem>>, vector<1x32x96xbf16>
    %223 = vector.shape_cast %222 : vector<1x32x96xbf16> to vector<32x96xbf16>
    %cst_85 = arith.constant dense<0.000000e+00> : vector<32x96xf32>
    %224 = tpu.matmul %221, %223, %cst_85 {dimension_numbers = #tpu.dot_dimension_numbers<[1], [0], [0], [1], [0, 0, 1, 1], [], []>} : vector<32x32xbf16>, vector<32x96xbf16>, vector<32x96xf32> -> vector<32x96xf32>
    %c1_86 = arith.constant 1 : index
    %c0_87 = arith.constant 0 : index
    %c0_88 = arith.constant 0 : index
    %225 = vector.load %arg3[%c1_86, %c0_87, %c0_88] : memref<2x1x96xf32, #tpu.memory_space<vmem>>, vector<1x1x96xf32>
    %226 = vector.shape_cast %225 : vector<1x1x96xf32> to vector<1x96xf32>
    %227 = vector.broadcast %226 : vector<1x96xf32> to vector<32x96xf32>
    %228 = arith.addf %224, %227 : vector<32x96xf32>
    %229 = vector.extract_strided_slice %228 {offsets = [0, 0], sizes = [32, 8], strides = [1, 1]} : vector<32x96xf32> to vector<32x8xf32>
    %230 = vector.shape_cast %229 : vector<32x8xf32> to vector<4x8x8xf32>
    %231 = arith.truncf %230 : vector<4x8x8xf32> to vector<4x8x8xbf16>
    %232 = vector.extract_strided_slice %228 {offsets = [0, 32], sizes = [32, 8], strides = [1, 1]} : vector<32x96xf32> to vector<32x8xf32>
    %233 = vector.shape_cast %232 : vector<32x8xf32> to vector<4x8x8xf32>
    %234 = arith.truncf %233 : vector<4x8x8xf32> to vector<4x8x8xbf16>
    %235 = vector.extract_strided_slice %228 {offsets = [0, 64], sizes = [32, 8], strides = [1, 1]} : vector<32x96xf32> to vector<32x8xf32>
    %236 = vector.shape_cast %235 : vector<32x8xf32> to vector<4x8x8xf32>
    %237 = arith.truncf %236 : vector<4x8x8xf32> to vector<4x8x8xbf16>
    "tpu.trace_start"() <{level = 10 : i32, message = "bqd,bkd->bqk"}> : () -> ()
    %cst_89 = arith.constant dense<0.000000e+00> : vector<4x8x8xf32>
    %238 = tpu.matmul %231, %234, %cst_89 {dimension_numbers = #tpu.dot_dimension_numbers<[2], [2], [1], [1], [0, 0, 0, 1, 1, 1], [0], [0]>} : vector<4x8x8xbf16>, vector<4x8x8xbf16>, vector<4x8x8xf32> -> vector<4x8x8xf32>
    "tpu.trace_stop"() : () -> ()
    %cst_90 = arith.constant dense<0xFF800000> : vector<4x8xf32>
    %239 = vector.multi_reduction <maximumf>, %238, %cst_90 [2] : vector<4x8x8xf32> to vector<4x8xf32>
    %240 = vector.shape_cast %239 : vector<4x8xf32> to vector<4x8x1xf32>
    %241 = vector.broadcast %240 : vector<4x8x1xf32> to vector<4x8x8xf32>
    %242 = arith.subf %238, %241 : vector<4x8x8xf32>
    %243 = math.exp %242 : vector<4x8x8xf32>
    %cst_91 = arith.constant dense<0.000000e+00> : vector<4x8xf32>
    %244 = vector.multi_reduction <add>, %243, %cst_91 [2] : vector<4x8x8xf32> to vector<4x8xf32>
    %245 = vector.shape_cast %244 : vector<4x8xf32> to vector<4x8x1xf32>
    %246 = tpu.reciprocal %245 {approx = true} : vector<4x8x1xf32> -> vector<4x8x1xf32>
    %247 = vector.broadcast %246 : vector<4x8x1xf32> to vector<4x8x8xf32>
    %248 = arith.mulf %243, %247 : vector<4x8x8xf32>
    %249 = arith.truncf %248 : vector<4x8x8xf32> to vector<4x8x8xbf16>
    "tpu.trace_start"() <{level = 10 : i32, message = "bqk,bkd->bqd"}> : () -> ()
    %cst_92 = arith.constant dense<0.000000e+00> : vector<4x8x8xf32>
    %250 = tpu.matmul %249, %237, %cst_92 {dimension_numbers = #tpu.dot_dimension_numbers<[2], [1], [1], [2], [0, 0, 0, 1, 1, 2], [0], [0]>} : vector<4x8x8xbf16>, vector<4x8x8xbf16>, vector<4x8x8xf32> -> vector<4x8x8xf32>
    "tpu.trace_stop"() : () -> ()
    %251 = vector.shape_cast %250 : vector<4x8x8xf32> to vector<32x8xf32>
    %252 = vector.extract_strided_slice %228 {offsets = [0, 8], sizes = [32, 8], strides = [1, 1]} : vector<32x96xf32> to vector<32x8xf32>
    %253 = vector.shape_cast %252 : vector<32x8xf32> to vector<4x8x8xf32>
    %254 = arith.truncf %253 : vector<4x8x8xf32> to vector<4x8x8xbf16>
    %255 = vector.extract_strided_slice %228 {offsets = [0, 40], sizes = [32, 8], strides = [1, 1]} : vector<32x96xf32> to vector<32x8xf32>
    %256 = vector.shape_cast %255 : vector<32x8xf32> to vector<4x8x8xf32>
    %257 = arith.truncf %256 : vector<4x8x8xf32> to vector<4x8x8xbf16>
    %258 = vector.extract_strided_slice %228 {offsets = [0, 72], sizes = [32, 8], strides = [1, 1]} : vector<32x96xf32> to vector<32x8xf32>
    %259 = vector.shape_cast %258 : vector<32x8xf32> to vector<4x8x8xf32>
    %260 = arith.truncf %259 : vector<4x8x8xf32> to vector<4x8x8xbf16>
    "tpu.trace_start"() <{level = 10 : i32, message = "bqd,bkd->bqk"}> : () -> ()
    %cst_93 = arith.constant dense<0.000000e+00> : vector<4x8x8xf32>
    %261 = tpu.matmul %254, %257, %cst_93 {dimension_numbers = #tpu.dot_dimension_numbers<[2], [2], [1], [1], [0, 0, 0, 1, 1, 1], [0], [0]>} : vector<4x8x8xbf16>, vector<4x8x8xbf16>, vector<4x8x8xf32> -> vector<4x8x8xf32>
    "tpu.trace_stop"() : () -> ()
    %cst_94 = arith.constant dense<0xFF800000> : vector<4x8xf32>
    %262 = vector.multi_reduction <maximumf>, %261, %cst_94 [2] : vector<4x8x8xf32> to vector<4x8xf32>
    %263 = vector.shape_cast %262 : vector<4x8xf32> to vector<4x8x1xf32>
    %264 = vector.broadcast %263 : vector<4x8x1xf32> to vector<4x8x8xf32>
    %265 = arith.subf %261, %264 : vector<4x8x8xf32>
    %266 = math.exp %265 : vector<4x8x8xf32>
    %cst_95 = arith.constant dense<0.000000e+00> : vector<4x8xf32>
    %267 = vector.multi_reduction <add>, %266, %cst_95 [2] : vector<4x8x8xf32> to vector<4x8xf32>
    %268 = vector.shape_cast %267 : vector<4x8xf32> to vector<4x8x1xf32>
    %269 = tpu.reciprocal %268 {approx = true} : vector<4x8x1xf32> -> vector<4x8x1xf32>
    %270 = vector.broadcast %269 : vector<4x8x1xf32> to vector<4x8x8xf32>
    %271 = arith.mulf %266, %270 : vector<4x8x8xf32>
    %272 = arith.truncf %271 : vector<4x8x8xf32> to vector<4x8x8xbf16>
    "tpu.trace_start"() <{level = 10 : i32, message = "bqk,bkd->bqd"}> : () -> ()
    %cst_96 = arith.constant dense<0.000000e+00> : vector<4x8x8xf32>
    %273 = tpu.matmul %272, %260, %cst_96 {dimension_numbers = #tpu.dot_dimension_numbers<[2], [1], [1], [2], [0, 0, 0, 1, 1, 2], [0], [0]>} : vector<4x8x8xbf16>, vector<4x8x8xbf16>, vector<4x8x8xf32> -> vector<4x8x8xf32>
    "tpu.trace_stop"() : () -> ()
    %274 = vector.shape_cast %273 : vector<4x8x8xf32> to vector<32x8xf32>
    %275 = vector.extract_strided_slice %228 {offsets = [0, 16], sizes = [32, 8], strides = [1, 1]} : vector<32x96xf32> to vector<32x8xf32>
    %276 = vector.shape_cast %275 : vector<32x8xf32> to vector<4x8x8xf32>
    %277 = arith.truncf %276 : vector<4x8x8xf32> to vector<4x8x8xbf16>
    %278 = vector.extract_strided_slice %228 {offsets = [0, 48], sizes = [32, 8], strides = [1, 1]} : vector<32x96xf32> to vector<32x8xf32>
    %279 = vector.shape_cast %278 : vector<32x8xf32> to vector<4x8x8xf32>
    %280 = arith.truncf %279 : vector<4x8x8xf32> to vector<4x8x8xbf16>
    %281 = vector.extract_strided_slice %228 {offsets = [0, 80], sizes = [32, 8], strides = [1, 1]} : vector<32x96xf32> to vector<32x8xf32>
    %282 = vector.shape_cast %281 : vector<32x8xf32> to vector<4x8x8xf32>
    %283 = arith.truncf %282 : vector<4x8x8xf32> to vector<4x8x8xbf16>
    "tpu.trace_start"() <{level = 10 : i32, message = "bqd,bkd->bqk"}> : () -> ()
    %cst_97 = arith.constant dense<0.000000e+00> : vector<4x8x8xf32>
    %284 = tpu.matmul %277, %280, %cst_97 {dimension_numbers = #tpu.dot_dimension_numbers<[2], [2], [1], [1], [0, 0, 0, 1, 1, 1], [0], [0]>} : vector<4x8x8xbf16>, vector<4x8x8xbf16>, vector<4x8x8xf32> -> vector<4x8x8xf32>
    "tpu.trace_stop"() : () -> ()
    %cst_98 = arith.constant dense<0xFF800000> : vector<4x8xf32>
    %285 = vector.multi_reduction <maximumf>, %284, %cst_98 [2] : vector<4x8x8xf32> to vector<4x8xf32>
    %286 = vector.shape_cast %285 : vector<4x8xf32> to vector<4x8x1xf32>
    %287 = vector.broadcast %286 : vector<4x8x1xf32> to vector<4x8x8xf32>
    %288 = arith.subf %284, %287 : vector<4x8x8xf32>
    %289 = math.exp %288 : vector<4x8x8xf32>
    %cst_99 = arith.constant dense<0.000000e+00> : vector<4x8xf32>
    %290 = vector.multi_reduction <add>, %289, %cst_99 [2] : vector<4x8x8xf32> to vector<4x8xf32>
    %291 = vector.shape_cast %290 : vector<4x8xf32> to vector<4x8x1xf32>
    %292 = tpu.reciprocal %291 {approx = true} : vector<4x8x1xf32> -> vector<4x8x1xf32>
    %293 = vector.broadcast %292 : vector<4x8x1xf32> to vector<4x8x8xf32>
    %294 = arith.mulf %289, %293 : vector<4x8x8xf32>
    %295 = arith.truncf %294 : vector<4x8x8xf32> to vector<4x8x8xbf16>
    "tpu.trace_start"() <{level = 10 : i32, message = "bqk,bkd->bqd"}> : () -> ()
    %cst_100 = arith.constant dense<0.000000e+00> : vector<4x8x8xf32>
    %296 = tpu.matmul %295, %283, %cst_100 {dimension_numbers = #tpu.dot_dimension_numbers<[2], [1], [1], [2], [0, 0, 0, 1, 1, 2], [0], [0]>} : vector<4x8x8xbf16>, vector<4x8x8xbf16>, vector<4x8x8xf32> -> vector<4x8x8xf32>
    "tpu.trace_stop"() : () -> ()
    %297 = vector.shape_cast %296 : vector<4x8x8xf32> to vector<32x8xf32>
    %298 = vector.extract_strided_slice %228 {offsets = [0, 24], sizes = [32, 8], strides = [1, 1]} : vector<32x96xf32> to vector<32x8xf32>
    %299 = vector.shape_cast %298 : vector<32x8xf32> to vector<4x8x8xf32>
    %300 = arith.truncf %299 : vector<4x8x8xf32> to vector<4x8x8xbf16>
    %301 = vector.extract_strided_slice %228 {offsets = [0, 56], sizes = [32, 8], strides = [1, 1]} : vector<32x96xf32> to vector<32x8xf32>
    %302 = vector.shape_cast %301 : vector<32x8xf32> to vector<4x8x8xf32>
    %303 = arith.truncf %302 : vector<4x8x8xf32> to vector<4x8x8xbf16>
    %304 = vector.extract_strided_slice %228 {offsets = [0, 88], sizes = [32, 8], strides = [1, 1]} : vector<32x96xf32> to vector<32x8xf32>
    %305 = vector.shape_cast %304 : vector<32x8xf32> to vector<4x8x8xf32>
    %306 = arith.truncf %305 : vector<4x8x8xf32> to vector<4x8x8xbf16>
    "tpu.trace_start"() <{level = 10 : i32, message = "bqd,bkd->bqk"}> : () -> ()
    %cst_101 = arith.constant dense<0.000000e+00> : vector<4x8x8xf32>
    %307 = tpu.matmul %300, %303, %cst_101 {dimension_numbers = #tpu.dot_dimension_numbers<[2], [2], [1], [1], [0, 0, 0, 1, 1, 1], [0], [0]>} : vector<4x8x8xbf16>, vector<4x8x8xbf16>, vector<4x8x8xf32> -> vector<4x8x8xf32>
    "tpu.trace_stop"() : () -> ()
    %cst_102 = arith.constant dense<0xFF800000> : vector<4x8xf32>
    %308 = vector.multi_reduction <maximumf>, %307, %cst_102 [2] : vector<4x8x8xf32> to vector<4x8xf32>
    %309 = vector.shape_cast %308 : vector<4x8xf32> to vector<4x8x1xf32>
    %310 = vector.broadcast %309 : vector<4x8x1xf32> to vector<4x8x8xf32>
    %311 = arith.subf %307, %310 : vector<4x8x8xf32>
    %312 = math.exp %311 : vector<4x8x8xf32>
    %cst_103 = arith.constant dense<0.000000e+00> : vector<4x8xf32>
    %313 = vector.multi_reduction <add>, %312, %cst_103 [2] : vector<4x8x8xf32> to vector<4x8xf32>
    %314 = vector.shape_cast %313 : vector<4x8xf32> to vector<4x8x1xf32>
    %315 = tpu.reciprocal %314 {approx = true} : vector<4x8x1xf32> -> vector<4x8x1xf32>
    %316 = vector.broadcast %315 : vector<4x8x1xf32> to vector<4x8x8xf32>
    %317 = arith.mulf %312, %316 : vector<4x8x8xf32>
    %318 = arith.truncf %317 : vector<4x8x8xf32> to vector<4x8x8xbf16>
    "tpu.trace_start"() <{level = 10 : i32, message = "bqk,bkd->bqd"}> : () -> ()
    %cst_104 = arith.constant dense<0.000000e+00> : vector<4x8x8xf32>
    %319 = tpu.matmul %318, %306, %cst_104 {dimension_numbers = #tpu.dot_dimension_numbers<[2], [1], [1], [2], [0, 0, 0, 1, 1, 2], [0], [0]>} : vector<4x8x8xbf16>, vector<4x8x8xbf16>, vector<4x8x8xf32> -> vector<4x8x8xf32>
    "tpu.trace_stop"() : () -> ()
    %320 = vector.shape_cast %319 : vector<4x8x8xf32> to vector<32x8xf32>
    %321 = tpu.concatenate %251, %274, %297, %320 in 1 : vector<32x8xf32>, vector<32x8xf32>, vector<32x8xf32>, vector<32x8xf32> -> vector<32x32xf32>
    %322 = arith.truncf %321 : vector<32x32xf32> to vector<32x32xbf16>
    %c1_105 = arith.constant 1 : index
    %c0_106 = arith.constant 0 : index
    %c0_107 = arith.constant 0 : index
    %323 = vector.load %arg4[%c1_105, %c0_106, %c0_107] : memref<2x32x32xbf16, #tpu.memory_space<vmem>>, vector<1x32x32xbf16>
    %324 = vector.shape_cast %323 : vector<1x32x32xbf16> to vector<32x32xbf16>
    %cst_108 = arith.constant dense<0.000000e+00> : vector<32x32xf32>
    %325 = tpu.matmul %322, %324, %cst_108 {dimension_numbers = #tpu.dot_dimension_numbers<[1], [0], [0], [1], [0, 0, 1, 1], [], []>} : vector<32x32xbf16>, vector<32x32xbf16>, vector<32x32xf32> -> vector<32x32xf32>
    %c1_109 = arith.constant 1 : index
    %c0_110 = arith.constant 0 : index
    %c0_111 = arith.constant 0 : index
    %326 = vector.load %arg5[%c1_109, %c0_110, %c0_111] : memref<2x1x32xf32, #tpu.memory_space<vmem>>, vector<1x1x32xf32>
    %327 = vector.shape_cast %326 : vector<1x1x32xf32> to vector<1x32xf32>
    %328 = vector.broadcast %327 : vector<1x32xf32> to vector<32x32xf32>
    %329 = arith.addf %325, %328 : vector<32x32xf32>
    %330 = arith.addf %192, %329 : vector<32x32xf32>
    %c1_112 = arith.constant 1 : index
    %c0_113 = arith.constant 0 : index
    %c0_114 = arith.constant 0 : index
    %331 = vector.load %arg8[%c1_112, %c0_113, %c0_114] : memref<2x1x32xf32, #tpu.memory_space<vmem>>, vector<1x1x32xf32>
    %332 = vector.shape_cast %331 : vector<1x1x32xf32> to vector<1x32xf32>
    %c1_115 = arith.constant 1 : index
    %c0_116 = arith.constant 0 : index
    %c0_117 = arith.constant 0 : index
    %333 = vector.load %arg9[%c1_115, %c0_116, %c0_117] : memref<2x1x32xf32, #tpu.memory_space<vmem>>, vector<1x1x32xf32>
    %334 = vector.shape_cast %333 : vector<1x1x32xf32> to vector<1x32xf32>
    %cst_118 = arith.constant dense<0.000000e+00> : vector<32xf32>
    %335 = vector.multi_reduction <add>, %330, %cst_118 [1] : vector<32x32xf32> to vector<32xf32>
    %336 = vector.shape_cast %335 : vector<32xf32> to vector<32x1xf32>
    %cst_119 = arith.constant 3.200000e+01 : f32
    %337 = vector.broadcast %cst_119 : f32 to vector<32x1xf32>
    %338 = arith.divf %336, %337 : vector<32x1xf32>
    %339 = arith.mulf %330, %330 : vector<32x32xf32>
    %cst_120 = arith.constant dense<0.000000e+00> : vector<32xf32>
    %340 = vector.multi_reduction <add>, %339, %cst_120 [1] : vector<32x32xf32> to vector<32xf32>
    %341 = vector.shape_cast %340 : vector<32xf32> to vector<32x1xf32>
    %cst_121 = arith.constant 3.200000e+01 : f32
    %342 = vector.broadcast %cst_121 : f32 to vector<32x1xf32>
    %343 = arith.divf %341, %342 : vector<32x1xf32>
    %344 = arith.mulf %338, %338 : vector<32x1xf32>
    %345 = arith.subf %343, %344 : vector<32x1xf32>
    %cst_122 = arith.constant 0.000000e+00 : f32
    %346 = vector.broadcast %cst_122 : f32 to vector<32x1xf32>
    %347 = arith.maximumf %345, %346 : vector<32x1xf32>
    %348 = vector.broadcast %338 : vector<32x1xf32> to vector<32x32xf32>
    %349 = arith.subf %330, %348 : vector<32x32xf32>
    %cst_123 = arith.constant 9.99999996E-13 : f32
    %350 = vector.broadcast %cst_123 : f32 to vector<32x1xf32>
    %351 = arith.addf %347, %350 : vector<32x1xf32>
    %352 = math.rsqrt %351 : vector<32x1xf32>
    %353 = vector.broadcast %352 : vector<32x1xf32> to vector<32x32xf32>
    %354 = arith.mulf %349, %353 : vector<32x32xf32>
    %355 = vector.broadcast %332 : vector<1x32xf32> to vector<32x32xf32>
    %356 = arith.mulf %355, %354 : vector<32x32xf32>
    %357 = vector.broadcast %334 : vector<1x32xf32> to vector<32x32xf32>
    %358 = arith.addf %356, %357 : vector<32x32xf32>
    %359 = arith.truncf %358 : vector<32x32xf32> to vector<32x32xbf16>
    %c1_124 = arith.constant 1 : index
    %c0_125 = arith.constant 0 : index
    %c0_126 = arith.constant 0 : index
    %360 = vector.load %arg10[%c1_124, %c0_125, %c0_126] : memref<2x32x128xbf16, #tpu.memory_space<vmem>>, vector<1x32x128xbf16>
    %361 = vector.shape_cast %360 : vector<1x32x128xbf16> to vector<32x128xbf16>
    %c1_127 = arith.constant 1 : index
    %c0_128 = arith.constant 0 : index
    %c0_129 = arith.constant 0 : index
    %362 = vector.load %arg11[%c1_127, %c0_128, %c0_129] : memref<2x1x128xf32, #tpu.memory_space<vmem>>, vector<1x1x128xf32>
    %363 = vector.shape_cast %362 : vector<1x1x128xf32> to vector<1x128xf32>
    %c1_130 = arith.constant 1 : index
    %c0_131 = arith.constant 0 : index
    %c0_132 = arith.constant 0 : index
    %364 = vector.load %arg12[%c1_130, %c0_131, %c0_132] : memref<2x128x32xbf16, #tpu.memory_space<vmem>>, vector<1x128x32xbf16>
    %365 = vector.shape_cast %364 : vector<1x128x32xbf16> to vector<128x32xbf16>
    %cst_133 = arith.constant dense<0.000000e+00> : vector<32x128xf32>
    %366 = tpu.matmul %359, %361, %cst_133 {dimension_numbers = #tpu.dot_dimension_numbers<[1], [0], [0], [1], [0, 0, 1, 1], [], []>} : vector<32x32xbf16>, vector<32x128xbf16>, vector<32x128xf32> -> vector<32x128xf32>
    %367 = vector.broadcast %363 : vector<1x128xf32> to vector<32x128xf32>
    %368 = arith.addf %366, %367 : vector<32x128xf32>
    %cst_134 = arith.constant 1.702000e+00 : f32
    %369 = vector.broadcast %cst_134 : f32 to vector<32x128xf32>
    %370 = arith.mulf %369, %368 : vector<32x128xf32>
    %371 = arith.negf %370 : vector<32x128xf32>
    %372 = math.exp %371 : vector<32x128xf32>
    %cst_135 = arith.constant 1.000000e+00 : f32
    %373 = vector.broadcast %cst_135 : f32 to vector<32x128xf32>
    %374 = arith.addf %373, %372 : vector<32x128xf32>
    %375 = arith.divf %373, %374 : vector<32x128xf32>
    %376 = arith.mulf %368, %375 : vector<32x128xf32>
    %377 = arith.truncf %376 : vector<32x128xf32> to vector<32x128xbf16>
    %cst_136 = arith.constant dense<0.000000e+00> : vector<32x32xf32>
    %378 = tpu.matmul %377, %365, %cst_136 {dimension_numbers = #tpu.dot_dimension_numbers<[1], [0], [0], [1], [0, 0, 1, 1], [], []>} : vector<32x128xbf16>, vector<128x32xbf16>, vector<32x32xf32> -> vector<32x32xf32>
    %379 = arith.addf %330, %378 : vector<32x32xf32>
    %c1_137 = arith.constant 1 : index
    %c0_138 = arith.constant 0 : index
    %c0_139 = arith.constant 0 : index
    %380 = vector.load %arg13[%c1_137, %c0_138, %c0_139] : memref<2x1x32xf32, #tpu.memory_space<vmem>>, vector<1x1x32xf32>
    %381 = vector.shape_cast %380 : vector<1x1x32xf32> to vector<1x32xf32>
    %382 = vector.broadcast %381 : vector<1x32xf32> to vector<32x32xf32>
    %383 = arith.addf %379, %382 : vector<32x32xf32>
    %384 = vector.shape_cast %383 : vector<32x32xf32> to vector<4x8x32xf32>
    %c0_140 = arith.constant 0 : index
    %c0_141 = arith.constant 0 : index
    %c0_142 = arith.constant 0 : index
    %385 = vector.load %arg14[%c0_140, %c0_141, %c0_142] : memref<4x8x32xf32, #tpu.memory_space<vmem>>, vector<4x8x32xf32>
    tpu.vector_store %arg14[%c0_140, %c0_141, %c0_142], %384 {strides = array<i32>} : memref<4x8x32xf32, #tpu.memory_space<vmem>>, vector<4x8x32xf32>,
    return
  }
  func.func @transform_0(%arg0: i32) -> (i32, i32, i32) {
    %c0_i32 = arith.constant 0 : i32
    %c0_i32_0 = arith.constant 0 : i32
    %c0_i32_1 = arith.constant 0 : i32
    return %arg0, %c0_i32, %c0_i32_0 : i32, i32, i32
  }
  func.func @transform_1(%arg0: i32) -> (i32, i32, i32) {
    %c0_i32 = arith.constant 0 : i32
    %c0_i32_0 = arith.constant 0 : i32
    %c0_i32_1 = arith.constant 0 : i32
    %c0_i32_2 = arith.constant 0 : i32
    return %c0_i32, %c0_i32_0, %c0_i32_1 : i32, i32, i32
  }
  func.func @transform_2(%arg0: i32) -> (i32, i32, i32) {
    %c0_i32 = arith.constant 0 : i32
    %c0_i32_0 = arith.constant 0 : i32
    %c0_i32_1 = arith.constant 0 : i32
    %c0_i32_2 = arith.constant 0 : i32
    return %c0_i32, %c0_i32_0, %c0_i32_1 : i32, i32, i32
  }
  func.func @transform_3(%arg0: i32) -> (i32, i32, i32) {
    %c0_i32 = arith.constant 0 : i32
    %c0_i32_0 = arith.constant 0 : i32
    %c0_i32_1 = arith.constant 0 : i32
    %c0_i32_2 = arith.constant 0 : i32
    return %c0_i32, %c0_i32_0, %c0_i32_1 : i32, i32, i32
  }
  func.func @transform_4(%arg0: i32) -> (i32, i32, i32) {
    %c0_i32 = arith.constant 0 : i32
    %c0_i32_0 = arith.constant 0 : i32
    %c0_i32_1 = arith.constant 0 : i32
    %c0_i32_2 = arith.constant 0 : i32
    return %c0_i32, %c0_i32_0, %c0_i32_1 : i32, i32, i32
  }
  func.func @transform_5(%arg0: i32) -> (i32, i32, i32) {
    %c0_i32 = arith.constant 0 : i32
    %c0_i32_0 = arith.constant 0 : i32
    %c0_i32_1 = arith.constant 0 : i32
    %c0_i32_2 = arith.constant 0 : i32
    return %c0_i32, %c0_i32_0, %c0_i32_1 : i32, i32, i32
  }
  func.func @transform_6(%arg0: i32) -> (i32, i32, i32) {
    %c0_i32 = arith.constant 0 : i32
    %c0_i32_0 = arith.constant 0 : i32
    %c0_i32_1 = arith.constant 0 : i32
    %c0_i32_2 = arith.constant 0 : i32
    return %c0_i32, %c0_i32_0, %c0_i32_1 : i32, i32, i32
  }
  func.func @transform_7(%arg0: i32) -> (i32, i32, i32) {
    %c0_i32 = arith.constant 0 : i32
    %c0_i32_0 = arith.constant 0 : i32
    %c0_i32_1 = arith.constant 0 : i32
    %c0_i32_2 = arith.constant 0 : i32
    return %c0_i32, %c0_i32_0, %c0_i32_1 : i32, i32, i32
  }
  func.func @transform_8(%arg0: i32) -> (i32, i32, i32) {
    %c0_i32 = arith.constant 0 : i32
    %c0_i32_0 = arith.constant 0 : i32
    %c0_i32_1 = arith.constant 0 : i32
    %c0_i32_2 = arith.constant 0 : i32
    return %c0_i32, %c0_i32_0, %c0_i32_1 : i32, i32, i32
  }
  func.func @transform_9(%arg0: i32) -> (i32, i32, i32) {
    %c0_i32 = arith.constant 0 : i32
    %c0_i32_0 = arith.constant 0 : i32
    %c0_i32_1 = arith.constant 0 : i32
    %c0_i32_2 = arith.constant 0 : i32
    return %c0_i32, %c0_i32_0, %c0_i32_1 : i32, i32, i32
  }
  func.func @transform_10(%arg0: i32) -> (i32, i32, i32) {
    %c0_i32 = arith.constant 0 : i32
    %c0_i32_0 = arith.constant 0 : i32
    %c0_i32_1 = arith.constant 0 : i32
    %c0_i32_2 = arith.constant 0 : i32
    return %c0_i32, %c0_i32_0, %c0_i32_1 : i32, i32, i32
  }
  func.func @transform_11(%arg0: i32) -> (i32, i32, i32) {
    %c0_i32 = arith.constant 0 : i32
    %c0_i32_0 = arith.constant 0 : i32
    %c0_i32_1 = arith.constant 0 : i32
    %c0_i32_2 = arith.constant 0 : i32
    return %c0_i32, %c0_i32_0, %c0_i32_1 : i32, i32, i32
  }
  func.func @transform_12(%arg0: i32) -> (i32, i32, i32) {
    %c0_i32 = arith.constant 0 : i32
    %c0_i32_0 = arith.constant 0 : i32
    %c0_i32_1 = arith.constant 0 : i32
    %c0_i32_2 = arith.constant 0 : i32
    return %c0_i32, %c0_i32_0, %c0_i32_1 : i32, i32, i32
  }
  func.func @transform_13(%arg0: i32) -> (i32, i32, i32) {
    %c0_i32 = arith.constant 0 : i32
    %c0_i32_0 = arith.constant 0 : i32
    %c0_i32_1 = arith.constant 0 : i32
    return %arg0, %c0_i32, %c0_i32_0 : i32, i32, i32
  }
}

</mosaic_0001>

<bundles_post_ra>
// kernel: tpu_custom_call.1
= control target key start
LH: loop header
LB: loop body
LE: loop exit
PB: predicated region body
PF: predicated region fallthrough
CT: control target
= control target key end

     0   :  { %s5541_s0 = inlined_call_operand.vmem [shape: f32[8,8,32], index: 0, kind: input, shape index: {}]   ;;  %s5542_s1 = inlined_call_operand.vmem [shape: bf16[2,32,96], index: 1, kind: input, shape index: {}]   ;;  %s5543_s2 = inlined_call_operand.hbm [shape: f32[2,1,96], index: 2, kind: input, shape index: {}]   ;;  %s5544_s3 = inlined_call_operand.vmem [shape: bf16[2,32,32], index: 3, kind: input, shape index: {}]   ;;  %s5545_s4 = inlined_call_operand.vmem [shape: f32[2,1,32], index: 4, kind: input, shape index: {}]   ;;  %s5546_s5 = inlined_call_operand.hbm [shape: f32[2,1,32], index: 5, kind: input, shape index: {}]   ;;  %s5547_s6 = inlined_call_operand.vmem [shape: f32[2,1,32], index: 6, kind: input, shape index: {}]   ;;  %s5548_s7 = inlined_call_operand.hbm [shape: f32[2,1,32], index: 7, kind: input, shape index: {}]   ;;  %s5549_s8 = inlined_call_operand.vmem [shape: f32[2,1,32], index: 8, kind: input, shape index: {}]   ;;  %s5550_s9 = inlined_call_operand.vmem [shape: bf16[2,32,128], index: 9, kind: input, shape index: {}]   ;;  %s5551_s10 = inlined_call_operand.vmem [shape: f32[2,1,128], index: 10, kind: input, shape index: {}]   ;;  %s5552_s11 = inlined_call_operand.vmem [shape: bf16[2,128,32], index: 11, kind: input, shape index: {}]   ;;  %s5553_s12 = inlined_call_operand.vmem [shape: f32[2,1,32], index: 12, kind: input, shape index: {}]   ;;  %s5554_s13 = inlined_call_operand.hbm [shape: f32[8,8,32], index: 13, kind: output, shape index: {}]  }
   0x1   :  { %5578 = sst [smem:[#allocation17_spill]] %s5543_s2 }
   0x2   :  { %5579 = sst [smem:[#allocation18_spill]] %s5546_s5 }
   0x3   :  { %18 = vsyncpa [#allocation3], 0 }
   0x4   :  { %19 = vsyncpa [#allocation6], 0 }
   0x5   :  { %20 = vsyncpa [#allocation4], 0 }
   0x6   :  { %22 = vsyncpa [#allocation4 + $0x1], 0  ;;  %s4569_s25 = smov 0   ;;  %s4571_s26 = smov 0  }
   0x7   :  { %s4573_s27 = smov 0   ;;  %s4575_s28 = smov 0  }
   0x8 LB: > { %5580 = sst [smem:[#allocation12_spill]] %s4464_s25  ;;  %s4590_s29 = sadd.s32 4294967295, %s4476_s28   ;;  %s4476_s28 = sphi %s4575_s28, %s5602_s28   ;;  %s4472_s27 = sphi %s4573_s27, %s5604_s27   ;;  %s4468_s26 = sphi %s4571_s26, %s5606_s26   ;;  %s4464_s25 = sphi %s4569_s25, %s5605_s25  }
   0x9   : > { %5581 = sst [smem:[#allocation13_spill]] %s4472_s27  ;;  %s3678_s30 = sadd.s32 4294967294, %s4476_s28  }
   0xa   : > { %s4594_s14 = sadd.s32 1, %s4476_s28   ;;  %s313_s15 = sadd.s32 1, %s4472_s27 }
   0xb   : > { %5582 = sst [smem:[#allocation14_spill]] %s4594_s14  ;;  %s310_s16 = ssub.s32 %s4476_s28, %s4594_s14 }
   0xc   : > { %p323_p0 = scmp.ne.s32.totalorder %s4472_s27, %s4468_s26  ;;  %p311_p1 = scmp.eq.s32.totalorder %s310_s16, 0 }
   0xd   : > { %p324_p2 = scmp.eq.s32.totalorder %s4590_s29, 1  ;;  %p329_p3 = scmp.ne.s32.totalorder %s4468_s26, %s4464_s25 }
   0xe   : > { %p330_p4 = scmp.eq.s32.totalorder %s3678_s30, 1  ;;  %p3679_p7 = scmp.ge.s32.totalorder %s4476_s28, 1 }
   0xf   : > { %s4605_s17 = scalar_select %p311_p1, %s4472_s27, %s313_s15  }
  0x10   : > { %p4607_p5 = por %p324_p2, %p323_p0  ;;  %p4611_p6 = por %p330_p4, %p329_p3 }
  0x11   : > { %5583 = sst [smem:[#allocation15_spill]] %s4605_s17  ;;  %p337_p8 = scmp.lt.s32.totalorder %s4476_s28, 3 }
  0x12   : > { %s5585_s19 = scalar_select %p4611_p6, 1, 0 }
  0x13   : > { %p3982_p9 = scmp.eq.s32.totalorder %s4590_s29, 0  ;;  %p4618_p10 = pnand %p3679_p7, %p337_p8 }
  0x14   : > { %5586 = sst [smem:[#allocation16_spill]] %s5585_s19  ;;  %s4478_s17 = smov [#allocation5]  }
  0x15   : > { %s5588_s5 = sld [smem:[#allocation18_spill]]  ;;  %p3968_p11 = pneg %p4618_p10 }
  0x16   : > { %s5589_s2 = sld [smem:[#allocation17_spill]]  ;;  %s373_s27 = sshll.u32 %s4478_s17, 4  ;;  %s374_s27 = int_to_ptr.vmem [resolvable:$true] %s373_s27 }
  0x17   : > { %p4632_p12 = pnand %p3982_p9, %p3968_p11  ;;  %s4479_s21 = smov 16  }
  0x18   : > { %s4480_s22 = smov 1   ;;  %s4482_s19 = smov [#allocation7]  }
  0x19   : > { %s390_s25 = sshll.u32 %s4482_s19, 4  ;;  %s391_s25 = int_to_ptr.vmem [resolvable:$true] %s390_s25 }
  0x1b   : > { %s371_s23 = sshll.u32 %s5588_s5, 4  ;;  %s4481_s5 = smov [#allocation2]   ;;  %s372_s23 = int_to_ptr.hbm [resolvable:$true] %s371_s23 }
  0x1c   : > { %s351_s15 = sshll.u32 %s5589_s2, 4  ;;  %s353_s14 = sshll.u32 %s4481_s5, 4  ;;  %s352_s15 = int_to_ptr.hbm [resolvable:$true] %s351_s15  ;;  %s354_s14 = int_to_ptr.vmem [resolvable:$true] %s353_s14 }
  0x1d   : > { %3974 = dma.hbm_to_vmem [thread:$0]  (!%p4632_p12), %s372_s23, 32, %s374_s27, [#allocation6], %s4479_s21, %s4479_s21, %s4480_s22  }
  0x1e   : > { %s388_s2 = sshll.u32 %s5548_s7, 4  ;;  %430 = sbr.rel (%p4618_p10) target bundleno = 6029 (0x178d), region = 72  ;;  %s389_s2 = int_to_ptr.hbm [resolvable:$true] %s388_s2 }
  0x1f   : > { %3971 = dma.hbm_to_vmem [thread:$0]  (!%p4632_p12), %s352_s15, 32, %s354_s14, [#allocation3], %s4479_s21, %s4479_s21, %s4480_s22  }
  0x20   : > { %3977 = dma.hbm_to_vmem [thread:$0]  (!%p4632_p12), %s389_s2, 32, %s391_s25, [#allocation6], %s4479_s21, %s4479_s21, %s4480_s22  }
  0x23   : > { %4451 = dma.done.wait (%p3982_p9), [#allocation3], 32  }
  0x24   : > { %4453 = vsyncadd (%p3982_p9), [#allocation3], 4294967264 }
  0x25   : > { %4455 = dma.done.wait (%p3982_p9), [#allocation6], 64  }
  0x26   : > { %4457 = vsyncadd (%p3982_p9), [#allocation6], 4294967232  ;;  %s3689_s5 = sshll.u32 %s4590_s29, 2  ;;  %vm499_vm0 = vcmask 261120   ;;  %v4483_v16 = vmov 32.0   ;;  %v3926_v30 = vld [vmem:[%s5542_s1 + $0x8] sm:$0xff] }
  0x27   : > { %p486_p13 = scmp.lt.s32.totalorder %s3689_s5, 7  ;;  %4118 = vrcp.f32 %v4483_v16  ;;  %655 = vmatpush.bf16.msra.mxu0 %v3926_v30  ;;  %v3925_v35 = vld [vmem:[%s5542_s1] sm:$0xff]  ;;  %s4484_s21 = smov 96   ;;  %vm677_vm14 = vcmask 64512   ;;  %vm822_vm15 = vcmask 1043456  }
  0x28   : > { %s4485_s22 = smov 64   ;;  %s4486_s24 = smov 88  }
  0x29   : > { %s5608_s5 = smov (!%p486_p13, %s3689_s5), 7  ;;  %s4487_s30 = smov 120  }
  0x2a   : > { %s3690_s2 = sshll.u32 %s5608_s5, 3  ;;  %s5576_s5 = smov 56  }
  0x2b   : > { %s4659_s14 = scalar_lea.vmem %s5541_s0, %s3690_s2  ;;  %656 = vmatpush.bf16.msra.mxu0 %v3925_v35  ;;  %s4489_s2 = smov 80  }
  0x2c   : > { %v4662_v0 = vld [vmem:[%s4659_s14] sm:$0xff]  ;;  %v4665_v1 = vld [vmem:[%s4659_s14 + $0x10] sm:$0xff]  ;;  %v4672_v4 = vld [vmem:[%s4659_s14 + $0x8] sm:$0xff]  ;;  %s5574_s25 = smov 112   ;;  %s5572_s27 = smov 48  }
  0x2d   : > { %v500_v2 = vsel %vm499_vm0, %v4662_v0, 0.0  ;;  %v523_v3 = vmul.f32 %v4662_v0, %v4662_v0  ;;  %v506_v5 = vsel %vm499_vm0, %v4665_v1, 0.0  ;;  %v503_v7 = vsel %vm499_vm0, %v4672_v4, 0.0  ;;  %v4682_v9 = vld [vmem:[%s4659_s14 + $0x18] sm:$0xff]  ;;  %v4119_v17 = vpop.eup %4118  ;;  %s5566_s17 = smov 72   ;;  %s5564_s19 = smov 104  }
  0x2e   : > { %501 = vadd.xlane.f32.xlu0 %v500_v2  ;;  %507 = vadd.xlane.f32.xlu2 %v506_v5  ;;  %v524_v8 = vmul.f32 %v4672_v4, %v4672_v4  ;;  %v509_v10 = vsel %vm499_vm0, %v4682_v9, 0.0  ;;  %v525_v12 = vmul.f32 %v4665_v1, %v4665_v1  ;;  %v526_v13 = vmul.f32 %v4682_v9, %v4682_v9  ;;  %s5562_s20 = smov 40   ;;  %s5560_s23 = smov 8  }
  0x2f   : > { %v527_v6 = vsel %vm499_vm0, %v523_v3, 0.0  ;;  %v513_v18 = vmul.f32 32.0, %v4119_v17  ;;  %vm517_vm1 = vweird.f32 %v4119_v17  ;;  %s5570_s15 = smov 16   ;;  %s5568_s16 = smov 24  }
  0x30   : > { %528 = vadd.xlane.f32.xlu1 %v527_v6  ;;  %v530_v11 = vsel %vm499_vm0, %v524_v8, 0.0  ;;  %v533_v14 = vsel %vm499_vm0, %v525_v12, 0.0  ;;  %v536_v15 = vsel %vm499_vm0, %v526_v13, 0.0 }
  0x31   : > { %v514_v19 = vsub.f32 1.0, %v513_v18 }
  0x33   : > { %v515_v20 = vmul.f32 %v4119_v17, %v514_v19 }
  0x35   : > { %v516_v21 = vadd.f32 %v4119_v17, %v515_v20 }
  0x36   : > { %504 = vadd.xlane.f32.xlu0 %v503_v7  ;;  %510 = vadd.xlane.f32.xlu2 %v509_v10 }
  0x37   : > { %v4693_v22 = vsel %vm517_vm1, %v4119_v17, %v516_v21  ;;  %vm1626_vm1 = vcmask 130048  }
  0x38   : > { %531 = vadd.xlane.f32.xlu1 %v530_v11 }
  0x3e   : > { %534 = vadd.xlane.f32.xlu0 %v533_v14  ;;  %v4102_v14 = vld [vmem:[#allocation5] ss:$0 sm:$0xff] }
  0x40   : > { %537 = vadd.xlane.f32.xlu1 %v536_v15 }
  0xa1   : > { %v502_v23 = vpop.xlane.xlu0 %501  ;;  %v508_v25 = vpop.xlane.xlu2 %507 }
  0xa2   : > { %v519_v24 = vmul.f32 %v4693_v22, %v502_v23  ;;  %v4709_v39 = vmul.f32 %v4693_v22, %v508_v25 }
  0xa3   : > { %v529_v26 = vpop.xlane.xlu1 %528 }
  0xa4   : > { %v543_v27 = vmul.f32 %v519_v24, %v519_v24  ;;  %v539_v28 = vmul.f32 %v529_v26, %v4693_v22  ;;  %v545_v43 = vmul.f32 %v4709_v39, %v4709_v39  ;;  %v555_v7 = vsub.f32 %v4662_v0, %v519_v24  ;;  %v4103_v26 = vld [vmem:[%s5547_s6] ss:$0 sm:$0xff] }
  0xa6   : > { %v547_v29 = vsub.f32 %v539_v28, %v543_v27 }
  0xa8   : > { %v551_v31 = vmax.f32 %v547_v29, 0.0  ;;  %v557_v29 = vsub.f32 %v4665_v1, %v4709_v39  ;;  %v4104_v1 = vld [vmem:[#allocation2] ss:$0 sm:$0xff] }
  0xa9   : > { %v505_v32 = vpop.xlane.xlu0 %504  ;;  %v511_v37 = vpop.xlane.xlu2 %510 }
  0xaa   : > { %v559_v33 = vadd.f32 1e-12, %v551_v31  ;;  %v4701_v34 = vmul.f32 %v4693_v22, %v505_v32  ;;  %v4713_v41 = vmul.f32 %v4693_v22, %v511_v37 }
  0xab   : > { %v532_v36 = vpop.xlane.xlu1 %531 }
  0xac   : > { %4120 = vrsqrt.f32 %v559_v33  ;;  %v544_v38 = vmul.f32 %v4701_v34, %v4701_v34  ;;  %v540_v40 = vmul.f32 %v532_v36, %v4693_v22  ;;  %v546_v47 = vmul.f32 %v4713_v41, %v4713_v41 }
  0xad   : > { %vm569_vm3 = vweird.f32 %v559_v33  ;;  %v556_v18 = vsub.f32 %v4672_v4, %v4701_v34  ;;  %v558_v30 = vsub.f32 %v4682_v9, %v4713_v41 }
  0xae   : > { %v548_v42 = vsub.f32 %v540_v40, %v544_v38 }
  0xb0   : > { %v552_v44 = vmax.f32 %v548_v42, 0.0 }
  0xb1   : > { %v535_v45 = vpop.xlane.xlu0 %534 }
  0xb2   : > { %v4121_v46 = vpop.eup %4120  ;;  %v541_v48 = vmul.f32 %v535_v45, %v4693_v22  ;;  %v560_v50 = vadd.f32 1e-12, %v552_v44 }
  0xb3   : > { %v564_v49 = vmul.f32 %v4121_v46, %v559_v33  ;;  %v538_v51 = vpop.xlane.xlu1 %537  ;;  %vm570_vm2 = vweird.f32 %v4121_v46 }
  0xb4   : > { %v542_v52 = vmul.f32 %v538_v51, %v4693_v22  ;;  %v549_v53 = vsub.f32 %v541_v48, %v545_v43  ;;  %4122 = vrsqrt.f32 %v560_v50  ;;  %vm571_vm4 = vmor %vm569_vm3, %vm570_vm2  ;;  %vm579_vm6 = vweird.f32 %v560_v50 }
  0xb5   : > { %v565_v54 = vmul.f32 %v4121_v46, %v564_v49  ;;  %vm1631_vm2 = vcmask 195584  }
  0xb6   : > { %v550_v55 = vsub.f32 %v542_v52, %v546_v47  ;;  %v553_v56 = vmax.f32 %v549_v53, 0.0 }
  0xb7   : > { %v566_v57 = vmul.f32 0.5, %v565_v54 }
  0xb8   : > { %v554_v58 = vmax.f32 %v550_v55, 0.0  ;;  %v561_v59 = vadd.f32 1e-12, %v553_v56 }
  0xb9   : > { %v567_v60 = vsub.f32 1.5, %v566_v57 }
  0xba   : > { %v562_v61 = vadd.f32 1e-12, %v554_v58  ;;  %4124 = vrsqrt.f32 %v561_v59  ;;  %v4123_v62 = vpop.eup %4122  ;;  %vm589_vm8 = vweird.f32 %v561_v59 }
  0xbb   : > { %v568_v63 = vmul.f32 %v4121_v46, %v567_v60  ;;  %v574_v2 = vmul.f32 %v4123_v62, %v560_v50  ;;  %vm580_vm5 = vweird.f32 %v4123_v62 }
  0xbc   : > { %4126 = vrsqrt.f32 %v562_v61  ;;  %vm581_vm7 = vmor %vm579_vm6, %vm580_vm5  ;;  %vm599_vm9 = vweird.f32 %v562_v61 }
  0xbd   : > { %v575_v3 = vmul.f32 %v4123_v62, %v574_v2  ;;  %v572_v5 = vsel %vm571_vm4, %v4121_v46, %v568_v63 }
  0xbe   : > { %v603_v13 = vmul.f32 %v572_v5, %v555_v7 }
  0xbf   : > { %v576_v8 = vmul.f32 0.5, %v575_v3 }
  0xc0   : > { %v4125_v6 = vpop.eup %4124  ;;  %v610_v21 = vmul.f32 %v4102_v14, %v603_v13 }
  0xc1   : > { %v584_v10 = vmul.f32 %v4125_v6, %v561_v59  ;;  %v577_v12 = vsub.f32 1.5, %v576_v8  ;;  %vm590_vm10 = vweird.f32 %v4125_v6 }
  0xc2   : > { %v4127_v11 = vpop.eup %4126  ;;  %vm591_vm12 = vmor %vm589_vm8, %vm590_vm10  ;;  %v617_v32 = vadd.f32 %v4103_v26, %v610_v21 }
  0xc3   : > { %v594_v15 = vmul.f32 %v4127_v11, %v562_v61  ;;  %v585_v16 = vmul.f32 %v4125_v6, %v584_v10  ;;  %v578_v17 = vmul.f32 %v4123_v62, %v577_v12  ;;  %vm600_vm11 = vweird.f32 %v4127_v11 }
  0xc4   : > { %vm601_vm13 = vmor %vm599_vm9, %vm600_vm11 }
  0xc5   : > { %v595_v19 = vmul.f32 %v4127_v11, %v594_v15  ;;  %v586_v20 = vmul.f32 0.5, %v585_v16  ;;  %v582_v0 = vsel %vm581_vm7, %v4123_v62, %v578_v17 }
  0xc6   : > { %v604_v25 = vmul.f32 %v582_v0, %v556_v18 }
  0xc7   : > { %v596_v23 = vmul.f32 0.5, %v595_v19  ;;  %v587_v24 = vsub.f32 1.5, %v586_v20 }
  0xc8   : > { %v611_v4 = vmul.f32 %v4102_v14, %v604_v25 }
  0xc9   : > { %v597_v27 = vsub.f32 1.5, %v596_v23  ;;  %v588_v28 = vmul.f32 %v4125_v6, %v587_v24 }
  0xca   : > { %v618_v33 = vadd.f32 %v4103_v26, %v611_v4 }
  0xcb   : > { %v598_v31 = vmul.f32 %v4127_v11, %v597_v27  ;;  %v592_v34 = vsel %vm591_vm12, %v4125_v6, %v588_v28 }
  0xcc   : > { %v621_v35 = vpack.c.bf16 %v618_v33, %v617_v32  ;;  %v605_v37 = vmul.f32 %v592_v34, %v557_v29 }
  0xcd   : > { %v602_v36 = vsel %vm601_vm13, %v4127_v11, %v598_v31 }
  0xce   : > { %3699 = vmatmul.msk.bf16.vlgmr.msra.gmra.mxu0 %vm499_vm0, %v621_v35  ;;  %v606_v38 = vmul.f32 %v602_v36, %v558_v30  ;;  %v612_v40 = vmul.f32 %v4102_v14, %v605_v37 }
  0xd0   : > { %v613_v42 = vmul.f32 %v4102_v14, %v606_v38  ;;  %v619_v43 = vadd.f32 %v4103_v26, %v612_v40 }
  0xd2   : > { %v620_v44 = vadd.f32 %v4103_v26, %v613_v42 }
  0xd4   : > { %v622_v45 = vpack.c.bf16 %v620_v44, %v619_v43 }
  0xde   : > { %3700 = vmatmul.msk.bf16.gmra.mxu0 %vm499_vm0, %v622_v45 }
 0x14b   : > { %v658_v39 = vpop.f32.mrf.mxu0 }
 0x14c   : > { %v659_v9 = vadd.f32 %v4104_v1, %v658_v39 }
 0x14e   : > { %v668_v41 = vpack.c.bf16 %v659_v9, %v659_v9 }
 0x150   : > { %v673_v46 = vunpack.c.l.b16 %v668_v41 }
 0x152   : > { %v4733_v47 = vpack.c.b16 %v673_v46, %v673_v46 }
 0x153   : > { %v660_v48 = vpop.f32.mrf.mxu0 }
 0x154   : > { %v661_v49 = vadd.f32 %v4104_v1, %v660_v48  ;;  %675 = vrot.lane.b32.xlu2 %v4733_v47, %s4484_s21 }
 0x156   : > { %v669_v50 = vpack.c.bf16 %v661_v49, %v661_v49 }
 0x158   : > { %v698_v51 = vunpack.c.l.b16 %v669_v50 }
 0x15a   : > { %v4737_v52 = vpack.c.b16 %v698_v51, %v698_v51 }
 0x15b   : > { %v663_v53 = vpop.f32.mrf.mxu0 }
 0x15c   : > { %v664_v54 = vadd.f32 %v4104_v1, %v663_v53  ;;  %700 = vrot.lane.b32.xlu0 %v4737_v52, %s4484_s21 }
 0x15e   : > { %v670_v55 = vpack.c.bf16 %v664_v54, %v664_v54 }
 0x160   : > { %v722_v56 = vunpack.c.l.b16 %v670_v55 }
 0x162   : > { %v4741_v57 = vpack.c.b16 %v722_v56, %v722_v56 }
 0x163   : > { %v665_v58 = vpop.f32.mrf.mxu0 }
 0x164   : > { %v666_v59 = vadd.f32 %v4104_v1, %v665_v58  ;;  %724 = vrot.lane.b32.xlu1 %v4741_v57, %s4484_s21 }
 0x166   : > { %v671_v60 = vpack.c.bf16 %v666_v59, %v666_v59 }
 0x168   : > { %v746_v61 = vunpack.c.l.b16 %v671_v60 }
 0x16a   : > { %v4745_v62 = vpack.c.b16 %v746_v61, %v746_v61 }
 0x16c   : > { %748 = vrot.lane.b32.xlu2 %v4745_v62, %s4484_s21 }
 0x1ae   : > { %v676_v63 = vpop.permute.xlu2 %675 }
 0x1af   : > { %v682_v2 = vsel %vm677_vm14, %v676_v63, 0 }
 0x1b0   : > { %691 = vmatpush.bf16.xpose.msra.mxu2 %v682_v2 }
 0x1b7   : > { %3701 = vmatmul.msk.bf16.vlgmr.msra.gmra.mxu2 %vm677_vm14, %v668_v41 }
 0x1c6   : > { %v749_v3 = vpop.permute.xlu2 %748 }
 0x1c7   : > { %v754_v5 = vsel %vm677_vm14, %v749_v3, 0 }
 0x1c8   : > { %763 = vmatpush.bf16.xpose.msra.mxu1 %v754_v5 }
 0x1ce   : > { %v701_v6 = vpop.permute.xlu0 %700 }
 0x1cf   : > { %3704 = vmatmul.msk.bf16.vlgmr.msra.gmra.mxu1 %vm677_vm14, %v671_v60  ;;  %v706_v7 = vsel %vm677_vm14, %v701_v6, 0 }
 0x1d0   : > { %715 = vmatpush.bf16.xpose.msrb.mxu2 %v706_v7 }
 0x1d6   : > { %v725_v8 = vpop.permute.xlu1 %724 }
 0x1d7   : > { %3702 = vmatmul.msk.bf16.vlgmr.msrb.gmra.mxu2 %vm677_vm14, %v669_v50  ;;  %v730_v10 = vsel %vm677_vm14, %v725_v8, 0 }
 0x1d8   : > { %739 = vmatpush.bf16.xpose.msra.mxu3 %v730_v10 }
 0x1df   : > { %3703 = vmatmul.msk.bf16.vlgmr.msra.gmra.mxu3 %vm677_vm14, %v670_v55 }
 0x23a   : > { %v693_v11 = vpop.f32.mrf.mxu2 }
 0x23b   : > { %v769_v12 = vsel %vm677_vm14, %v693_v11, -inf }
 0x23c   : > { %770 = vmax.xlane.f32.xlu0 %v769_v12 }
 0x242   : > { %v695_v13 = vpop.f32.mrf.mxu2 }
 0x24c   : > { %v765_v14 = vpop.f32.mrf.mxu1 }
 0x24d   : > { %v778_v21 = vsel %vm677_vm14, %v765_v14, -inf }
 0x250   : > { %817 = vrot.lane.b32.xlu0 %v4733_v47, %s4485_s22 }
 0x254   : > { %v767_v15 = vpop.f32.mrf.mxu1 }
 0x25a   : > { %v717_v16 = vpop.f32.mrf.mxu2 }
 0x25b   : > { %v772_v17 = vsel %vm677_vm14, %v717_v16, -inf }
 0x25c   : > { %773 = vmax.xlane.f32.xlu2 %v772_v17 }
 0x262   : > { %v719_v18 = vpop.f32.mrf.mxu2  ;;  %v741_v19 = vpop.f32.mrf.mxu3 }
 0x263   : > { %v775_v20 = vsel %vm677_vm14, %v741_v19, -inf }
 0x264   : > { %776 = vmax.xlane.f32.xlu1 %v775_v20 }
 0x26a   : > { %v743_v0 = vpop.f32.mrf.mxu3 }
 0x274   : > { %839 = vrot.lane.b32.xlu2 %v4737_v52, %s4485_s22 }
 0x27a   : > { %779 = vmax.xlane.f32.xlu0 %v778_v21 }
 0x28e   : > { %927 = vrot.lane.b32.xlu0 %v4737_v52, %s4486_s24 }
 0x296   : > { %925 = vrot.lane.b32.xlu0 %v4737_v52, %s4487_s30 }
 0x29e   : > { %860 = vrot.lane.b32.xlu0 %v4741_v57, %s4485_s22 }
 0x2a6   : > { %881 = vrot.lane.b32.xlu0 %v4745_v62, %s4485_s22 }
 0x2ae   : > { %950 = vrot.lane.b32.xlu0 %v4741_v57, %s4486_s24 }
 0x2af   : > { %v771_v23 = vpop.xlane.xlu0 %770 }
 0x2b0   : > { %v781_v24 = vsub.f32 %v693_v11, %v771_v23 }
 0x2b2   : > { %v785_v25 = vmul.f32 1.442695, %v781_v24 }
 0x2b4   : > { %4128 = vpow2.f32 %v785_v25 }
 0x2b6   : > { %973 = vrot.lane.b32.xlu0 %v4745_v62, %s4486_s24 }
 0x2ba   : > { %v4129_v26 = vpop.eup %4128 }
 0x2bb   : > { %v793_v27 = vsel %vm677_vm14, %v4129_v26, 0.0 }
 0x2bc   : > { %794 = vadd.xlane.f32.xlu2 %v793_v27 }
 0x2be   : > { %948 = vrot.lane.b32.xlu0 %v4741_v57, %s4487_s30 }
 0x2c2   : > { %v818_v28 = vpop.permute.xlu0 %817 }
 0x2c3   : > { %v824_v4 = vsel %vm822_vm15, %v818_v28, 0 }
 0x2c4   : > { %833 = vmatpush.bf16.msra.mxu2 %v824_v4 }
 0x2cf   : > { %v774_v29 = vpop.xlane.xlu2 %773 }
 0x2d0   : > { %v782_v30 = vsub.f32 %v717_v16, %v774_v29 }
 0x2d2   : > { %v787_v31 = vmul.f32 1.442695, %v782_v30 }
 0x2d4   : > { %4130 = vpow2.f32 %v787_v31  ;;  %902 = vrot.lane.b32.xlu2 %v4733_v47, %s4487_s30 }
 0x2d7   : > { %v840_v32 = vpop.permute.xlu2 %839  ;;  %v777_v1 = vpop.xlane.xlu1 %776 }
 0x2d8   : > { %v845_v33 = vsel %vm822_vm15, %v840_v32, 0  ;;  %v783_v39 = vsub.f32 %v741_v19, %v777_v1 }
 0x2d9   : > { %854 = vmatpush.bf16.msrb.mxu3 %v845_v33 }
 0x2da   : > { %v4131_v34 = vpop.eup %4130  ;;  %v789_v41 = vmul.f32 1.442695, %v783_v39 }
 0x2db   : > { %v796_v35 = vsel %vm677_vm14, %v4131_v34, 0.0 }
 0x2dc   : > { %797 = vadd.xlane.f32.xlu1 %v796_v35 }
 0x2ed   : > { %v780_v36 = vpop.xlane.xlu0 %779 }
 0x2ee   : > { %v784_v37 = vsub.f32 %v765_v14, %v780_v36 }
 0x2f0   : > { %v791_v38 = vmul.f32 1.442695, %v784_v37 }
 0x2f2   : > { %4132 = vpow2.f32 %v791_v38 }
 0x2f3   : > { %4134 = vpow2.f32 %v789_v41 }
 0x2f5   : > { %904 = vrot.lane.b32.xlu1 %v4733_v47, %s4486_s24 }
 0x2f8   : > { %v4133_v40 = vpop.eup %4132 }
 0x2f9   : > { %v802_v42 = vsel %vm677_vm14, %v4133_v40, 0.0  ;;  %v4135_v50 = vpop.eup %4134 }
 0x2fa   : > { %v799_v51 = vsel %vm677_vm14, %v4135_v50, 0.0 }
 0x2fd   : > { %803 = vadd.xlane.f32.xlu2 %v802_v42 }
 0x300   : > { %v928_v43 = vpop.permute.xlu0 %927 }
 0x301   : > { %v933_v44 = vsel %vm677_vm14, %v928_v43, 0 }
 0x302   : > { %942 = vmatpush.bf16.xpose.msra.mxu3 %v933_v44 }
 0x308   : > { %v926_v45 = vpop.permute.xlu0 %925 }
 0x310   : > { %v861_v9 = vpop.permute.xlu0 %860 }
 0x311   : > { %v866_v46 = vsel %vm822_vm15, %v861_v9, 0 }
 0x312   : > { %875 = vmatpush.bf16.msrb.mxu0 %v866_v46 }
 0x315   : > { %1042 = vrot.lane.b32.xlu2 %v4733_v47, %s5576_s5 }
 0x318   : > { %v882_v48 = vpop.permute.xlu0 %881 }
 0x319   : > { %v887_v49 = vsel %vm822_vm15, %v882_v48, 0 }
 0x31a   : > { %896 = vmatpush.bf16.msrb.mxu1 %v887_v49 }
 0x31d   : > { %1128 = vrot.lane.b32.xlu2 %v4733_v47, %s4489_s2 }
 0x31f   : > { %800 = vadd.xlane.f32.xlu1 %v799_v51 }
 0x320   : > { %v951_v53 = vpop.permute.xlu0 %950 }
 0x321   : > { %v956_v54 = vsel %vm677_vm14, %v951_v53, 0 }
 0x322   : > { %965 = vmatpush.bf16.xpose.msra.mxu0 %v956_v54 }
 0x328   : > { %v974_v55 = vpop.permute.xlu0 %973 }
 0x329   : > { %v979_v56 = vsel %vm677_vm14, %v974_v55, 0 }
 0x32a   : > { %988 = vmatpush.bf16.xpose.msra.mxu1 %v979_v56 }
 0x32f   : > { %v795_v58 = vpop.xlane.xlu2 %794 }
 0x330   : > { %4136 = vrcp.f32 %v795_v58  ;;  %v949_v23 = vpop.permute.xlu0 %948 }
 0x336   : > { %v4137_v59 = vpop.eup %4136 }
 0x337   : > { %v809_v60 = vmul.f32 %v4137_v59, %v4129_v26  ;;  %v903_v7 = vpop.permute.xlu2 %902 }
 0x338   : > { %971 = vrot.lane.b32.xlu1 %v4745_v62, %s4487_s30 }
 0x339   : > { %v813_v61 = vpack.c.bf16 %v809_v60, %v809_v60 }
 0x33b   : > { %3705 = vmatmul.msk.bf16.vlgmr.msra.gmra.mxu2 %vm677_vm14, %v813_v61 }
 0x340   : > { %1126 = vrot.lane.b32.xlu1 %v4733_v47, %s5574_s25 }
 0x34f   : > { %v798_v63 = vpop.xlane.xlu1 %797 }
 0x350   : > { %4138 = vrcp.f32 %v798_v63 }
 0x356   : > { %v4139_v2 = vpop.eup %4138 }
 0x357   : > { %v810_v3 = vmul.f32 %v4139_v2, %v4131_v34 }
 0x359   : > { %v814_v5 = vpack.c.bf16 %v810_v3, %v810_v3 }
 0x35b   : > { %3706 = vmatmul.msk.bf16.vlgmr.msrb.gmra.mxu3 %vm677_vm14, %v814_v5 }
 0x367   : > { %v905_v6 = vpop.permute.xlu1 %904 }
 0x368   : > { %v910_v8 = vsel %vm677_vm14, %v905_v6, 0 }
 0x369   : > { %919 = vmatpush.bf16.xpose.msrb.mxu2 %v910_v8 }
 0x36b   : > { %3710 = vmatmul.msk.bf16.vlgmr.msra.gmra.mxu3 %vm677_vm14, %v926_v45 }
 0x370   : > { %3709 = vmatmul.msk.bf16.vlgmr.msrb.gmra.mxu2 %vm677_vm14, %v903_v7  ;;  %v804_v10 = vpop.xlane.xlu2 %803 }
 0x371   : > { %4140 = vrcp.f32 %v804_v10 }
 0x377   : > { %v4141_v11 = vpop.eup %4140 }
 0x378   : > { %v1043_v12 = vpop.permute.xlu2 %1042  ;;  %v812_v13 = vmul.f32 %v4141_v11, %v4133_v40 }
 0x379   : > { %v1048_v14 = vsel %vm822_vm15, %v1043_v12, 0 }
 0x37a   : > { %1057 = vmatpush.bf16.msra.mxu2 %v1048_v14  ;;  %v816_v15 = vpack.c.bf16 %v812_v13, %v812_v13 }
 0x37c   : > { %3708 = vmatmul.msk.bf16.vlgmr.msrb.gmra.mxu1 %vm677_vm14, %v816_v15 }
 0x380   : > { %v1129_v16 = vpop.permute.xlu2 %1128 }
 0x381   : > { %v1134_v17 = vsel %vm677_vm14, %v1129_v16, 0 }
 0x382   : > { %1143 = vmatpush.bf16.xpose.msrb.mxu2 %v1134_v17 }
 0x392   : > { %v801_v18 = vpop.xlane.xlu1 %800 }
 0x393   : > { %4142 = vrcp.f32 %v801_v18 }
 0x399   : > { %v4143_v19 = vpop.eup %4142 }
 0x39a   : > { %v811_v20 = vmul.f32 %v4143_v19, %v4135_v50 }
 0x39c   : > { %v815_v0 = vpack.c.bf16 %v811_v20, %v811_v20 }
 0x39e   : > { %3707 = vmatmul.msk.bf16.vlgmr.msrb.gmra.mxu0 %vm677_vm14, %v815_v0 }
 0x3aa   : > { %v972_v21 = vpop.permute.xlu1 %971 }
 0x3ab   : > { %3712 = vmatmul.msk.bf16.vlgmr.msra.gmra.mxu1 %vm677_vm14, %v972_v21 }
 0x3ae   : > { %3711 = vmatmul.msk.bf16.vlgmr.msra.gmra.mxu0 %vm677_vm14, %v949_v23 }
 0x3b2   : > { %v1127_v3 = vpop.permute.xlu1 %1126 }
 0x3be   : > { %v4813_v24 = vpop.f32.mrf.mxu2 }
 0x3c6   : > { %v837_v25 = vpop.f32.mrf.mxu2 }
 0x3de   : > { %v4815_v26 = vpop.f32.mrf.mxu3 }
 0x3e6   : > { %v858_v27 = vpop.f32.mrf.mxu3 }
 0x3ee   : > { %v944_v28 = vpop.f32.mrf.mxu3 }
 0x3ef   : > { %v997_v44 = vsel %vm677_vm14, %v944_v28, -inf }
 0x3f3   : > { %v921_v4 = vpop.f32.mrf.mxu2 }
 0x3f4   : > { %v994_v29 = vsel %vm677_vm14, %v921_v4, -inf }
 0x3f5   : > { %995 = vmax.xlane.f32.xlu0 %v994_v29 }
 0x3f6   : > { %v946_v30 = vpop.f32.mrf.mxu3 }
 0x3f9   : > { %v4818_v31 = vpop.f32.mrf.mxu1 }
 0x3fb   : > { %v923_v32 = vpop.f32.mrf.mxu2 }
 0x401   : > { %v900_v33 = vpop.f32.mrf.mxu1 }
 0x409   : > { %1063 = vrot.lane.b32.xlu0 %v4737_v52, %s5576_s5 }
 0x411   : > { %1151 = vrot.lane.b32.xlu0 %v4737_v52, %s4489_s2 }
 0x41b   : > { %v4824_v34 = vpop.f32.mrf.mxu0 }
 0x423   : > { %v879_v35 = vpop.f32.mrf.mxu0 }
 0x428   : > { %v990_v36 = vpop.f32.mrf.mxu1 }
 0x429   : > { %v1003_v43 = vsel %vm677_vm14, %v990_v36, -inf }
 0x42b   : > { %v967_v37 = vpop.f32.mrf.mxu0 }
 0x42c   : > { %v1000_v38 = vsel %vm677_vm14, %v967_v37, -inf }
 0x42d   : > { %1001 = vmax.xlane.f32.xlu2 %v1000_v38 }
 0x430   : > { %v992_v40 = vpop.f32.mrf.mxu1 }
 0x433   : > { %v969_v42 = vpop.f32.mrf.mxu0 }
 0x435   : > { %1004 = vmax.xlane.f32.xlu2 %v1003_v43 }
 0x43d   : > { %998 = vmax.xlane.f32.xlu2 %v997_v44 }
 0x468   : > { %v996_v45 = vpop.xlane.xlu0 %995 }
 0x469   : > { %v1006_v1 = vsub.f32 %v921_v4, %v996_v45 }
 0x46b   : > { %v1010_v39 = vmul.f32 1.442695, %v1006_v1 }
 0x46d   : > { %4144 = vpow2.f32 %v1010_v39 }
 0x473   : > { %v4145_v9 = vpop.eup %4144 }
 0x474   : > { %v1018_v41 = vsel %vm677_vm14, %v4145_v9, 0.0 }
 0x475   : > { %1019 = vadd.xlane.f32.xlu1 %v1018_v41 }
 0x47b   : > { %v1064_v46 = vpop.permute.xlu0 %1063 }
 0x47c   : > { %v1069_v48 = vsel %vm822_vm15, %v1064_v46, 0 }
 0x47d   : > { %1078 = vmatpush.bf16.msrb.mxu3 %v1069_v48 }
 0x483   : > { %v1152_v49 = vpop.permute.xlu0 %1151 }
 0x484   : > { %v1157_v50 = vsel %vm677_vm14, %v1152_v49, 0 }
 0x485   : > { %1166 = vmatpush.bf16.xpose.msra.mxu3 %v1157_v50 }
 0x48e   : > { %1084 = vrot.lane.b32.xlu1 %v4741_v57, %s5576_s5 }
 0x496   : > { %1105 = vrot.lane.b32.xlu1 %v4745_v62, %s5576_s5  ;;  %s5596_s5 = smov 40  }
 0x49e   : > { %1174 = vrot.lane.b32.xlu1 %v4741_v57, %s4489_s2 }
 0x4a0   : > { %v1002_v51 = vpop.xlane.xlu2 %1001 }
 0x4a1   : > { %v1008_v53 = vsub.f32 %v967_v37, %v1002_v51 }
 0x4a3   : > { %v1014_v54 = vmul.f32 1.442695, %v1008_v53 }
 0x4a5   : > { %4146 = vpow2.f32 %v1014_v54 }
 0x4a6   : > { %1172 = vrot.lane.b32.xlu1 %v4741_v57, %s5574_s25 }
 0x4a8   : > { %v1005_v55 = vpop.xlane.xlu2 %1004 }
 0x4a9   : > { %v1009_v6 = vsub.f32 %v990_v36, %v1005_v55 }
 0x4ab   : > { %v4147_v56 = vpop.eup %4146  ;;  %v1016_v8 = vmul.f32 1.442695, %v1009_v6 }
 0x4ac   : > { %v1024_v58 = vsel %vm677_vm14, %v4147_v56, 0.0 }
 0x4ad   : > { %1025 = vadd.xlane.f32.xlu0 %v1024_v58 }
 0x4b0   : > { %v999_v59 = vpop.xlane.xlu2 %998 }
 0x4b1   : > { %v1007_v60 = vsub.f32 %v944_v28, %v999_v59 }
 0x4b3   : > { %v1012_v61 = vmul.f32 1.442695, %v1007_v60 }
 0x4b5   : > { %4148 = vpow2.f32 %v1012_v61 }
 0x4bb   : > { %v4149_v63 = vpop.eup %4148 }
 0x4bc   : > { %v1021_v2 = vsel %vm677_vm14, %v4149_v63, 0.0 }
 0x4bd   : > { %1022 = vadd.xlane.f32.xlu2 %v1021_v2 }
 0x4c1   : > { %1197 = vrot.lane.b32.xlu0 %v4745_v62, %s4489_s2 }
 0x4d5   : > { %1149 = vrot.lane.b32.xlu2 %v4737_v52, %s5574_s25 }
 0x4e8   : > { %v1020_v5 = vpop.xlane.xlu1 %1019 }
 0x4e9   : > { %4150 = vrcp.f32 %v1020_v5 }
 0x4ea   : > { %4152 = vpow2.f32 %v1016_v8 }
 0x4ef   : > { %v4151_v7 = vpop.eup %4150 }
 0x4f0   : > { %v1034_v10 = vmul.f32 %v4151_v7, %v4145_v9  ;;  %v4153_v12 = vpop.eup %4152 }
 0x4f1   : > { %v1027_v13 = vsel %vm677_vm14, %v4153_v12, 0.0 }
 0x4f2   : > { %v1038_v11 = vpack.c.bf16 %v1034_v10, %v1034_v10 }
 0x4f4   : > { %3713 = vmatmul.msk.bf16.vlgmr.msra.gmra.mxu2 %vm677_vm14, %v1038_v11 }
 0x4fe   : > { %1028 = vadd.xlane.f32.xlu2 %v1027_v13 }
 0x500   : > { %v1085_v14 = vpop.permute.xlu1 %1084 }
 0x501   : > { %v1090_v15 = vsel %vm822_vm15, %v1085_v14, 0 }
 0x502   : > { %1099 = vmatpush.bf16.msrb.mxu0 %v1090_v15 }
 0x504   : > { %3717 = vmatmul.msk.bf16.vlgmr.msrb.gmra.mxu2 %vm677_vm14, %v1127_v3 }
 0x508   : > { %v1106_v16 = vpop.permute.xlu1 %1105 }
 0x509   : > { %v1111_v17 = vsel %vm822_vm15, %v1106_v16, 0 }
 0x50a   : > { %1120 = vmatpush.bf16.msrb.mxu1 %v1111_v17 }
 0x510   : > { %v1175_v18 = vpop.permute.xlu1 %1174 }
 0x511   : > { %v1180_v19 = vsel %vm677_vm14, %v1175_v18, 0 }
 0x512   : > { %1189 = vmatpush.bf16.xpose.msra.mxu0 %v1180_v19 }
 0x516   : > { %1195 = vrot.lane.b32.xlu2 %v4745_v62, %s5574_s25  ;;  %s5597_s25 = smov 16  }
 0x518   : > { %v1173_v32 = vpop.permute.xlu1 %1172 }
 0x520   : > { %v1026_v20 = vpop.xlane.xlu0 %1025 }
 0x521   : > { %4154 = vrcp.f32 %v1026_v20 }
 0x527   : > { %v4155_v0 = vpop.eup %4154 }
 0x528   : > { %v1036_v21 = vmul.f32 %v4155_v0, %v4147_v56 }
 0x52a   : > { %v1040_v23 = vpack.c.bf16 %v1036_v21, %v1036_v21 }
 0x52c   : > { %3715 = vmatmul.msk.bf16.vlgmr.msrb.gmra.mxu0 %vm677_vm14, %v1040_v23 }
 0x530   : > { %v1023_v25 = vpop.xlane.xlu2 %1022 }
 0x531   : > { %4156 = vrcp.f32 %v1023_v25 }
 0x533   : > { %v1198_v27 = vpop.permute.xlu0 %1197 }
 0x534   : > { %v1203_v28 = vsel %vm677_vm14, %v1198_v27, 0 }
 0x535   : > { %1212 = vmatpush.bf16.xpose.msra.mxu1 %v1203_v28 }
 0x537   : > { %v4157_v4 = vpop.eup %4156 }
 0x538   : > { %v1035_v29 = vmul.f32 %v4157_v4, %v4149_v63  ;;  %v1150_v33 = vpop.permute.xlu2 %1149 }
 0x53a   : > { %v1039_v30 = vpack.c.bf16 %v1035_v29, %v1035_v29 }
 0x53c   : > { %3714 = vmatmul.msk.bf16.vlgmr.msrb.gmra.mxu3 %vm677_vm14, %v1039_v30  ;;  %3719 = vmatmul.msk.bf16.vlgmr.msra.gmra.mxu0 %vm677_vm14, %v1173_v32 }
 0x54c   : > { %3718 = vmatmul.msk.bf16.vlgmr.msra.gmra.mxu3 %vm677_vm14, %v1150_v33 }
 0x571   : > { %v1029_v35 = vpop.xlane.xlu2 %1028 }
 0x572   : > { %4158 = vrcp.f32 %v1029_v35 }
 0x577   : > { %v4859_v36 = vpop.f32.mrf.mxu2 }
 0x578   : > { %v4159_v37 = vpop.eup %4158 }
 0x579   : > { %v1037_v38 = vmul.f32 %v4159_v37, %v4153_v12  ;;  %v1196_v45 = vpop.permute.xlu2 %1195 }
 0x57b   : > { %v1041_v40 = vpack.c.bf16 %v1037_v38, %v1037_v38 }
 0x57d   : > { %3716 = vmatmul.msk.bf16.vlgmr.msrb.gmra.mxu1 %vm677_vm14, %v1041_v40 }
 0x57f   : > { %v1061_v42 = vpop.f32.mrf.mxu2 }
 0x587   : > { %v1145_v43 = vpop.f32.mrf.mxu2 }
 0x588   : > { %v1218_v44 = vsel %vm677_vm14, %v1145_v43, -inf }
 0x589   : > { %1219 = vmax.xlane.f32.xlu1 %v1218_v44 }
 0x58d   : > { %3720 = vmatmul.msk.bf16.vlgmr.msra.gmra.mxu1 %vm677_vm14, %v1196_v45 }
 0x58f   : > { %v1147_v1 = vpop.f32.mrf.mxu2 }
 0x5a9   : > { %v4864_v39 = vpop.f32.mrf.mxu0 }
 0x5b1   : > { %v1103_v9 = vpop.f32.mrf.mxu0 }
 0x5b9   : > { %v1191_v41 = vpop.f32.mrf.mxu0 }
 0x5ba   : > { %v1224_v46 = vsel %vm677_vm14, %v1191_v41, -inf }
 0x5bb   : > { %1225 = vmax.xlane.f32.xlu2 %v1224_v46 }
 0x5bf   : > { %v4867_v48 = vpop.f32.mrf.mxu3 }
 0x5c1   : > { %v1193_v49 = vpop.f32.mrf.mxu0 }
 0x5c7   : > { %v1082_v50 = vpop.f32.mrf.mxu3 }
 0x5cf   : > { %v1168_v51 = vpop.f32.mrf.mxu3 }
 0x5d0   : > { %v1221_v53 = vsel %vm677_vm14, %v1168_v51, -inf }
 0x5d1   : > { %1222 = vmax.xlane.f32.xlu0 %v1221_v53 }
 0x5d3   : > { %1287 = vrot.lane.b32.xlu2 %v4737_v52, %s5572_s27 }
 0x5d7   : > { %v1170_v54 = vpop.f32.mrf.mxu3 }
 0x5e5   : > { %1352 = vrot.lane.b32.xlu0 %v4733_v47, %s5566_s17 }
 0x5ed   : > { %1375 = vrot.lane.b32.xlu0 %v4737_v52, %s5566_s17 }
 0x5f5   : > { %1350 = vrot.lane.b32.xlu0 %v4733_v47, %s5564_s19 }
 0x5fa   : > { %v4878_v55 = vpop.f32.mrf.mxu1 }
 0x5fc   : > { %v1220_v56 = vpop.xlane.xlu1 %1219 }
 0x5fd   : > { %1373 = vrot.lane.b32.xlu0 %v4737_v52, %s5564_s19  ;;  %v1230_v58 = vsub.f32 %v1145_v43, %v1220_v56 }
 0x5ff   : > { %v1234_v60 = vmul.f32 1.442695, %v1230_v58 }
 0x601   : > { %4160 = vpow2.f32 %v1234_v60 }
 0x602   : > { %v1124_v59 = vpop.f32.mrf.mxu1 }
 0x605   : > { %1308 = vrot.lane.b32.xlu0 %v4741_v57, %s5572_s27 }
 0x607   : > { %v4161_v2 = vpop.eup %4160 }
 0x608   : > { %v1242_v5 = vsel %vm677_vm14, %v4161_v2, 0.0 }
 0x60a   : > { %v1214_v61 = vpop.f32.mrf.mxu1 }
 0x60b   : > { %v1227_v63 = vsel %vm677_vm14, %v1214_v61, -inf }
 0x60c   : > { %1228 = vmax.xlane.f32.xlu1 %v1227_v63 }
 0x612   : > { %v1216_v3 = vpop.f32.mrf.mxu1 }
 0x614   : > { %1243 = vadd.xlane.f32.xlu1 %v1242_v5 }
 0x62d   : > { %1266 = vrot.lane.b32.xlu1 %v4733_v47, %s5572_s27 }
 0x62e   : > { %v1226_v6 = vpop.xlane.xlu2 %1225 }
 0x62f   : > { %v1232_v7 = vsub.f32 %v1191_v41, %v1226_v6 }
 0x631   : > { %v1238_v8 = vmul.f32 1.442695, %v1232_v7 }
 0x633   : > { %4162 = vpow2.f32 %v1238_v8 }
 0x636   : > { %v1288_v10 = vpop.permute.xlu2 %1287 }
 0x637   : > { %v1293_v11 = vsel %vm822_vm15, %v1288_v10, 0 }
 0x638   : > { %1302 = vmatpush.bf16.msrb.mxu3 %v1293_v11 }
 0x639   : > { %v4163_v12 = vpop.eup %4162 }
 0x63a   : > { %v1248_v13 = vsel %vm677_vm14, %v4163_v12, 0.0 }
 0x63b   : > { %1249 = vadd.xlane.f32.xlu2 %v1248_v13 }
 0x644   : > { %v1223_v14 = vpop.xlane.xlu0 %1222 }
 0x645   : > { %v1231_v15 = vsub.f32 %v1168_v51, %v1223_v14 }
 0x647   : > { %v1236_v16 = vmul.f32 1.442695, %v1231_v15 }
 0x649   : > { %4164 = vpow2.f32 %v1236_v16 }
 0x64f   : > { %v4165_v17 = vpop.eup %4164 }
 0x650   : > { %v1245_v18 = vsel %vm677_vm14, %v4165_v17, 0.0 }
 0x651   : > { %1246 = vadd.xlane.f32.xlu0 %v1245_v18 }
 0x653   : > { %1421 = vrot.lane.b32.xlu2 %v4745_v62, %s5566_s17 }
 0x657   : > { %v1353_v19 = vpop.permute.xlu0 %1352 }
 0x658   : > { %v1358_v42 = vsel %vm677_vm14, %v1353_v19, 0 }
 0x65f   : > { %v1376_v20 = vpop.permute.xlu0 %1375 }
 0x660   : > { %v1381_v0 = vsel %vm677_vm14, %v1376_v20, 0 }
 0x661   : > { %1390 = vmatpush.bf16.xpose.msra.mxu3 %v1381_v0 }
 0x665   : > { %1329 = vrot.lane.b32.xlu0 %v4745_v62, %s5572_s27  ;;  %s4426_s27 = scalar_lea.hbm %s5554_s13, 64 }
 0x667   : > { %v1351_v21 = vpop.permute.xlu0 %1350 }
 0x66d   : > { %1398 = vrot.lane.b32.xlu0 %v4741_v57, %s5566_s17 }
 0x66f   : > { %v1374_v23 = vpop.permute.xlu0 %1373 }
 0x675   : > { %1419 = vrot.lane.b32.xlu0 %v4745_v62, %s5564_s19 }
 0x677   : > { %v1309_v25 = vpop.permute.xlu0 %1308 }
 0x678   : > { %v1314_v27 = vsel %vm822_vm15, %v1309_v25, 0 }
 0x679   : > { %1323 = vmatpush.bf16.msrb.mxu0 %v1314_v27 }
 0x67f   : > { %v1229_v28 = vpop.xlane.xlu1 %1228 }
 0x680   : > { %v1233_v4 = vsub.f32 %v1214_v61, %v1229_v28 }
 0x682   : > { %v1240_v29 = vmul.f32 1.442695, %v1233_v4 }
 0x684   : > { %4166 = vpow2.f32 %v1240_v29  ;;  %v4042_v29 = vpack.i.bf16 %v4867_v48, %v4859_v36 }
 0x687   : > { %v1244_v33 = vpop.xlane.xlu1 %1243 }
 0x688   : > { %4168 = vrcp.f32 %v1244_v33 }
 0x68a   : > { %v4167_v30 = vpop.eup %4166 }
 0x68b   : > { %v1251_v32 = vsel %vm677_vm14, %v4167_v30, 0.0 }
 0x68c   : > { %1252 = vadd.xlane.f32.xlu1 %v1251_v32 }
 0x68e   : > { %v4169_v35 = vpop.eup %4168 }
 0x68f   : > { %v1258_v37 = vmul.f32 %v4169_v35, %v4161_v2 }
 0x691   : > { %v1262_v43 = vpack.c.bf16 %v1258_v37, %v1258_v37 }
 0x69f   : > { %v1267_v38 = vpop.permute.xlu1 %1266 }
 0x6a0   : > { %v1272_v40 = vsel %vm822_vm15, %v1267_v38, 0 }
 0x6a1   : > { %1281 = vmatpush.bf16.msra.mxu2 %v1272_v40 }
 0x6a4   : > { %3721 = vmatmul.msk.bf16.vlgmr.msra.gmra.mxu2 %vm677_vm14, %v1262_v43 }
 0x6a5   : > { %1367 = vmatpush.bf16.xpose.msrb.mxu2 %v1358_v42  ;;  %1396 = vrot.lane.b32.xlu1 %v4741_v57, %s5564_s19  ;;  %s5598_s19 = smov 8  }
 0x6ae   : > { %v1250_v44 = vpop.xlane.xlu2 %1249 }
 0x6af   : > { %4170 = vrcp.f32 %v1250_v44 }
 0x6b4   : > { %3725 = vmatmul.msk.bf16.vlgmr.msrb.gmra.mxu2 %vm677_vm14, %v1351_v21 }
 0x6b5   : > { %v4171_v45 = vpop.eup %4170 }
 0x6b6   : > { %v1260_v1 = vmul.f32 %v4171_v45, %v4163_v12  ;;  %v1422_v51 = vpop.permute.xlu2 %1421 }
 0x6b7   : > { %v1427_v56 = vsel %vm677_vm14, %v1422_v51, 0 }
 0x6b8   : > { %v1264_v9 = vpack.c.bf16 %v1260_v1, %v1260_v1 }
 0x6ba   : > { %3723 = vmatmul.msk.bf16.vlgmr.msrb.gmra.mxu0 %vm677_vm14, %v1264_v9 }
 0x6c4   : > { %v1247_v41 = vpop.xlane.xlu0 %1246 }
 0x6c5   : > { %4172 = vrcp.f32 %v1247_v41 }
 0x6cb   : > { %v4173_v46 = vpop.eup %4172 }
 0x6cc   : > { %v1259_v49 = vmul.f32 %v4173_v46, %v4165_v17 }
 0x6ce   : > { %v1263_v50 = vpack.c.bf16 %v1259_v49, %v1259_v49 }
 0x6d0   : > { %3722 = vmatmul.msk.bf16.vlgmr.msrb.gmra.mxu3 %vm677_vm14, %v1263_v50 }
 0x6d7   : > { %v1330_v53 = vpop.permute.xlu0 %1329 }
 0x6d8   : > { %v1335_v54 = vsel %vm822_vm15, %v1330_v53, 0 }
 0x6d9   : > { %1344 = vmatpush.bf16.msrb.mxu1 %v1335_v54 }
 0x6dd   : > { %1436 = vmatpush.bf16.xpose.msra.mxu1 %v1427_v56 }
 0x6df   : > { %v1399_v58 = vpop.permute.xlu0 %1398 }
 0x6e0   : > { %v1404_v59 = vsel %vm677_vm14, %v1399_v58, 0  ;;  %3726 = vmatmul.msk.bf16.vlgmr.msra.gmra.mxu3 %vm677_vm14, %v1374_v23 }
 0x6e1   : > { %1413 = vmatpush.bf16.xpose.msra.mxu0 %v1404_v59 }
 0x6e7   : > { %v1420_v5 = vpop.permute.xlu0 %1419 }
 0x6ff   : > { %v1253_v60 = vpop.xlane.xlu1 %1252 }
 0x700   : > { %4174 = vrcp.f32 %v1253_v60 }
 0x706   : > { %v4175_v61 = vpop.eup %4174 }
 0x707   : > { %v1261_v63 = vmul.f32 %v4175_v61, %v4167_v30 }
 0x709   : > { %v1265_v2 = vpack.c.bf16 %v1261_v63, %v1261_v63 }
 0x70b   : > { %3724 = vmatmul.msk.bf16.vlgmr.msrb.gmra.mxu1 %vm677_vm14, %v1265_v2 }
 0x717   : > { %v1397_v3 = vpop.permute.xlu1 %1396 }
 0x718   : > { %3727 = vmatmul.msk.bf16.vlgmr.msra.gmra.mxu0 %vm677_vm14, %v1397_v3 }
 0x71b   : > { %3728 = vmatmul.msk.bf16.vlgmr.msra.gmra.mxu1 %vm677_vm14, %v1420_v5 }
 0x727   : > { %v1283_v6 = vpop.f32.mrf.mxu2 }
 0x72f   : > { %v1285_v7 = vpop.f32.mrf.mxu2 }
 0x737   : > { %v4917_v8 = vpop.f32.mrf.mxu0  ;;  %v1369_v10 = vpop.f32.mrf.mxu2 }
 0x738   : > { %v1442_v11 = vsel %vm677_vm14, %v1369_v10, -inf }
 0x739   : > { %1443 = vmax.xlane.f32.xlu0 %v1442_v11 }
 0x73f   : > { %v1327_v12 = vpop.f32.mrf.mxu0  ;;  %v1371_v13 = vpop.f32.mrf.mxu2 }
 0x753   : > { %v1304_v14 = vpop.f32.mrf.mxu3 }
 0x754   : > { %v4047_v15 = vpack.i.bf16 %v1304_v14, %v1283_v6 }
 0x75b   : > { %v1306_v16 = vpop.f32.mrf.mxu3 }
 0x763   : > { %v1392_v17 = vpop.f32.mrf.mxu3 }
 0x764   : > { %v1445_v18 = vsel %vm677_vm14, %v1392_v17, -inf }
 0x765   : > { %1446 = vmax.xlane.f32.xlu2 %v1445_v18 }
 0x76b   : > { %v1394_v19 = vpop.f32.mrf.mxu3 }
 0x788   : > { %v4921_v20 = vpop.f32.mrf.mxu1 }
 0x790   : > { %v1348_v0 = vpop.f32.mrf.mxu1 }
 0x795   : > { %v1415_v21 = vpop.f32.mrf.mxu0 }
 0x796   : > { %v1448_v23 = vsel %vm677_vm14, %v1415_v21, -inf }
 0x797   : > { %1449 = vmax.xlane.f32.xlu1 %v1448_v23 }
 0x798   : > { %v1438_v25 = vpop.f32.mrf.mxu1 }
 0x799   : > { %v1451_v27 = vsel %vm677_vm14, %v1438_v25, -inf }
 0x79a   : > { %1452 = vmax.xlane.f32.xlu0 %v1451_v27 }
 0x79d   : > { %v1417_v28 = vpop.f32.mrf.mxu0 }
 0x7a0   : > { %v1440_v4 = vpop.f32.mrf.mxu1 }
 0x7a1   : > { %v4062_v4 = vpack.i.bf16 %v4921_v20, %v4917_v8 }
 0x7ac   : > { %v1444_v30 = vpop.xlane.xlu0 %1443 }
 0x7ad   : > { %v1454_v32 = vsub.f32 %v1369_v10, %v1444_v30  ;;  %v3927_v30 = vld [vmem:[%s5544_s3] sm:$0xff] }
 0x7ae   : > { %1511 = vrot.lane.b32.xlu0 %v4737_v52, %s5562_s20 }
 0x7af   : > { %v1458_v33 = vmul.f32 1.442695, %v1454_v32 }
 0x7b0   : > { %1490 = vrot.lane.b32.xlu1 %v4733_v47, %s5562_s20  ;;  %v4057_v47 = vpack.i.bf16 %v4878_v55, %v4864_v39 }
 0x7b1   : > { %4176 = vpow2.f32 %v1458_v33 }
 0x7b7   : > { %v4177_v35 = vpop.eup %4176 }
 0x7b8   : > { %4043 = vrot.lane.b32.xlu1 %v4042_v29, %s5560_s23  ;;  %v1466_v37 = vsel %vm677_vm14, %v4177_v35, 0.0  ;;  %v3928_v29 = vld [vmem:[%s5544_s3 + $0x8] sm:$0xff] }
 0x7d8   : > { %1467 = vadd.xlane.f32.xlu0 %v1466_v37  ;;  %v1447_v43 = vpop.xlane.xlu2 %1446 }
 0x7d9   : > { %v1455_v45 = vsub.f32 %v1392_v17, %v1447_v43 }
 0x7db   : > { %v1460_v1 = vmul.f32 1.442695, %v1455_v45 }
 0x7ec   : > { %1553 = vrot.lane.b32.xlu0 %v4745_v62, %s5562_s20 }
 0x7f4   : > { %4048 = vrot.lane.b32.xlu0 %v4047_v15, %s5570_s15 }
 0x7fc   : > { %4058 = vrot.lane.b32.xlu0 %v4057_v47, %s5560_s23  ;;  %s5599_s23 = smov 24  }
 0x80a   : > { %v1450_v52 = vpop.xlane.xlu1 %1449 }
 0x80b   : > { %v1456_v36 = vsub.f32 %v1415_v21, %v1450_v52 }
 0x80d   : > { %v1462_v48 = vmul.f32 1.442695, %v1456_v36  ;;  %v1453_v38 = vpop.xlane.xlu0 %1452 }
 0x80e   : > { %v1457_v40 = vsub.f32 %v1438_v25, %v1453_v38 }
 0x80f   : > { %4178 = vpow2.f32 %v1462_v48 }
 0x810   : > { %v1464_v42 = vmul.f32 1.442695, %v1457_v40 }
 0x812   : > { %4180 = vpow2.f32 %v1464_v42 }
 0x813   : > { %4182 = vpow2.f32 %v1460_v1 }
 0x815   : > { %v4179_v44 = vpop.eup %4178 }
 0x816   : > { %v1472_v62 = vsel %vm677_vm14, %v4179_v44, 0.0 }
 0x817   : > { %1473 = vadd.xlane.f32.xlu2 %v1472_v62 }
 0x818   : > { %v4181_v9 = vpop.eup %4180 }
 0x819   : > { %v1475_v39 = vsel %vm677_vm14, %v4181_v9, 0.0  ;;  %v4183_v49 = vpop.eup %4182 }
 0x81a   : > { %v1469_v51 = vsel %vm677_vm14, %v4183_v49, 0.0 }
 0x81f   : > { %1476 = vadd.xlane.f32.xlu2 %v1475_v39 }
 0x820   : > { %v1512_v55 = vpop.permute.xlu0 %1511 }
 0x821   : > { %v1517_v41 = vsel %vm822_vm15, %v1512_v55, 0 }
 0x822   : > { %v1491_v46 = vpop.permute.xlu1 %1490  ;;  %1526 = vmatpush.bf16.msrb.mxu3 %v1517_v41 }
 0x823   : > { %v1496_v50 = vsel %vm822_vm15, %v1491_v46, 0 }
 0x824   : > { %1505 = vmatpush.bf16.msra.mxu2 %v1496_v50 }
 0x827   : > { %1470 = vadd.xlane.f32.xlu2 %v1469_v51 }
 0x828   : > { %1670 = vmatpush.bf16.msrb.mxu2 %v3928_v29 }
 0x82a   : > { %v4044_v32 = vpop.permute.xlu1 %4043 }
 0x82b   : > { %v4045_v37 = vunpack.i.l.bf16 %v4044_v32 }
 0x82c   : > { %1671 = vmatpush.bf16.msrb.mxu2 %v3927_v30 }
 0x82d   : > { %v1622_v36 = vsel %vm677_vm14, %v4813_v24, %v4045_v37 }
 0x83f   : > { %1532 = vrot.lane.b32.xlu2 %v4741_v57, %s5562_s20 }
 0x84b   : > { %v1468_v53 = vpop.xlane.xlu0 %1467 }
 0x84c   : > { %4184 = vrcp.f32 %v1468_v53 }
 0x852   : > { %v4185_v54 = vpop.eup %4184 }
 0x853   : > { %v1482_v56 = vmul.f32 %v4185_v54, %v4177_v35  ;;  %v4046_v35 = vunpack.i.h.bf16 %v4044_v32 }
 0x855   : > { %v1486_v58 = vpack.c.bf16 %v1482_v56, %v1482_v56  ;;  %v1623_v20 = vsel %vm677_vm14, %v4815_v26, %v4046_v35 }
 0x857   : > { %3729 = vmatmul.msk.bf16.vlgmr.msra.gmra.mxu2 %vm677_vm14, %v1486_v58 }
 0x85e   : > { %v1554_v59 = vpop.permute.xlu0 %1553 }
 0x85f   : > { %v1559_v60 = vsel %vm822_vm15, %v1554_v59, 0 }
 0x860   : > { %1568 = vmatpush.bf16.msrb.mxu1 %v1559_v60  ;;  %v4312_v60 = vld [vmem:[%s4659_s14] sm:$0xff] }
 0x866   : > { %v4049_v33 = vpop.permute.xlu0 %4048 }
 0x867   : > { %v4051_v47 = vunpack.i.h.bf16 %v4049_v33  ;;  %v4050_v52 = vunpack.i.l.bf16 %v4049_v33 }
 0x869   : > { %v1628_v40 = vsel %vm1626_vm1, %v1623_v20, %v4051_v47  ;;  %v1627_v42 = vsel %vm1626_vm1, %v1622_v36, %v4050_v52  ;;  %v3930_v47 = vld [vmem:[%s5550_s9 + $0x8] sm:$0xff] }
 0x86a   : > { %1853 = vmatpush.bf16.msra.mxu3 %v3930_v47 }
 0x86e   : > { %v4059_v62 = vpop.permute.xlu0 %4058 }
 0x86f   : > { %v4060_v26 = vunpack.i.l.bf16 %v4059_v62 }
 0x871   : > { %v1624_v46 = vsel %vm677_vm14, %v4824_v34, %v4060_v26 }
 0x88a   : > { %v1474_v61 = vpop.xlane.xlu2 %1473 }
 0x892   : > { %v1477_v63 = vpop.xlane.xlu2 %1476 }
 0x893   : > { %4186 = vrcp.f32 %v1477_v63 }
 0x894   : > { %4188 = vrcp.f32 %v1474_v61 }
 0x899   : > { %v4187_v2 = vpop.eup %4186 }
 0x89a   : > { %v1485_v3 = vmul.f32 %v4187_v2, %v4181_v9  ;;  %v1471_v5 = vpop.xlane.xlu2 %1470  ;;  %v4189_v6 = vpop.eup %4188  ;;  %v4061_v9 = vunpack.i.h.bf16 %v4059_v62 }
 0x89b   : > { %4190 = vrcp.f32 %v1471_v5  ;;  %v1484_v10 = vmul.f32 %v4189_v6, %v4179_v44  ;;  %v4313_v6 = vld [vmem:[%s4659_s14 + $0x8] sm:$0xff] }
 0x89c   : > { %v1489_v57 = vpack.c.bf16 %v1485_v3, %v1485_v3  ;;  %v1625_v41 = vsel %vm677_vm14, %v4818_v31, %v4061_v9  ;;  %v4105_v31 = vld [vmem:[%s5545_s4] ss:$0 sm:$0xff] }
 0x89d   : > { %v1488_v15 = vpack.c.bf16 %v1484_v10, %v1484_v10 }
 0x89e   : > { %3732 = vmatmul.msk.bf16.vlgmr.msrb.gmra.mxu1 %vm677_vm14, %v1489_v57 }
 0x8a1   : > { %v4191_v7 = vpop.eup %4190 }
 0x8a2   : > { %v1483_v11 = vmul.f32 %v4191_v7, %v4183_v49  ;;  %v1533_v12 = vpop.permute.xlu2 %1532 }
 0x8a3   : > { %v1538_v13 = vsel %vm822_vm15, %v1533_v12, 0 }
 0x8a4   : > { %v1487_v14 = vpack.c.bf16 %v1483_v11, %v1483_v11  ;;  %1547 = vmatpush.bf16.msrb.mxu0 %v1538_v13 }
 0x8a6   : > { %3730 = vmatmul.msk.bf16.vlgmr.msrb.gmra.mxu3 %vm677_vm14, %v1487_v14 }
 0x8a7   : > { %3731 = vmatmul.msk.bf16.vlgmr.msrb.gmra.mxu0 %vm677_vm14, %v1488_v15  ;;  %v4314_v15 = vld [vmem:[%s4659_s14 + $0x10] sm:$0xff] }
 0x8da   : > { %v1507_v16 = vpop.f32.mrf.mxu2 }
 0x8e2   : > { %v1509_v17 = vpop.f32.mrf.mxu2 }
 0x91b   : > { %v1570_v18 = vpop.f32.mrf.mxu1 }
 0x923   : > { %v1572_v19 = vpop.f32.mrf.mxu1 }
 0x924   : > { %v1549_v0 = vpop.f32.mrf.mxu0 }
 0x925   : > { %v4067_v21 = vpack.i.bf16 %v1570_v18, %v1549_v0 }
 0x927   : > { %4068 = vrot.lane.b32.xlu2 %v4067_v21, %s5568_s16 }
 0x929   : > { %v1528_v23 = vpop.f32.mrf.mxu3 }
 0x92a   : > { %v4052_v25 = vpack.i.bf16 %v1528_v23, %v1507_v16  ;;  %v4315_v23 = vld [vmem:[%s4659_s14 + $0x18] sm:$0xff] }
 0x92c   : > { %v1551_v27 = vpop.f32.mrf.mxu0  ;;  %4053 = vrot.lane.b32.xlu1 %v4052_v25, %s5568_s16  ;;  %s482_s16 = sand.u32 1, %s4468_s26  }
 0x92d   : > { %s3688_s17 = sshll.u32 %s482_s16, 5  ;;  %s3570_s14 = scalar_lea.sflag [#allocation4], %s482_s16 }
 0x931   : > { %v1530_v28 = vpop.f32.mrf.mxu3 }
 0x934   : > { %4063 = vrot.lane.b32.xlu1 %v4062_v4, %s5570_s15 }
 0x981   : > { %v4069_v55 = vpop.permute.xlu2 %4068 }
 0x982   : > { %v4071_v51 = vunpack.i.h.bf16 %v4069_v55  ;;  %v4070_v53 = vunpack.i.l.bf16 %v4069_v55 }
 0x99e   : > { %v4054_v8 = vpop.permute.xlu1 %4053 }
 0x99f   : > { %v4056_v48 = vunpack.i.h.bf16 %v4054_v8  ;;  %v4055_v38 = vunpack.i.l.bf16 %v4054_v8 }
 0x9a1   : > { %v1632_v43 = vsel %vm1631_vm2, %v1627_v42, %v4055_v38  ;;  %v1633_v44 = vsel %vm1631_vm2, %v1628_v40, %v4056_v48  ;;  %v3929_v48 = vld [vmem:[%s5550_s9] sm:$0xff] }
 0x9a2   : > { %v1636_v45 = vpack.c.bf16 %v1633_v44, %v1632_v43  ;;  %1854 = vmatpush.bf16.msra.mxu3 %v3929_v48 }
 0x9a4   : > { %3741 = vmatmul.msk.bf16.vlgmr.msrb.gmra.mxu2 %vm499_vm0, %v1636_v45 }
 0x9a6   : > { %v4064_v1 = vpop.permute.xlu1 %4063 }
 0x9a7   : > { %v4066_v39 = vunpack.i.h.bf16 %v4064_v1  ;;  %v4065_v24 = vunpack.i.l.bf16 %v4064_v1 }
 0x9a9   : > { %v1629_v49 = vsel %vm1626_vm1, %v1624_v46, %v4065_v24  ;;  %v1630_v50 = vsel %vm1626_vm1, %v1625_v41, %v4066_v39 }
 0x9aa   : > { %v1634_v54 = vsel %vm1631_vm2, %v1629_v49, %v4070_v53  ;;  %v1635_v56 = vsel %vm1631_vm2, %v1630_v50, %v4071_v51 }
 0x9ab   : > { %v1637_v58 = vpack.c.bf16 %v1635_v56, %v1634_v54 }
 0x9b4   : > { %3742 = vmatmul.msk.bf16.gmra.mxu2 %vm499_vm0, %v1637_v58 }
 0xa27   : > { %v1673_v59 = vpop.f32.mrf.mxu2 }
 0xa28   : > { %v1674_v34 = vadd.f32 %v4105_v31, %v1673_v59 }
 0xa2a   : > { %v4985_v61 = vadd.f32 %v4312_v60, %v1674_v34 }
 0xa2c   : > { %v1689_v63 = vsel %vm499_vm0, %v4985_v61, 0.0  ;;  %v1705_v2 = vmul.f32 %v4985_v61, %v4985_v61 }
 0xa2d   : > { %1690 = vadd.xlane.f32.xlu0 %v1689_v63 }
 0xa2e   : > { %v1709_v3 = vsel %vm499_vm0, %v1705_v2, 0.0 }
 0xa2f   : > { %v1675_v5 = vpop.f32.mrf.mxu2  ;;  %1710 = vadd.xlane.f32.xlu2 %v1709_v3 }
 0xa30   : > { %v1676_v57 = vadd.f32 %v4105_v31, %v1675_v5 }
 0xa32   : > { %v4993_v7 = vadd.f32 %v4313_v6, %v1676_v57 }
 0xa34   : > { %v1692_v10 = vsel %vm499_vm0, %v4993_v7, 0.0  ;;  %v1706_v11 = vmul.f32 %v4993_v7, %v4993_v7 }
 0xa35   : > { %1693 = vadd.xlane.f32.xlu1 %v1692_v10 }
 0xa36   : > { %v1712_v12 = vsel %vm499_vm0, %v1706_v11, 0.0 }
 0xa37   : > { %v1678_v13 = vpop.f32.mrf.mxu2  ;;  %1713 = vadd.xlane.f32.xlu0 %v1712_v12 }
 0xa38   : > { %v1679_v14 = vadd.f32 %v4105_v31, %v1678_v13  ;;  %v4106_v13 = vld [vmem:[#allocation7] ss:$0 sm:$0xff] }
 0xa3a   : > { %v5001_v16 = vadd.f32 %v4314_v15, %v1679_v14 }
 0xa3c   : > { %v1695_v17 = vsel %vm499_vm0, %v5001_v16, 0.0  ;;  %v1707_v18 = vmul.f32 %v5001_v16, %v5001_v16 }
 0xa3d   : > { %1696 = vadd.xlane.f32.xlu1 %v1695_v17 }
 0xa3e   : > { %v1715_v19 = vsel %vm499_vm0, %v1707_v18, 0.0 }
 0xa3f   : > { %v1680_v0 = vpop.f32.mrf.mxu2  ;;  %1716 = vadd.xlane.f32.xlu0 %v1715_v19 }
 0xa40   : > { %v1681_v21 = vadd.f32 %v4105_v31, %v1680_v0 }
 0xa42   : > { %v5009_v25 = vadd.f32 %v4315_v23, %v1681_v21 }
 0xa44   : > { %v1698_v27 = vsel %vm499_vm0, %v5009_v25, 0.0  ;;  %v1708_v28 = vmul.f32 %v5009_v25, %v5009_v25 }
 0xa45   : > { %1699 = vadd.xlane.f32.xlu2 %v1698_v27 }
 0xa46   : > { %v1718_v4 = vsel %vm499_vm0, %v1708_v28, 0.0 }
 0xa47   : > { %1719 = vadd.xlane.f32.xlu1 %v1718_v4  ;;  %v4107_v4 = vld [vmem:[%s5549_s8] ss:$0 sm:$0xff] }
 0xaa0   : > { %v1691_v29 = vpop.xlane.xlu0 %1690 }
 0xaa1   : > { %v1701_v30 = vmul.f32 %v1691_v29, %v4693_v22 }
 0xaa2   : > { %v1711_v32 = vpop.xlane.xlu2 %1710 }
 0xaa3   : > { %v1725_v33 = vmul.f32 %v1701_v30, %v1701_v30  ;;  %v1721_v35 = vmul.f32 %v1711_v32, %v4693_v22  ;;  %v1737_v6 = vsub.f32 %v4985_v61, %v1701_v30 }
 0xaa5   : > { %v1729_v37 = vsub.f32 %v1721_v35, %v1725_v33 }
 0xaa7   : > { %v1733_v52 = vmax.f32 %v1729_v37, 0.0 }
 0xaa8   : > { %v1694_v8 = vpop.xlane.xlu1 %1693 }
 0xaa9   : > { %v1741_v20 = vadd.f32 1e-12, %v1733_v52  ;;  %v1702_v36 = vmul.f32 %v1694_v8, %v4693_v22 }
 0xaaa   : > { %v1714_v38 = vpop.xlane.xlu0 %1713 }
 0xaab   : > { %4192 = vrsqrt.f32 %v1741_v20  ;;  %v1726_v40 = vmul.f32 %v1702_v36, %v1702_v36  ;;  %v1722_v42 = vmul.f32 %v1714_v38, %v4693_v22  ;;  %vm1751_vm4 = vweird.f32 %v1741_v20 }
 0xaac   : > { %v1738_v19 = vsub.f32 %v4993_v7, %v1702_v36 }
 0xaad   : > { %v1730_v43 = vsub.f32 %v1722_v42, %v1726_v40 }
 0xaaf   : > { %v1734_v44 = vmax.f32 %v1730_v43, 0.0 }
 0xab0   : > { %v1697_v45 = vpop.xlane.xlu1 %1696 }
 0xab1   : > { %v4193_v62 = vpop.eup %4192  ;;  %v5027_v1 = vmul.f32 %v1697_v45, %v4693_v22  ;;  %v1742_v26 = vadd.f32 1e-12, %v1734_v44 }
 0xab2   : > { %v1746_v9 = vmul.f32 %v4193_v62, %v1741_v20  ;;  %v1717_v39 = vpop.xlane.xlu0 %1716  ;;  %vm1752_vm3 = vweird.f32 %v4193_v62 }
 0xab3   : > { %v1727_v24 = vmul.f32 %v5027_v1, %v5027_v1  ;;  %v1723_v55 = vmul.f32 %v1717_v39, %v4693_v22  ;;  %4194 = vrsqrt.f32 %v1742_v26  ;;  %vm1753_vm5 = vmor %vm1751_vm4, %vm1752_vm3  ;;  %vm1761_vm7 = vweird.f32 %v1742_v26 }
 0xab4   : > { %v1747_v41 = vmul.f32 %v4193_v62, %v1746_v9  ;;  %v1739_v48 = vsub.f32 %v5001_v16, %v5027_v1  ;;  %v3938_v1 = vld [vmem:[%s5552_s11 + $0x38] sm:$0xff] }
 0xab5   : > { %v1731_v46 = vsub.f32 %v1723_v55, %v1727_v24  ;;  %2000 = vmatpush.bf16.msra.mxu0 %v3938_v1  ;;  %v3937_v55 = vld [vmem:[%s5552_s11 + $0x30] sm:$0xff] }
 0xab6   : > { %v1748_v49 = vmul.f32 0.5, %v1747_v41  ;;  %v3936_v41 = vld [vmem:[%s5552_s11 + $0x28] sm:$0xff] }
 0xab7   : > { %v1735_v50 = vmax.f32 %v1731_v46, 0.0  ;;  %v3935_v46 = vld [vmem:[%s5552_s11 + $0x20] sm:$0xff] }
 0xab8   : > { %v1749_v51 = vsub.f32 1.5, %v1748_v49  ;;  %v1700_v53 = vpop.xlane.xlu2 %1699  ;;  %v4108_v49 = vld [vmem:[%s5551_s10] ss:$0 sm:$0xff] }
 0xab9   : > { %v1743_v54 = vadd.f32 1e-12, %v1735_v50  ;;  %v1704_v56 = vmul.f32 %v1700_v53, %v4693_v22  ;;  %v4195_v58 = vpop.eup %4194  ;;  %2001 = vmatpush.bf16.msra.mxu0 %v3937_v55  ;;  %v3934_v50 = vld [vmem:[%s5552_s11 + $0x18] sm:$0xff] }
 0xaba   : > { %v1720_v31 = vpop.xlane.xlu1 %1719  ;;  %v1750_v59 = vmul.f32 %v4193_v62, %v1749_v51  ;;  %v1756_v34 = vmul.f32 %v4195_v58, %v1742_v26  ;;  %vm1762_vm6 = vweird.f32 %v4195_v58 }
 0xabb   : > { %4196 = vrsqrt.f32 %v1743_v54  ;;  %v1728_v60 = vmul.f32 %v1704_v56, %v1704_v56  ;;  %v1724_v63 = vmul.f32 %v1720_v31, %v4693_v22  ;;  %vm1763_vm8 = vmor %vm1761_vm7, %vm1762_vm6  ;;  %vm1771_vm10 = vweird.f32 %v1743_v54  ;;  %v3932_v31 = vld [vmem:[%s5552_s11 + $0x8] sm:$0xff] }
 0xabc   : > { %v1757_v2 = vmul.f32 %v4195_v58, %v1756_v34  ;;  %v1754_v5 = vsel %vm1753_vm5, %v4193_v62, %v1750_v59  ;;  %v1740_v43 = vsub.f32 %v5009_v25, %v1704_v56 }
 0xabd   : > { %v1732_v3 = vsub.f32 %v1724_v63, %v1728_v60  ;;  %v1785_v14 = vmul.f32 %v1754_v5, %v1737_v6  ;;  %2002 = vmatpush.bf16.msra.mxu0 %v3936_v41  ;;  %v3931_v60 = vld [vmem:[%s5552_s11] sm:$0xff] }
 0xabe   : > { %v1758_v57 = vmul.f32 0.5, %v1757_v2 }
 0xabf   : > { %v1736_v10 = vmax.f32 %v1732_v3, 0.0  ;;  %v1792_v23 = vmul.f32 %v4106_v13, %v1785_v14 }
 0xac0   : > { %v1759_v12 = vsub.f32 1.5, %v1758_v57 }
 0xac1   : > { %v4197_v11 = vpop.eup %4196  ;;  %v1744_v17 = vadd.f32 1e-12, %v1736_v10  ;;  %v1799_v33 = vadd.f32 %v4107_v4, %v1792_v23  ;;  %2003 = vmatpush.bf16.msra.mxu0 %v3935_v46 }
 0xac2   : > { %v1766_v15 = vmul.f32 %v4197_v11, %v1743_v54  ;;  %v1760_v18 = vmul.f32 %v4195_v58, %v1759_v12  ;;  %vm1772_vm9 = vweird.f32 %v4197_v11  ;;  %v3933_v54 = vld [vmem:[%s5552_s11 + $0x10] sm:$0xff] }
 0xac3   : > { %4198 = vrsqrt.f32 %v1744_v17  ;;  %vm1773_vm11 = vmor %vm1771_vm10, %vm1772_vm9  ;;  %vm1781_vm13 = vweird.f32 %v1744_v17 }
 0xac4   : > { %v1767_v0 = vmul.f32 %v4197_v11, %v1766_v15  ;;  %v1764_v21 = vsel %vm1763_vm8, %v4195_v58, %v1760_v18 }
 0xac5   : > { %v1786_v27 = vmul.f32 %v1764_v21, %v1738_v19  ;;  %2004 = vmatpush.bf16.msra.mxu0 %v3934_v50 }
 0xac6   : > { %v1768_v28 = vmul.f32 0.5, %v1767_v0 }
 0xac7   : > { %v1793_v29 = vmul.f32 %v4106_v13, %v1786_v27 }
 0xac8   : > { %v1769_v30 = vsub.f32 1.5, %v1768_v28 }
 0xac9   : > { %v4199_v32 = vpop.eup %4198  ;;  %v1800_v35 = vadd.f32 %v4107_v4, %v1793_v29  ;;  %2005 = vmatpush.bf16.msra.mxu0 %v3933_v54 }
 0xaca   : > { %v1770_v37 = vmul.f32 %v4197_v11, %v1769_v30  ;;  %v1776_v47 = vmul.f32 %v4199_v32, %v1744_v17  ;;  %vm1782_vm12 = vweird.f32 %v4199_v32 }
 0xacb   : > { %v1803_v52 = vpack.c.bf16 %v1800_v35, %v1799_v33  ;;  %vm1783_vm3 = vmor %vm1781_vm13, %vm1782_vm12 }
 0xacc   : > { %v1777_v8 = vmul.f32 %v4199_v32, %v1776_v47  ;;  %v1774_v36 = vsel %vm1773_vm11, %v4197_v11, %v1770_v37 }
 0xacd   : > { %3751 = vmatmul.msk.bf16.vlgmr.msra.gmra.mxu3 %vm499_vm0, %v1803_v52  ;;  %v1787_v40 = vmul.f32 %v1774_v36, %v1739_v48  ;;  %2006 = vmatpush.bf16.msra.mxu0 %v3932_v31 }
 0xace   : > { %v1778_v20 = vmul.f32 0.5, %v1777_v8 }
 0xacf   : > { %v1794_v62 = vmul.f32 %v4106_v13, %v1787_v40 }
 0xad0   : > { %v1779_v38 = vsub.f32 1.5, %v1778_v20 }
 0xad1   : > { %v1801_v26 = vadd.f32 %v4107_v4, %v1794_v62  ;;  %2007 = vmatpush.bf16.msra.mxu0 %v3931_v60 }
 0xad2   : > { %v1780_v42 = vmul.f32 %v4199_v32, %v1779_v38 }
 0xad4   : > { %v1784_v44 = vsel %vm1783_vm3, %v4199_v32, %v1780_v42 }
 0xad5   : > { %v1788_v45 = vmul.f32 %v1784_v44, %v1740_v43 }
 0xad7   : > { %v1795_v9 = vmul.f32 %v4106_v13, %v1788_v45 }
 0xad9   : > { %v1802_v39 = vadd.f32 %v4107_v4, %v1795_v9 }
 0xadb   : > { %v1804_v24 = vpack.c.bf16 %v1802_v39, %v1801_v26 }
 0xadd   : > { %3752 = vmatmul.msk.bf16.gmra.mxu3 %vm499_vm0, %v1804_v24 }
 0xb50   : > { %v1856_v51 = vpop.f32.mrf.mxu3 }
 0xb51   : > { %v5062_v53 = vadd.f32 %v4108_v49, %v1856_v51 }
 0xb53   : > { %v3753_v56 = vmul.f32 -1.702, %v5062_v53 }
 0xb55   : > { %v1874_v58 = vmul.f32 1.442695, %v3753_v56 }
 0xb57   : > { %4200 = vpow2.f32 %v1874_v58 }
 0xb58   : > { %v1858_v59 = vpop.f32.mrf.mxu3 }
 0xb59   : > { %v1859_v34 = vadd.f32 %v4108_v49, %v1858_v59 }
 0xb5b   : > { %v3754_v63 = vmul.f32 -1.702, %v1859_v34 }
 0xb5d   : > { %v4201_v2 = vpop.eup %4200  ;;  %v1876_v3 = vmul.f32 1.442695, %v3754_v63 }
 0xb5e   : > { %v1882_v5 = vadd.f32 1.0, %v4201_v2 }
 0xb5f   : > { %4202 = vpow2.f32 %v1876_v3 }
 0xb60   : > { %4204 = vrcp.f32 %v1882_v5  ;;  %v1861_v57 = vpop.f32.mrf.mxu3  ;;  %v1897_v32 = vand.u32 2147483648, %v1882_v5  ;;  %vm1891_vm5 = vweird.f32 %v1882_v5  ;;  %v1895_v33 = vand.u32 2147483647, %v1882_v5 }
 0xb61   : > { %v5074_v6 = vadd.f32 %v4108_v49, %v1861_v57 }
 0xb62   : > { %v1898_v20 = vor.u32 1.1754944e-38, %v1897_v32  ;;  %vm1896_vm8 = vcmp.eq.f32.partialorder %v1895_v33, 8.507059e+37 }
 0xb63   : > { %v3755_v10 = vmul.f32 -1.702, %v5074_v6 }
 0xb65   : > { %v4203_v11 = vpop.eup %4202  ;;  %v1878_v12 = vmul.f32 1.442695, %v3755_v10  ;;  %v4109_v10 = vld [vmem:[%s5553_s12] ss:$0 sm:$0xff] }
 0xb66   : > { %v4205_v13 = vpop.eup %4204  ;;  %v1883_v14 = vadd.f32 1.0, %v4203_v11 }
 0xb67   : > { %v1887_v15 = vmul.f32 %v4205_v13, %v1882_v5  ;;  %4206 = vpow2.f32 %v1878_v12  ;;  %vm1892_vm4 = vweird.f32 %v4205_v13 }
 0xb68   : > { %4208 = vrcp.f32 %v1883_v14  ;;  %v1863_v17 = vpop.f32.mrf.mxu3  ;;  %vm1893_vm6 = vmor %vm1891_vm5, %vm1892_vm4  ;;  %v1912_v37 = vand.u32 2147483648, %v1883_v14  ;;  %v1910_v8 = vand.u32 2147483647, %v1883_v14  ;;  %vm1906_vm9 = vweird.f32 %v1883_v14 }
 0xb69   : > { %v1888_v18 = vsub.f32 1.0, %v1887_v15  ;;  %v5077_v19 = vadd.f32 %v4108_v49, %v1863_v17 }
 0xb6a   : > { %v1913_v42 = vor.u32 1.1754944e-38, %v1912_v37  ;;  %vm1911_vm11 = vcmp.eq.f32.partialorder %v1910_v8, 8.507059e+37 }
 0xb6b   : > { %v1889_v0 = vmul.f32 %v4205_v13, %v1888_v18  ;;  %v3756_v21 = vmul.f32 -1.702, %v5077_v19 }
 0xb6d   : > { %v4207_v23 = vpop.eup %4206  ;;  %v1880_v27 = vmul.f32 1.442695, %v3756_v21  ;;  %v1890_v29 = vadd.f32 %v4205_v13, %v1889_v0 }
 0xb6e   : > { %v4209_v28 = vpop.eup %4208  ;;  %v1884_v4 = vadd.f32 1.0, %v4207_v23 }
 0xb6f   : > { %v1902_v30 = vmul.f32 %v4209_v28, %v1883_v14  ;;  %4210 = vpow2.f32 %v1880_v27  ;;  %v1894_v47 = vsel %vm1893_vm6, %v4205_v13, %v1890_v29  ;;  %vm1907_vm7 = vweird.f32 %v4209_v28 }
 0xb70   : > { %4212 = vrcp.f32 %v1884_v4  ;;  %v1899_v40 = vsel %vm1896_vm8, %v1898_v20, %v1894_v47  ;;  %vm1908_vm10 = vmor %vm1906_vm9, %vm1907_vm7  ;;  %v1927_v49 = vand.u32 2147483648, %v1884_v4  ;;  %vm1921_vm13 = vweird.f32 %v1884_v4 }
 0xb71   : > { %v1903_v35 = vsub.f32 1.0, %v1902_v30  ;;  %v1946_v9 = vmul.f32 %v1899_v40, %v5062_v53  ;;  %v1925_v50 = vand.u32 2147483647, %v1884_v4 }
 0xb72   : > { %v1928_v53 = vor.u32 1.1754944e-38, %v1927_v49 }
 0xb73   : > { %v1904_v52 = vmul.f32 %v4209_v28, %v1903_v35  ;;  %vm1926_vm5 = vcmp.eq.f32.partialorder %v1925_v50, 8.507059e+37 }
 0xb75   : > { %v4211_v36 = vpop.eup %4210  ;;  %v1905_v48 = vadd.f32 %v4209_v28, %v1904_v52 }
 0xb76   : > { %v4213_v38 = vpop.eup %4212  ;;  %v1885_v43 = vadd.f32 1.0, %v4211_v36 }
 0xb77   : > { %v1909_v44 = vsel %vm1908_vm10, %v4209_v28, %v1905_v48  ;;  %v1917_v45 = vmul.f32 %v4213_v38, %v1884_v4  ;;  %vm1922_vm12 = vweird.f32 %v4213_v38  ;;  %v3940_v48 = vld [vmem:[%s5542_s1 + $0x18] sm:$0xff] }
 0xb78   : > { %v1914_v62 = vsel %vm1911_vm11, %v1913_v42, %v1909_v44  ;;  %4214 = vrcp.f32 %v1885_v43  ;;  %vm1923_vm3 = vmor %vm1921_vm13, %vm1922_vm12  ;;  %v1942_v54 = vand.u32 2147483648, %v1885_v43  ;;  %v1940_v31 = vand.u32 2147483647, %v1885_v43  ;;  %2185 = vmatpush.bf16.msra.mxu1 %v3940_v48  ;;  %v3939_v44 = vld [vmem:[%s5542_s1 + $0x10] sm:$0xff] }
 0xb79   : > { %v1947_v26 = vmul.f32 %v1914_v62, %v1859_v34  ;;  %v1918_v39 = vsub.f32 1.0, %v1917_v45  ;;  %vm1936_vm6 = vweird.f32 %v1885_v43 }
 0xb7a   : > { %v1943_v60 = vor.u32 1.1754944e-38, %v1942_v54  ;;  %vm1941_vm8 = vcmp.eq.f32.partialorder %v1940_v31, 8.507059e+37 }
 0xb7b   : > { %v1950_v24 = vpack.c.bf16 %v1947_v26, %v1946_v9  ;;  %v1919_v1 = vmul.f32 %v4213_v38, %v1918_v39 }
 0xb7c   : > { %2186 = vmatpush.bf16.msra.mxu1 %v3939_v44 }
 0xb7d   : > { %2008 = vmatmul.bf16.vlgmr.msra.gmra.mxu0 %v1950_v24  ;;  %v1920_v41 = vadd.f32 %v4213_v38, %v1919_v1 }
 0xb7e   : > { %v4215_v55 = vpop.eup %4214 }
 0xb7f   : > { %v1932_v46 = vmul.f32 %v4215_v55, %v1885_v43  ;;  %v1924_v56 = vsel %vm1923_vm3, %v4213_v38, %v1920_v41  ;;  %vm1937_vm4 = vweird.f32 %v4215_v55 }
 0xb80   : > { %v1929_v34 = vsel %vm1926_vm5, %v1928_v53, %v1924_v56  ;;  %vm1938_vm7 = vmor %vm1936_vm6, %vm1937_vm4 }
 0xb81   : > { %v1933_v51 = vsub.f32 1.0, %v1932_v46  ;;  %v1948_v3 = vmul.f32 %v1929_v34, %v5074_v6 }
 0xb83   : > { %v1934_v58 = vmul.f32 %v4215_v55, %v1933_v51 }
 0xb85   : > { %v1935_v59 = vadd.f32 %v4215_v55, %v1934_v58 }
 0xb87   : > { %v1939_v63 = vsel %vm1938_vm7, %v4215_v55, %v1935_v59 }
 0xb88   : > { %v1944_v2 = vsel %vm1941_vm8, %v1943_v60, %v1939_v63 }
 0xb89   : > { %v1949_v5 = vmul.f32 %v1944_v2, %v5077_v19 }
 0xb8b   : > { %v1951_v57 = vpack.c.bf16 %v1949_v5, %v1948_v3 }
 0xb8d   : > { %2013 = vmatmul.bf16.gmra.mxu0 %v1951_v57 }
 0xbfa   : > { %v2009_v11 = vpop.f32.mrf.mxu0 }
 0xbfb   : > { %v2019_v12 = vadd.f32 %v2009_v11, %v4985_v61 }
 0xbfd   : > { %v5087_v13 = vadd.f32 %v4109_v10, %v2019_v12 }
 0xbff   : > { %v2035_v14 = vsel %vm499_vm0, %v5087_v13, 0.0  ;;  %v2051_v15 = vmul.f32 %v5087_v13, %v5087_v13 }
 0xc00   : > { %2036 = vadd.xlane.f32.xlu2 %v2035_v14 }
 0xc01   : > { %v2055_v6 = vsel %vm499_vm0, %v2051_v15, 0.0 }
 0xc02   : > { %2056 = vadd.xlane.f32.xlu1 %v2055_v6  ;;  %v2011_v17 = vpop.f32.mrf.mxu0 }
 0xc03   : > { %v2020_v18 = vadd.f32 %v2011_v17, %v4993_v7 }
 0xc05   : > { %v5095_v19 = vadd.f32 %v4109_v10, %v2020_v18 }
 0xc07   : > { %v2038_v61 = vsel %vm499_vm0, %v5095_v19, 0.0  ;;  %v2052_v0 = vmul.f32 %v5095_v19, %v5095_v19 }
 0xc08   : > { %2039 = vadd.xlane.f32.xlu0 %v2038_v61 }
 0xc09   : > { %v2058_v21 = vsel %vm499_vm0, %v2052_v0, 0.0  ;;  %v4110_v0 = vld [vmem:[#allocation5 + $0x1] ss:$0 sm:$0xff] }
 0xc0a   : > { %2059 = vadd.xlane.f32.xlu2 %v2058_v21  ;;  %v2014_v23 = vpop.f32.mrf.mxu0 }
 0xc0b   : > { %v2021_v27 = vadd.f32 %v2014_v23, %v5001_v16 }
 0xc0d   : > { %v5103_v28 = vadd.f32 %v4109_v10, %v2021_v27 }
 0xc0f   : > { %v2041_v7 = vsel %vm499_vm0, %v5103_v28, 0.0  ;;  %v2053_v4 = vmul.f32 %v5103_v28, %v5103_v28 }
 0xc10   : > { %2042 = vadd.xlane.f32.xlu0 %v2041_v7 }
 0xc11   : > { %v2061_v29 = vsel %vm499_vm0, %v2053_v4, 0.0 }
 0xc12   : > { %2062 = vadd.xlane.f32.xlu2 %v2061_v29  ;;  %v2016_v30 = vpop.f32.mrf.mxu0 }
 0xc13   : > { %v2022_v32 = vadd.f32 %v2016_v30, %v5009_v25 }
 0xc15   : > { %v5111_v33 = vadd.f32 %v4109_v10, %v2022_v32 }
 0xc17   : > { %v2044_v16 = vsel %vm499_vm0, %v5111_v33, 0.0  ;;  %v2054_v35 = vmul.f32 %v5111_v33, %v5111_v33 }
 0xc18   : > { %2045 = vadd.xlane.f32.xlu1 %v2044_v16 }
 0xc19   : > { %v2064_v37 = vsel %vm499_vm0, %v2054_v35, 0.0 }
 0xc1a   : > { %2065 = vadd.xlane.f32.xlu0 %v2064_v37  ;;  %v4111_v37 = vld [vmem:[%s5547_s6 + $0x1] ss:$0 sm:$0xff] }
 0xc73   : > { %v2037_v47 = vpop.xlane.xlu2 %2036 }
 0xc74   : > { %v2047_v52 = vmul.f32 %v2037_v47, %v4693_v22 }
 0xc75   : > { %v2057_v8 = vpop.xlane.xlu1 %2056 }
 0xc76   : > { %v2071_v20 = vmul.f32 %v2047_v52, %v2047_v52  ;;  %v2067_v36 = vmul.f32 %v2057_v8, %v4693_v22  ;;  %v2083_v6 = vsub.f32 %v5087_v13, %v2047_v52 }
 0xc78   : > { %v2075_v25 = vsub.f32 %v2067_v36, %v2071_v20 }
 0xc7a   : > { %v2079_v38 = vmax.f32 %v2075_v25, 0.0 }
 0xc7b   : > { %v2040_v40 = vpop.xlane.xlu0 %2039 }
 0xc7c   : > { %v2087_v42 = vadd.f32 1e-12, %v2079_v38  ;;  %v2048_v43 = vmul.f32 %v2040_v40, %v4693_v22 }
 0xc7d   : > { %v2060_v45 = vpop.xlane.xlu2 %2059 }
 0xc7e   : > { %4216 = vrsqrt.f32 %v2087_v42  ;;  %v2072_v62 = vmul.f32 %v2048_v43, %v2048_v43  ;;  %v2068_v9 = vmul.f32 %v2060_v45, %v4693_v22  ;;  %vm2097_vm10 = vweird.f32 %v2087_v42 }
 0xc7f   : > { %v2084_v4 = vsub.f32 %v5095_v19, %v2048_v43 }
 0xc80   : > { %v2076_v26 = vsub.f32 %v2068_v9, %v2072_v62 }
 0xc82   : > { %v2080_v39 = vmax.f32 %v2076_v26, 0.0 }
 0xc83   : > { %v2043_v24 = vpop.xlane.xlu0 %2042 }
 0xc84   : > { %v4217_v1 = vpop.eup %4216  ;;  %v5129_v55 = vmul.f32 %v2043_v24, %v4693_v22  ;;  %v2088_v46 = vadd.f32 1e-12, %v2080_v39 }
 0xc85   : > { %v2092_v41 = vmul.f32 %v4217_v1, %v2087_v42  ;;  %v2063_v49 = vpop.xlane.xlu2 %2062  ;;  %vm2098_vm9 = vweird.f32 %v4217_v1 }
 0xc86   : > { %v2073_v50 = vmul.f32 %v5129_v55, %v5129_v55  ;;  %v2069_v51 = vmul.f32 %v2063_v49, %v4693_v22  ;;  %4218 = vrsqrt.f32 %v2088_v46  ;;  %vm2099_vm11 = vmor %vm2097_vm10, %vm2098_vm9  ;;  %vm2107_vm13 = vweird.f32 %v2088_v46 }
 0xc87   : > { %v2093_v54 = vmul.f32 %v4217_v1, %v2092_v41  ;;  %v2085_v44 = vsub.f32 %v5103_v28, %v5129_v55 }
 0xc88   : > { %v2077_v56 = vsub.f32 %v2069_v51, %v2073_v50  ;;  %v4112_v51 = vld [vmem:[#allocation2 + $0x1] ss:$0 sm:$0xff] }
 0xc89   : > { %v2094_v58 = vmul.f32 0.5, %v2093_v54 }
 0xc8a   : > { %v2081_v31 = vmax.f32 %v2077_v56, 0.0 }
 0xc8b   : > { %v2095_v53 = vsub.f32 1.5, %v2094_v58  ;;  %v2046_v59 = vpop.xlane.xlu1 %2045 }
 0xc8c   : > { %v2089_v34 = vadd.f32 1e-12, %v2081_v31  ;;  %v2050_v60 = vmul.f32 %v2046_v59, %v4693_v22  ;;  %v4219_v63 = vpop.eup %4218 }
 0xc8d   : > { %v2066_v2 = vpop.xlane.xlu0 %2065  ;;  %v2096_v3 = vmul.f32 %v4217_v1, %v2095_v53  ;;  %v2102_v5 = vmul.f32 %v4219_v63, %v2088_v46  ;;  %vm2108_vm12 = vweird.f32 %v4219_v63 }
 0xc8e   : > { %4220 = vrsqrt.f32 %v2089_v34  ;;  %v2074_v57 = vmul.f32 %v2050_v60, %v2050_v60  ;;  %v2070_v10 = vmul.f32 %v2066_v2, %v4693_v22  ;;  %vm2109_vm3 = vmor %vm2107_vm13, %vm2108_vm12  ;;  %vm2117_vm5 = vweird.f32 %v2089_v34 }
 0xc8f   : > { %v2103_v11 = vmul.f32 %v4219_v63, %v2102_v5  ;;  %v2100_v14 = vsel %vm2099_vm11, %v4217_v1, %v2096_v3  ;;  %v2086_v26 = vsub.f32 %v5111_v33, %v2050_v60 }
 0xc90   : > { %v2078_v12 = vsub.f32 %v2070_v10, %v2074_v57  ;;  %v2131_v21 = vmul.f32 %v2100_v14, %v2083_v6 }
 0xc91   : > { %v2104_v15 = vmul.f32 0.5, %v2103_v11 }
 0xc92   : > { %v2082_v17 = vmax.f32 %v2078_v12, 0.0  ;;  %v2138_v32 = vmul.f32 %v4110_v0, %v2131_v21 }
 0xc93   : > { %v2105_v61 = vsub.f32 1.5, %v2104_v15 }
 0xc94   : > { %v4221_v18 = vpop.eup %4220  ;;  %v2090_v27 = vadd.f32 1e-12, %v2082_v17  ;;  %v2145_v20 = vadd.f32 %v4111_v37, %v2138_v32 }
 0xc95   : > { %v2112_v23 = vmul.f32 %v4221_v18, %v2089_v34  ;;  %v2106_v7 = vmul.f32 %v4219_v63, %v2105_v61  ;;  %vm2118_vm4 = vweird.f32 %v4221_v18 }
 0xc96   : > { %4222 = vrsqrt.f32 %v2090_v27  ;;  %vm2119_vm6 = vmor %vm2117_vm5, %vm2118_vm4  ;;  %vm2127_vm8 = vweird.f32 %v2090_v27 }
 0xc97   : > { %v2113_v29 = vmul.f32 %v4221_v18, %v2112_v23  ;;  %v2110_v30 = vsel %vm2109_vm3, %v4219_v63, %v2106_v7 }
 0xc98   : > { %v2132_v16 = vmul.f32 %v2110_v30, %v2084_v4 }
 0xc99   : > { %v2114_v35 = vmul.f32 0.5, %v2113_v29 }
 0xc9a   : > { %v2139_v47 = vmul.f32 %v4110_v0, %v2132_v16 }
 0xc9b   : > { %v2115_v52 = vsub.f32 1.5, %v2114_v35 }
 0xc9c   : > { %v4223_v8 = vpop.eup %4222  ;;  %v2146_v36 = vadd.f32 %v4111_v37, %v2139_v47 }
 0xc9d   : > { %v2116_v25 = vmul.f32 %v4221_v18, %v2115_v52  ;;  %v2122_v48 = vmul.f32 %v4223_v8, %v2090_v27  ;;  %vm2128_vm7 = vweird.f32 %v4223_v8 }
 0xc9e   : > { %v2149_v38 = vpack.c.bf16 %v2146_v36, %v2145_v20  ;;  %vm2129_vm9 = vmor %vm2127_vm8, %vm2128_vm7 }
 0xc9f   : > { %v2123_v40 = vmul.f32 %v4223_v8, %v2122_v48  ;;  %v2120_v43 = vsel %vm2119_vm6, %v4221_v18, %v2116_v25 }
 0xca0   : > { %3802 = vmatmul.msk.bf16.vlgmr.msra.gmra.mxu1 %vm499_vm0, %v2149_v38  ;;  %v2133_v62 = vmul.f32 %v2120_v43, %v2085_v44 }
 0xca1   : > { %v2124_v42 = vmul.f32 0.5, %v2123_v40 }
 0xca2   : > { %v2140_v1 = vmul.f32 %v4110_v0, %v2133_v62 }
 0xca3   : > { %v2125_v45 = vsub.f32 1.5, %v2124_v42 }
 0xca4   : > { %v2147_v46 = vadd.f32 %v4111_v37, %v2140_v1 }
 0xca5   : > { %v2126_v9 = vmul.f32 %v4223_v8, %v2125_v45 }
 0xca7   : > { %v2130_v39 = vsel %vm2129_vm9, %v4223_v8, %v2126_v9 }
 0xca8   : > { %v2134_v24 = vmul.f32 %v2130_v39, %v2086_v26 }
 0xcaa   : > { %v2141_v41 = vmul.f32 %v4110_v0, %v2134_v24 }
 0xcac   : > { %v2148_v49 = vadd.f32 %v4111_v37, %v2141_v41 }
 0xcae   : > { %v2150_v50 = vpack.c.bf16 %v2148_v49, %v2147_v46 }
 0xcb0   : > { %3803 = vmatmul.msk.bf16.gmra.mxu1 %vm499_vm0, %v2150_v50 }
 0xd1d   : > { %v2188_v54 = vpop.f32.mrf.mxu1 }
 0xd1e   : > { %v2189_v55 = vadd.f32 %v4112_v51, %v2188_v54 }
 0xd20   : > { %v2198_v56 = vpack.c.bf16 %v2189_v55, %v2189_v55 }
 0xd22   : > { %v2203_v58 = vunpack.c.l.b16 %v2198_v56 }
 0xd24   : > { %v5146_v31 = vpack.c.b16 %v2203_v58, %v2203_v58 }
 0xd25   : > { %v2190_v53 = vpop.f32.mrf.mxu1 }
 0xd26   : > { %v2191_v59 = vadd.f32 %v4112_v51, %v2190_v53  ;;  %2205 = vrot.lane.b32.xlu1 %v5146_v31, %s4484_s21 }
 0xd28   : > { %v2199_v34 = vpack.c.bf16 %v2191_v59, %v2191_v59 }
 0xd2a   : > { %v2227_v60 = vunpack.c.l.b16 %v2199_v34 }
 0xd2c   : > { %v5150_v63 = vpack.c.b16 %v2227_v60, %v2227_v60 }
 0xd2d   : > { %v2193_v2 = vpop.f32.mrf.mxu1 }
 0xd2e   : > { %v2194_v3 = vadd.f32 %v4112_v51, %v2193_v2  ;;  %2229 = vrot.lane.b32.xlu0 %v5150_v63, %s4484_s21 }
 0xd30   : > { %v2200_v5 = vpack.c.bf16 %v2194_v3, %v2194_v3 }
 0xd32   : > { %v2251_v57 = vunpack.c.l.b16 %v2200_v5 }
 0xd34   : > { %v5154_v10 = vpack.c.b16 %v2251_v57, %v2251_v57 }
 0xd35   : > { %v2195_v11 = vpop.f32.mrf.mxu1 }
 0xd36   : > { %v2196_v12 = vadd.f32 %v4112_v51, %v2195_v11  ;;  %2432 = vrot.lane.b32.xlu0 %v5146_v31, %s4486_s24  ;;  %2253 = vrot.lane.b32.xlu1 %v5154_v10, %s4484_s21 }
 0xd38   : > { %v2201_v14 = vpack.c.bf16 %v2196_v12, %v2196_v12 }
 0xd3a   : > { %v2275_v15 = vunpack.c.l.b16 %v2201_v14 }
 0xd3c   : > { %v5160_v6 = vpack.c.b16 %v2275_v15, %v2275_v15 }
 0xd3e   : > { %2430 = vrot.lane.b32.xlu0 %v5146_v31, %s4487_s30  ;;  %2277 = vrot.lane.b32.xlu2 %v5160_v6, %s4484_s21  ;;  %s5591_s21 = smov 56  }
 0xd98   : > { %v2206_v17 = vpop.permute.xlu1 %2205  ;;  %v2278_v18 = vpop.permute.xlu2 %2277 }
 0xd99   : > { %v2211_v61 = vsel %vm677_vm14, %v2206_v17, 0  ;;  %v2283_v0 = vsel %vm677_vm14, %v2278_v18, 0 }
 0xd9a   : > { %2220 = vmatpush.bf16.xpose.msra.mxu2 %v2211_v61 }
 0xda0   : > { %v2230_v21 = vpop.permute.xlu0 %2229 }
 0xda1   : > { %v2235_v23 = vsel %vm677_vm14, %v2230_v21, 0  ;;  %3804 = vmatmul.msk.bf16.vlgmr.msra.gmra.mxu2 %vm677_vm14, %v2198_v56 }
 0xda2   : > { %2292 = vmatpush.bf16.xpose.msrb.mxu2 %v2283_v0  ;;  %2244 = vmatpush.bf16.xpose.msrb.mxu3 %v2235_v23 }
 0xda8   : > { %v2254_v27 = vpop.permute.xlu1 %2253  ;;  %v2433_v43 = vpop.permute.xlu0 %2432 }
 0xda9   : > { %v2259_v7 = vsel %vm677_vm14, %v2254_v27, 0  ;;  %3805 = vmatmul.msk.bf16.vlgmr.msrb.gmra.mxu3 %vm677_vm14, %v2199_v34  ;;  %v2438_v50 = vsel %vm677_vm14, %v2433_v43, 0 }
 0xdaa   : > { %2268 = vmatpush.bf16.xpose.msrb.mxu1 %v2259_v7 }
 0xdb0   : > { %v2431_v24 = vpop.permute.xlu0 %2430 }
 0xdb1   : > { %3806 = vmatmul.msk.bf16.vlgmr.msrb.gmra.mxu1 %vm677_vm14, %v2200_v5  ;;  %3807 = vmatmul.msk.bf16.vlgmr.msrb.gmra.mxu2 %vm677_vm14, %v2201_v14 }
 0xe24   : > { %v2222_v4 = vpop.f32.mrf.mxu2 }
 0xe25   : > { %v2298_v29 = vsel %vm677_vm14, %v2222_v4, -inf }
 0xe26   : > { %2299 = vmax.xlane.f32.xlu2 %v2298_v29 }
 0xe2c   : > { %v2224_v30 = vpop.f32.mrf.mxu2  ;;  %v2246_v32 = vpop.f32.mrf.mxu3 }
 0xe2d   : > { %v2301_v16 = vsel %vm677_vm14, %v2246_v32, -inf }
 0xe2e   : > { %v2270_v35 = vpop.f32.mrf.mxu1  ;;  %2302 = vmax.xlane.f32.xlu1 %v2301_v16 }
 0xe2f   : > { %v2304_v36 = vsel %vm677_vm14, %v2270_v35, -inf }
 0xe34   : > { %v2248_v37 = vpop.f32.mrf.mxu3  ;;  %v2294_v47 = vpop.f32.mrf.mxu2 }
 0xe35   : > { %v2307_v52 = vsel %vm677_vm14, %v2294_v47, -inf }
 0xe36   : > { %2308 = vmax.xlane.f32.xlu0 %v2307_v52  ;;  %v2272_v8 = vpop.f32.mrf.mxu1 }
 0xe3c   : > { %v2296_v20 = vpop.f32.mrf.mxu2 }
 0xe3e   : > { %2409 = vrot.lane.b32.xlu2 %v5160_v6, %s4485_s22 }
 0xe47   : > { %2346 = vrot.lane.b32.xlu1 %v5146_v31, %s4485_s22 }
 0xe4a   : > { %2501 = vrot.lane.b32.xlu0 %v5160_v6, %s4486_s24 }
 0xe4f   : > { %2367 = vrot.lane.b32.xlu1 %v5150_v63, %s4485_s22 }
 0xe67   : > { %2305 = vmax.xlane.f32.xlu2 %v2304_v36 }
 0xe99   : > { %v2300_v25 = vpop.xlane.xlu2 %2299 }
 0xe9a   : > { %v2310_v48 = vsub.f32 %v2222_v4, %v2300_v25 }
 0xe9c   : > { %v2314_v38 = vmul.f32 1.442695, %v2310_v48 }
 0xe9e   : > { %4224 = vpow2.f32 %v2314_v38 }
 0xea1   : > { %v2410_v40 = vpop.permute.xlu2 %2409  ;;  %v2303_v42 = vpop.xlane.xlu1 %2302 }
 0xea2   : > { %v2415_v44 = vsel %vm822_vm15, %v2410_v40, 0  ;;  %v2311_v45 = vsub.f32 %v2246_v32, %v2303_v42 }
 0xea3   : > { %2424 = vmatpush.bf16.msra.mxu2 %v2415_v44 }
 0xea4   : > { %v4225_v62 = vpop.eup %4224  ;;  %v2316_v9 = vmul.f32 1.442695, %v2311_v45 }
 0xea5   : > { %v2322_v26 = vsel %vm677_vm14, %v4225_v62, 0.0 }
 0xea6   : > { %4226 = vpow2.f32 %v2316_v9  ;;  %2323 = vadd.xlane.f32.xlu0 %v2322_v26 }
 0xea9   : > { %v2309_v41 = vpop.xlane.xlu0 %2308 }
 0xeaa   : > { %v2313_v59 = vsub.f32 %v2294_v47, %v2309_v41 }
 0xeac   : > { %v4227_v39 = vpop.eup %4226  ;;  %v2320_v60 = vmul.f32 1.442695, %v2313_v59 }
 0xead   : > { %v2325_v1 = vsel %vm677_vm14, %v4227_v39, 0.0 }
 0xeae   : > { %2326 = vadd.xlane.f32.xlu2 %v2325_v1 }
 0xeb9   : > { %v2347_v46 = vpop.permute.xlu1 %2346 }
 0xeba   : > { %v2352_v49 = vsel %vm822_vm15, %v2347_v46, 0  ;;  %2455 = vrot.lane.b32.xlu0 %v5150_v63, %s4486_s24 }
 0xebb   : > { %2361 = vmatpush.bf16.msra.mxu3 %v2352_v49 }
 0xebc   : > { %v2502_v51 = vpop.permute.xlu0 %2501 }
 0xebd   : > { %v2507_v54 = vsel %vm677_vm14, %v2502_v51, 0 }
 0xebe   : > { %2516 = vmatpush.bf16.xpose.msrb.mxu2 %v2507_v54 }
 0xebf   : > { %2447 = vmatpush.bf16.xpose.msrb.mxu3 %v2438_v50 }
 0xec1   : > { %v2368_v55 = vpop.permute.xlu1 %2367 }
 0xec2   : > { %v2373_v56 = vsel %vm822_vm15, %v2368_v55, 0  ;;  %2388 = vrot.lane.b32.xlu0 %v5154_v10, %s4485_s22  ;;  %s5592_s22 = smov 112  }
 0xec3   : > { %2382 = vmatpush.bf16.msrb.mxu0 %v2373_v56 }
 0xec6   : > { %2499 = vrot.lane.b32.xlu2 %v5160_v6, %s4487_s30 }
 0xeca   : > { %2478 = vrot.lane.b32.xlu0 %v5154_v10, %s4486_s24  ;;  %s5593_s24 = smov 48  }
 0xed2   : > { %2656 = vrot.lane.b32.xlu0 %v5146_v31, %s4489_s2 }
 0xeda   : > { %v2306_v58 = vpop.xlane.xlu2 %2305 }
 0xedb   : > { %v2312_v53 = vsub.f32 %v2270_v35, %v2306_v58 }
 0xedd   : > { %v2318_v34 = vmul.f32 1.442695, %v2312_v53 }
 0xedf   : > { %4228 = vpow2.f32 %v2318_v34 }
 0xee0   : > { %4230 = vpow2.f32 %v2320_v60 }
 0xee5   : > { %v4229_v2 = vpop.eup %4228 }
 0xee6   : > { %v2328_v3 = vsel %vm677_vm14, %v4229_v2, 0.0  ;;  %v4231_v5 = vpop.eup %4230 }
 0xee7   : > { %2329 = vadd.xlane.f32.xlu1 %v2328_v3  ;;  %v2331_v57 = vsel %vm677_vm14, %v4231_v5, 0.0 }
 0xeef   : > { %2332 = vadd.xlane.f32.xlu2 %v2331_v57 }
 0xf00   : > { %2570 = vrot.lane.b32.xlu1 %v5146_v31, %s5591_s21 }
 0xf07   : > { %2453 = vrot.lane.b32.xlu2 %v5150_v63, %s4487_s30 }
 0xf0f   : > { %2476 = vrot.lane.b32.xlu2 %v5154_v10, %s4487_s30  ;;  %s5594_s30 = smov 72  }
 0xf19   : > { %v2324_v11 = vpop.xlane.xlu0 %2323 }
 0xf1a   : > { %4232 = vrcp.f32 %v2324_v11 }
 0xf20   : > { %v4233_v12 = vpop.eup %4232 }
 0xf21   : > { %v2338_v14 = vmul.f32 %v4233_v12, %v4225_v62  ;;  %v2327_v15 = vpop.xlane.xlu2 %2326 }
 0xf22   : > { %4234 = vrcp.f32 %v2327_v15 }
 0xf23   : > { %v2342_v17 = vpack.c.bf16 %v2338_v14, %v2338_v14 }
 0xf25   : > { %3808 = vmatmul.msk.bf16.vlgmr.msra.gmra.mxu3 %vm677_vm14, %v2342_v17 }
 0xf28   : > { %v4235_v18 = vpop.eup %4234 }
 0xf29   : > { %v2339_v61 = vmul.f32 %v4235_v18, %v4227_v39  ;;  %v2500_v30 = vpop.permute.xlu2 %2499 }
 0xf2b   : > { %v2343_v0 = vpack.c.bf16 %v2339_v61, %v2339_v61 }
 0xf2c   : > { %v2456_v21 = vpop.permute.xlu0 %2455 }
 0xf2d   : > { %v2461_v23 = vsel %vm677_vm14, %v2456_v21, 0  ;;  %3809 = vmatmul.msk.bf16.vlgmr.msrb.gmra.mxu0 %vm677_vm14, %v2343_v0 }
 0xf2e   : > { %2470 = vmatpush.bf16.xpose.msra.mxu0 %v2461_v23 }
 0xf34   : > { %v2389_v27 = vpop.permute.xlu0 %2388 }
 0xf35   : > { %v2394_v7 = vsel %vm822_vm15, %v2389_v27, 0  ;;  %3812 = vmatmul.msk.bf16.vlgmr.msrb.gmra.mxu3 %vm677_vm14, %v2431_v24 }
 0xf36   : > { %2403 = vmatpush.bf16.msra.mxu1 %v2394_v7 }
 0xf3c   : > { %v2479_v4 = vpop.permute.xlu0 %2478 }
 0xf3d   : > { %v2484_v29 = vsel %vm677_vm14, %v2479_v4, 0 }
 0xf3e   : > { %2493 = vmatpush.bf16.xpose.msrb.mxu1 %v2484_v29 }
 0xf44   : > { %v2657_v25 = vpop.permute.xlu0 %2656 }
 0xf45   : > { %v2662_v40 = vsel %vm677_vm14, %v2657_v25, 0 }
 0xf5a   : > { %v2330_v32 = vpop.xlane.xlu1 %2329 }
 0xf5b   : > { %4236 = vrcp.f32 %v2330_v32 }
 0xf61   : > { %v4237_v16 = vpop.eup %4236 }
 0xf62   : > { %v2340_v35 = vmul.f32 %v4237_v16, %v4229_v2  ;;  %v2333_v37 = vpop.xlane.xlu2 %2332 }
 0xf63   : > { %4238 = vrcp.f32 %v2333_v37 }
 0xf64   : > { %v2344_v47 = vpack.c.bf16 %v2340_v35, %v2340_v35 }
 0xf66   : > { %3810 = vmatmul.msk.bf16.vlgmr.msra.gmra.mxu1 %vm677_vm14, %v2344_v47 }
 0xf69   : > { %v4239_v52 = vpop.eup %4238 }
 0xf6a   : > { %v2341_v8 = vmul.f32 %v4239_v52, %v4231_v5  ;;  %v2454_v20 = vpop.permute.xlu2 %2453 }
 0xf6b   : > { %3813 = vmatmul.msk.bf16.vlgmr.msra.gmra.mxu0 %vm677_vm14, %v2454_v20 }
 0xf6c   : > { %v2345_v36 = vpack.c.bf16 %v2341_v8, %v2341_v8 }
 0xf6e   : > { %3811 = vmatmul.msk.bf16.vlgmr.msra.gmra.mxu2 %vm677_vm14, %v2345_v36 }
 0xf72   : > { %v2571_v48 = vpop.permute.xlu1 %2570  ;;  %v2477_v42 = vpop.permute.xlu2 %2476 }
 0xf73   : > { %v2576_v38 = vsel %vm822_vm15, %v2571_v48, 0 }
 0xf74   : > { %2585 = vmatpush.bf16.msra.mxu3 %v2576_v38 }
 0xf76   : > { %3814 = vmatmul.msk.bf16.vlgmr.msrb.gmra.mxu1 %vm677_vm14, %v2477_v42 }
 0xf78   : > { %2671 = vmatpush.bf16.xpose.msrb.mxu3 %v2662_v40 }
 0xf7e   : > { %3815 = vmatmul.msk.bf16.vlgmr.msrb.gmra.mxu2 %vm677_vm14, %v2500_v30 }
 0xfa8   : > { %v5224_v43 = vpop.f32.mrf.mxu3 }
 0xfaa   : > { %v5226_v44 = vpop.f32.mrf.mxu0 }
 0xfb0   : > { %v2365_v45 = vpop.f32.mrf.mxu3 }
 0xfb2   : > { %v2386_v62 = vpop.f32.mrf.mxu0 }
 0xfb8   : > { %v2449_v9 = vpop.f32.mrf.mxu3 }
 0xfb9   : > { %v2522_v26 = vsel %vm677_vm14, %v2449_v9, -inf }
 0xfba   : > { %2523 = vmax.xlane.f32.xlu0 %v2522_v26 }
 0xfc0   : > { %v2451_v39 = vpop.f32.mrf.mxu3 }
 0xfce   : > { %2654 = vrot.lane.b32.xlu0 %v5146_v31, %s5592_s22 }
 0xfd6   : > { %2679 = vrot.lane.b32.xlu0 %v5150_v63, %s4489_s2 }
 0xfde   : > { %2723 = vrot.lane.b32.xlu0 %v5160_v6, %s5592_s22 }
 0xfe3   : > { %v5235_v24 = vpop.f32.mrf.mxu1 }
 0xfe8   : > { %v2472_v1 = vpop.f32.mrf.mxu0 }
 0xfe9   : > { %v2525_v41 = vsel %vm677_vm14, %v2472_v1, -inf }
 0xfea   : > { %2526 = vmax.xlane.f32.xlu1 %v2525_v41 }
 0xfeb   : > { %v2407_v46 = vpop.f32.mrf.mxu1 }
 0xff0   : > { %v2474_v49 = vpop.f32.mrf.mxu0 }
 0xff1   : > { %v5238_v50 = vpop.f32.mrf.mxu2 }
 0xff3   : > { %v2495_v51 = vpop.f32.mrf.mxu1 }
 0xff4   : > { %v2528_v54 = vsel %vm677_vm14, %v2495_v51, -inf }
 0xff5   : > { %2529 = vmax.xlane.f32.xlu1 %v2528_v54 }
 0xff9   : > { %v2428_v55 = vpop.f32.mrf.mxu2 }
 0xffb   : > { %v2497_v56 = vpop.f32.mrf.mxu1 }
0x1001   : > { %v2518_v58 = vpop.f32.mrf.mxu2 }
0x1002   : > { %v2531_v53 = vsel %vm677_vm14, %v2518_v58, -inf }
0x1003   : > { %2532 = vmax.xlane.f32.xlu2 %v2531_v53 }
0x1009   : > { %v2520_v59 = vpop.f32.mrf.mxu2 }
0x101b   : > { %2633 = vrot.lane.b32.xlu2 %v5160_v6, %s5591_s21 }
0x102d   : > { %v2524_v34 = vpop.xlane.xlu0 %2523 }
0x102e   : > { %v2534_v60 = vsub.f32 %v2449_v9, %v2524_v34 }
0x1030   : > { %v2538_v2 = vmul.f32 1.442695, %v2534_v60 }
0x1032   : > { %4240 = vpow2.f32 %v2538_v2 }
0x1038   : > { %v4241_v3 = vpop.eup %4240 }
0x1039   : > { %v2546_v5 = vsel %vm677_vm14, %v4241_v3, 0.0 }
0x103a   : > { %2547 = vadd.xlane.f32.xlu1 %v2546_v5 }
0x1040   : > { %v2655_v52 = vpop.permute.xlu0 %2654 }
0x1048   : > { %v2680_v8 = vpop.permute.xlu0 %2679 }
0x1049   : > { %v2685_v25 = vsel %vm677_vm14, %v2680_v8, 0 }
0x1050   : > { %v2724_v26 = vpop.permute.xlu0 %2723 }
0x1053   : > { %2591 = vrot.lane.b32.xlu1 %v5150_v63, %s5591_s21 }
0x105d   : > { %v2527_v57 = vpop.xlane.xlu1 %2526 }
0x105e   : > { %v2535_v11 = vsub.f32 %v2472_v1, %v2527_v57 }
0x1060   : > { %v2540_v12 = vmul.f32 1.442695, %v2535_v11 }
0x1062   : > { %4242 = vpow2.f32 %v2540_v12 }
0x1068   : > { %v4243_v14 = vpop.eup %4242  ;;  %v2530_v15 = vpop.xlane.xlu1 %2529 }
0x1069   : > { %v2549_v17 = vsel %vm677_vm14, %v4243_v14, 0.0  ;;  %v2536_v18 = vsub.f32 %v2495_v51, %v2530_v15 }
0x106a   : > { %2550 = vadd.xlane.f32.xlu2 %v2549_v17 }
0x106b   : > { %v2542_v61 = vmul.f32 1.442695, %v2536_v18 }
0x106d   : > { %4244 = vpow2.f32 %v2542_v61 }
0x1073   : > { %v4245_v23 = vpop.eup %4244 }
0x1074   : > { %v2552_v7 = vsel %vm677_vm14, %v4245_v23, 0.0 }
0x1076   : > { %v2533_v0 = vpop.xlane.xlu2 %2532 }
0x1077   : > { %v2537_v21 = vsub.f32 %v2518_v58, %v2533_v0 }
0x1079   : > { %v2544_v27 = vmul.f32 1.442695, %v2537_v21 }
0x107b   : > { %4246 = vpow2.f32 %v2544_v27 }
0x107d   : > { %2553 = vadd.xlane.f32.xlu1 %v2552_v7 }
0x107e   : > { %v2634_v4 = vpop.permute.xlu2 %2633 }
0x107f   : > { %v2639_v29 = vsel %vm822_vm15, %v2634_v4, 0 }
0x1080   : > { %2648 = vmatpush.bf16.msra.mxu2 %v2639_v29 }
0x1081   : > { %v4247_v30 = vpop.eup %4246 }
0x1082   : > { %2725 = vrot.lane.b32.xlu2 %v5160_v6, %s4489_s2  ;;  %v2555_v32 = vsel %vm677_vm14, %v4247_v30, 0.0 }
0x1083   : > { %2556 = vadd.xlane.f32.xlu0 %v2555_v32 }
0x108a   : > { %2612 = vrot.lane.b32.xlu2 %v5154_v10, %s5591_s21  ;;  %s484_s21 = scalar_lea.vmem [#allocation8], %s3688_s17 }
0x1092   : > { %2677 = vrot.lane.b32.xlu2 %v5150_v63, %s5592_s22 }
0x1096   : > { %2794 = vrot.lane.b32.xlu1 %v5146_v31, %s5593_s24 }
0x1097   : > { %2702 = vrot.lane.b32.xlu0 %v5154_v10, %s4489_s2  ;;  %s5595_s2 = smov 104  }
0x109a   : > { %2700 = vrot.lane.b32.xlu2 %v5154_v10, %s5592_s22  ;;  %s3953_s22 = sshll.u32 %s4590_s29, 5 }
0x10ad   : > { %v2548_v16 = vpop.xlane.xlu1 %2547 }
0x10ae   : > { %4248 = vrcp.f32 %v2548_v16 }
0x10b4   : > { %v4249_v35 = vpop.eup %4248 }
0x10b5   : > { %v2562_v37 = vmul.f32 %v4249_v35, %v4241_v3 }
0x10b7   : > { %v2566_v47 = vpack.c.bf16 %v2562_v37, %v2562_v37 }
0x10b9   : > { %3816 = vmatmul.msk.bf16.vlgmr.msra.gmra.mxu3 %vm677_vm14, %v2566_v47 }
0x10c5   : > { %v2592_v20 = vpop.permute.xlu1 %2591 }
0x10c6   : > { %v2597_v36 = vsel %vm822_vm15, %v2592_v20, 0 }
0x10c7   : > { %2606 = vmatpush.bf16.msrb.mxu0 %v2597_v36 }
0x10c9   : > { %3820 = vmatmul.msk.bf16.vlgmr.msrb.gmra.mxu3 %vm677_vm14, %v2655_v52 }
0x10cb   : > { %2694 = vmatpush.bf16.xpose.msra.mxu0 %v2685_v25 }
0x10dd   : > { %v2551_v48 = vpop.xlane.xlu2 %2550 }
0x10de   : > { %4250 = vrcp.f32 %v2551_v48 }
0x10e4   : > { %v4251_v38 = vpop.eup %4250 }
0x10e5   : > { %v2563_v40 = vmul.f32 %v4251_v38, %v4243_v14  ;;  %v2726_v42 = vpop.permute.xlu2 %2725 }
0x10e6   : > { %v2731_v45 = vsel %vm677_vm14, %v2726_v42, 0 }
0x10e7   : > { %v2567_v62 = vpack.c.bf16 %v2563_v40, %v2563_v40  ;;  %2740 = vmatpush.bf16.xpose.msrb.mxu2 %v2731_v45 }
0x10e9   : > { %3817 = vmatmul.msk.bf16.vlgmr.msrb.gmra.mxu0 %vm677_vm14, %v2567_v62 }
0x10ed   : > { %v2613_v9 = vpop.permute.xlu2 %2612 }
0x10ee   : > { %v2618_v39 = vsel %vm822_vm15, %v2613_v9, 0 }
0x10ef   : > { %2627 = vmatpush.bf16.msra.mxu1 %v2618_v39 }
0x10f0   : > { %v2554_v1 = vpop.xlane.xlu1 %2553 }
0x10f1   : > { %4252 = vrcp.f32 %v2554_v1 }
0x10f5   : > { %v2678_v51 = vpop.permute.xlu2 %2677 }
0x10f6   : > { %v2557_v41 = vpop.xlane.xlu0 %2556 }
0x10f7   : > { %v4253_v46 = vpop.eup %4252  ;;  %4254 = vrcp.f32 %v2557_v41 }
0x10f8   : > { %v2564_v49 = vmul.f32 %v4253_v46, %v4245_v23 }
0x10f9   : > { %3821 = vmatmul.msk.bf16.vlgmr.msra.gmra.mxu0 %vm677_vm14, %v2678_v51 }
0x10fa   : > { %v2568_v54 = vpack.c.bf16 %v2564_v49, %v2564_v49 }
0x10fc   : > { %3818 = vmatmul.msk.bf16.vlgmr.msra.gmra.mxu1 %vm677_vm14, %v2568_v54 }
0x10fd   : > { %v4255_v55 = vpop.eup %4254  ;;  %v2701_v2 = vpop.permute.xlu2 %2700 }
0x10fe   : > { %v2565_v56 = vmul.f32 %v4255_v55, %v4247_v30 }
0x1100   : > { %v2569_v58 = vpack.c.bf16 %v2565_v56, %v2565_v56 }
0x1102   : > { %3819 = vmatmul.msk.bf16.vlgmr.msra.gmra.mxu2 %vm677_vm14, %v2569_v58 }
0x1108   : > { %v2795_v53 = vpop.permute.xlu1 %2794 }
0x1109   : > { %v2800_v59 = vsel %vm822_vm15, %v2795_v53, 0  ;;  %v2703_v34 = vpop.permute.xlu0 %2702 }
0x110a   : > { %v2708_v60 = vsel %vm677_vm14, %v2703_v34, 0  ;;  %2809 = vmatpush.bf16.msra.mxu3 %v2800_v59 }
0x110b   : > { %2717 = vmatpush.bf16.xpose.msrb.mxu1 %v2708_v60 }
0x1112   : > { %3822 = vmatmul.msk.bf16.vlgmr.msrb.gmra.mxu1 %vm677_vm14, %v2701_v2  ;;  %3823 = vmatmul.msk.bf16.vlgmr.msrb.gmra.mxu2 %vm677_vm14, %v2724_v26 }
0x113c   : > { %v5277_v3 = vpop.f32.mrf.mxu3 }
0x1144   : > { %v2589_v5 = vpop.f32.mrf.mxu3 }
0x114c   : > { %v2673_v57 = vpop.f32.mrf.mxu3 }
0x114d   : > { %v2746_v11 = vsel %vm677_vm14, %v2673_v57, -inf }
0x114e   : > { %2747 = vmax.xlane.f32.xlu0 %v2746_v11 }
0x1154   : > { %v2675_v12 = vpop.f32.mrf.mxu3 }
0x1162   : > { %2815 = vrot.lane.b32.xlu0 %v5150_v63, %s5593_s24 }
0x1166   : > { %v5282_v14 = vpop.f32.mrf.mxu0 }
0x1167   : > { %v4072_v15 = vpack.i.bf16 %v5282_v14, %v5277_v3 }
0x116e   : > { %v2610_v17 = vpop.f32.mrf.mxu0 }
0x1176   : > { %v2696_v18 = vpop.f32.mrf.mxu0 }
0x1177   : > { %v2749_v61 = vsel %vm677_vm14, %v2696_v18, -inf }
0x1178   : > { %2750 = vmax.xlane.f32.xlu2 %v2749_v61 }
0x1179   : > { %v5287_v0 = vpop.f32.mrf.mxu1 }
0x117e   : > { %v2698_v21 = vpop.f32.mrf.mxu0 }
0x1181   : > { %v2631_v23 = vpop.f32.mrf.mxu1 }
0x1185   : > { %v5289_v27 = vpop.f32.mrf.mxu2 }
0x1186   : > { %v4087_v7 = vpack.i.bf16 %v5289_v27, %v5287_v0 }
0x118d   : > { %v2652_v4 = vpop.f32.mrf.mxu2 }
0x118f   : > { %v2719_v29 = vpop.f32.mrf.mxu1 }
0x1190   : > { %2880 = vrot.lane.b32.xlu2 %v5146_v31, %s5594_s30  ;;  %v2752_v30 = vsel %vm677_vm14, %v2719_v29, -inf }
0x1191   : > { %2753 = vmax.xlane.f32.xlu1 %v2752_v30 }
0x1195   : > { %v2742_v32 = vpop.f32.mrf.mxu2 }
0x1196   : > { %v2755_v35 = vsel %vm677_vm14, %v2742_v32, -inf }
0x1197   : > { %v2721_v16 = vpop.f32.mrf.mxu1 }
0x1198   : > { %2836 = vrot.lane.b32.xlu2 %v5154_v10, %s5593_s24 }
0x1199   : > { %2756 = vmax.xlane.f32.xlu1 %v2755_v35 }
0x119d   : > { %v2744_v37 = vpop.f32.mrf.mxu2 }
0x11a0   : > { %2901 = vrot.lane.b32.xlu2 %v5150_v63, %s5595_s2 }
0x11c1   : > { %v2748_v47 = vpop.xlane.xlu0 %2747 }
0x11c2   : > { %v2758_v52 = vsub.f32 %v2673_v57, %v2748_v47 }
0x11c4   : > { %v2762_v8 = vmul.f32 1.442695, %v2758_v52 }
0x11c6   : > { %4256 = vpow2.f32 %v2762_v8 }
0x11cc   : > { %v4257_v20 = vpop.eup %4256 }
0x11cd   : > { %v2770_v36 = vsel %vm677_vm14, %v4257_v20, 0.0 }
0x11ce   : > { %2771 = vadd.xlane.f32.xlu1 %v2770_v36 }
0x11d4   : > { %v2816_v25 = vpop.permute.xlu0 %2815 }
0x11d5   : > { %v2821_v48 = vsel %vm822_vm15, %v2816_v25, 0 }
0x11d6   : > { %2830 = vmatpush.bf16.msrb.mxu0 %v2821_v48 }
0x11e7   : > { %2857 = vrot.lane.b32.xlu1 %v5160_v6, %s5593_s24 }
0x11eb   : > { %v2751_v38 = vpop.xlane.xlu2 %2750 }
0x11ec   : > { %v2759_v40 = vsub.f32 %v2696_v18, %v2751_v38 }
0x11ee   : > { %v2764_v42 = vmul.f32 1.442695, %v2759_v40 }
0x11f0   : > { %4258 = vpow2.f32 %v2764_v42 }
0x11f3   : > { %v2881_v45 = vpop.permute.xlu2 %2880 }
0x11f4   : > { %v2886_v62 = vsel %vm677_vm14, %v2881_v45, 0 }
0x11f5   : > { %2895 = vmatpush.bf16.xpose.msrb.mxu3 %v2886_v62 }
0x11f6   : > { %v4259_v9 = vpop.eup %4258 }
0x11f7   : > { %v2773_v26 = vsel %vm677_vm14, %v4259_v9, 0.0 }
0x11f8   : > { %2774 = vadd.xlane.f32.xlu0 %v2773_v26 }
0x11fb   : > { %v2837_v39 = vpop.permute.xlu2 %2836 }
0x11fc   : > { %v2842_v1 = vsel %vm822_vm15, %v2837_v39, 0 }
0x11fd   : > { %2851 = vmatpush.bf16.msra.mxu1 %v2842_v1 }
0x1203   : > { %v2902_v23 = vpop.permute.xlu2 %2901 }
0x1204   : > { %v2754_v41 = vpop.xlane.xlu1 %2753 }
0x1205   : > { %v2760_v46 = vsub.f32 %v2719_v29, %v2754_v41 }
0x1207   : > { %v2766_v49 = vmul.f32 1.442695, %v2760_v46 }
0x1209   : > { %4260 = vpow2.f32 %v2766_v49 }
0x120c   : > { %2878 = vrot.lane.b32.xlu0 %v5146_v31, %s5595_s2  ;;  %v2757_v51 = vpop.xlane.xlu1 %2756 }
0x120d   : > { %v2761_v54 = vsub.f32 %v2742_v32, %v2757_v51 }
0x120f   : > { %v4261_v55 = vpop.eup %4260  ;;  %v2768_v56 = vmul.f32 1.442695, %v2761_v54 }
0x1210   : > { %v2776_v58 = vsel %vm677_vm14, %v4261_v55, 0.0 }
0x1211   : > { %4262 = vpow2.f32 %v2768_v56  ;;  %2777 = vadd.xlane.f32.xlu1 %v2776_v58 }
0x1214   : > { %2903 = vrot.lane.b32.xlu0 %v5150_v63, %s5594_s30 }
0x1217   : > { %v4263_v53 = vpop.eup %4262 }
0x1218   : > { %v2779_v59 = vsel %vm677_vm14, %v4263_v53, 0.0 }
0x1219   : > { %2780 = vadd.xlane.f32.xlu2 %v2779_v59 }
0x121c   : > { %2949 = vrot.lane.b32.xlu0 %v5160_v6, %s5594_s30 }
0x1224   : > { %2947 = vrot.lane.b32.xlu0 %v5160_v6, %s5595_s2 }
0x122c   : > { %2924 = vrot.lane.b32.xlu0 %v5154_v10, %s5595_s2  ;;  %s3581_s2 = scalar_lea.hbm %s5554_s13, %s3953_s22 }
0x1231   : > { %2926 = vrot.lane.b32.xlu2 %v5154_v10, %s5594_s30 }
0x1241   : > { %v2772_v34 = vpop.xlane.xlu1 %2771 }
0x1242   : > { %4264 = vrcp.f32 %v2772_v34 }
0x1248   : > { %v4265_v60 = vpop.eup %4264 }
0x1249   : > { %v2786_v2 = vmul.f32 %v4265_v60, %v4257_v20 }
0x124b   : > { %v2790_v5 = vpack.c.bf16 %v2786_v2, %v2786_v2 }
0x124d   : > { %3824 = vmatmul.msk.bf16.vlgmr.msra.gmra.mxu3 %vm677_vm14, %v2790_v5 }
0x1259   : > { %v2858_v57 = vpop.permute.xlu1 %2857 }
0x125a   : > { %v2863_v11 = vsel %vm822_vm15, %v2858_v57, 0 }
0x125b   : > { %2872 = vmatpush.bf16.msra.mxu2 %v2863_v11 }
0x126b   : > { %v2775_v12 = vpop.xlane.xlu0 %2774 }
0x126c   : > { %4266 = vrcp.f32 %v2775_v12 }
0x1272   : > { %v4267_v17 = vpop.eup %4266 }
0x1273   : > { %v2787_v18 = vmul.f32 %v4267_v17, %v4259_v9 }
0x1275   : > { %v2791_v61 = vpack.c.bf16 %v2787_v18, %v2787_v18 }
0x1277   : > { %3825 = vmatmul.msk.bf16.vlgmr.msrb.gmra.mxu0 %vm677_vm14, %v2791_v61 }
0x127e   : > { %v2879_v21 = vpop.permute.xlu0 %2878 }
0x127f   : > { %3828 = vmatmul.msk.bf16.vlgmr.msrb.gmra.mxu3 %vm677_vm14, %v2879_v21 }
0x1284   : > { %v2778_v4 = vpop.xlane.xlu1 %2777 }
0x1285   : > { %4268 = vrcp.f32 %v2778_v4 }
0x1286   : > { %v2904_v29 = vpop.permute.xlu0 %2903 }
0x1287   : > { %v2909_v30 = vsel %vm677_vm14, %v2904_v29, 0 }
0x1288   : > { %2918 = vmatpush.bf16.xpose.msra.mxu0 %v2909_v30 }
0x128b   : > { %v4269_v32 = vpop.eup %4268 }
0x128c   : > { %v2788_v16 = vmul.f32 %v4269_v32, %v4261_v55  ;;  %v2781_v35 = vpop.xlane.xlu2 %2780 }
0x128d   : > { %4270 = vrcp.f32 %v2781_v35 }
0x128e   : > { %v2792_v37 = vpack.c.bf16 %v2788_v16, %v2788_v16  ;;  %v2950_v47 = vpop.permute.xlu0 %2949 }
0x128f   : > { %v2955_v52 = vsel %vm677_vm14, %v2950_v47, 0  ;;  %3829 = vmatmul.msk.bf16.vlgmr.msra.gmra.mxu0 %vm677_vm14, %v2902_v23 }
0x1290   : > { %3826 = vmatmul.msk.bf16.vlgmr.msra.gmra.mxu1 %vm677_vm14, %v2792_v37  ;;  %2964 = vmatpush.bf16.xpose.msrb.mxu2 %v2955_v52 }
0x1293   : > { %v4271_v8 = vpop.eup %4270 }
0x1294   : > { %v2789_v20 = vmul.f32 %v4271_v8, %v4263_v53  ;;  %v2927_v36 = vpop.permute.xlu2 %2926 }
0x1295   : > { %v2932_v25 = vsel %vm677_vm14, %v2927_v36, 0 }
0x1296   : > { %v2793_v48 = vpack.c.bf16 %v2789_v20, %v2789_v20  ;;  %2941 = vmatpush.bf16.xpose.msrb.mxu1 %v2932_v25  ;;  %v2948_v38 = vpop.permute.xlu0 %2947 }
0x1298   : > { %3827 = vmatmul.msk.bf16.vlgmr.msra.gmra.mxu2 %vm677_vm14, %v2793_v48 }
0x129e   : > { %v2925_v40 = vpop.permute.xlu0 %2924 }
0x12a0   : > { %3830 = vmatmul.msk.bf16.vlgmr.msrb.gmra.mxu1 %vm677_vm14, %v2925_v40 }
0x12a8   : > { %3831 = vmatmul.msk.bf16.vlgmr.msrb.gmra.mxu2 %vm677_vm14, %v2948_v38 }
0x12d0   : > { %v5334_v42 = vpop.f32.mrf.mxu3 }
0x12d8   : > { %v2813_v45 = vpop.f32.mrf.mxu3 }
0x12f4   : > { %v5336_v62 = vpop.f32.mrf.mxu0 }
0x12f5   : > { %v4077_v9 = vpack.i.bf16 %v5336_v62, %v5334_v42 }
0x12fc   : > { %v2834_v26 = vpop.f32.mrf.mxu0 }
0x1302   : > { %v2897_v39 = vpop.f32.mrf.mxu3 }
0x1303   : > { %v2970_v1 = vsel %vm677_vm14, %v2897_v39, -inf }
0x1304   : > { %2971 = vmax.xlane.f32.xlu2 %v2970_v1 }
0x130a   : > { %v2899_v41 = vpop.f32.mrf.mxu3 }
0x130c   : > { %v2920_v46 = vpop.f32.mrf.mxu0 }
0x130d   : > { %v5341_v49 = vpop.f32.mrf.mxu1  ;;  %v2973_v51 = vsel %vm677_vm14, %v2920_v46, -inf }
0x130e   : > { %2974 = vmax.xlane.f32.xlu1 %v2973_v51 }
0x1314   : > { %v2922_v54 = vpop.f32.mrf.mxu0 }
0x1315   : > { %v2855_v55 = vpop.f32.mrf.mxu1 }
0x131b   : > { %v5344_v56 = vpop.f32.mrf.mxu2 }
0x131c   : > { %v4092_v58 = vpack.i.bf16 %v5344_v56, %v5341_v49  ;;  %3039 = vrot.lane.b32.xlu2 %v5150_v63, %s5596_s5 }
0x131d   : > { %v2943_v53 = vpop.f32.mrf.mxu1 }
0x131e   : > { %v2976_v59 = vsel %vm677_vm14, %v2943_v53, -inf }
0x131f   : > { %2977 = vmax.xlane.f32.xlu1 %v2976_v59 }
0x1323   : > { %v2876_v34 = vpop.f32.mrf.mxu2 }
0x1324   : > { %3060 = vrot.lane.b32.xlu2 %v5154_v10, %s5596_s5 }
0x1325   : > { %v2945_v60 = vpop.f32.mrf.mxu1 }
0x1326   : > { %v3942_v60 = vld [vmem:[%s5544_s3 + $0x18] sm:$0xff] }
0x132b   : > { %v2966_v2 = vpop.f32.mrf.mxu2 }
0x132c   : > { %v2979_v5 = vsel %vm677_vm14, %v2966_v2, -inf }
0x132d   : > { %2980 = vmax.xlane.f32.xlu0 %v2979_v5 }
0x1333   : > { %v2968_v57 = vpop.f32.mrf.mxu2 }
0x1338   : > { %3018 = vrot.lane.b32.xlu1 %v5146_v31, %s5596_s5 }
0x1377   : > { %v2972_v11 = vpop.xlane.xlu2 %2971 }
0x1378   : > { %v2982_v61 = vsub.f32 %v2897_v39, %v2972_v11 }
0x137a   : > { %v2986_v23 = vmul.f32 1.442695, %v2982_v61 }
0x137f   : > { %v3040_v12 = vpop.permute.xlu2 %3039 }
0x1380   : > { %v3045_v63 = vsel %vm822_vm15, %v3040_v12, 0 }
0x1381   : > { %3054 = vmatpush.bf16.msrb.mxu0 %v3045_v63  ;;  %v2975_v17 = vpop.xlane.xlu1 %2974 }
0x1382   : > { %v2983_v18 = vsub.f32 %v2920_v46, %v2975_v17  ;;  %v3941_v17 = vld [vmem:[%s5544_s3 + $0x10] sm:$0xff] }
0x1384   : > { %v2988_v21 = vmul.f32 1.442695, %v2983_v18 }
0x1386   : > { %4272 = vpow2.f32 %v2988_v21 }
0x1387   : > { %v3061_v10 = vpop.permute.xlu2 %3060  ;;  %4274 = vpow2.f32 %v2986_v23 }
0x1388   : > { %v3066_v4 = vsel %vm822_vm15, %v3061_v10, 0 }
0x1389   : > { %3075 = vmatpush.bf16.msra.mxu1 %v3066_v4 }
0x138c   : > { %v4273_v29 = vpop.eup %4272 }
0x138d   : > { %v2997_v30 = vsel %vm677_vm14, %v4273_v29, 0.0  ;;  %v4275_v31 = vpop.eup %4274 }
0x138e   : > { %2998 = vadd.xlane.f32.xlu1 %v2997_v30  ;;  %v2994_v32 = vsel %vm677_vm14, %v4275_v31, 0.0 }
0x1392   : > { %v2978_v16 = vpop.xlane.xlu1 %2977 }
0x1393   : > { %v2984_v47 = vsub.f32 %v2943_v53, %v2978_v16 }
0x1395   : > { %v2990_v8 = vmul.f32 1.442695, %v2984_v47 }
0x1396   : > { %2995 = vadd.xlane.f32.xlu1 %v2994_v32 }
0x13a0   : > { %v2981_v35 = vpop.xlane.xlu0 %2980 }
0x13a1   : > { %v2985_v37 = vsub.f32 %v2966_v2, %v2981_v35 }
0x13a3   : > { %v2992_v52 = vmul.f32 1.442695, %v2985_v37 }
0x13a5   : > { %4276 = vpow2.f32 %v2992_v52 }
0x13a6   : > { %4278 = vpow2.f32 %v2990_v8 }
0x13aa   : > { %v3019_v20 = vpop.permute.xlu1 %3018 }
0x13ab   : > { %v4277_v36 = vpop.eup %4276  ;;  %v3024_v25 = vsel %vm822_vm15, %v3019_v20, 0 }
0x13ac   : > { %3033 = vmatpush.bf16.msra.mxu3 %v3024_v25  ;;  %v3003_v48 = vsel %vm677_vm14, %v4277_v36, 0.0  ;;  %v4279_v38 = vpop.eup %4278 }
0x13ad   : > { %3004 = vadd.xlane.f32.xlu0 %v3003_v48  ;;  %v3000_v40 = vsel %vm677_vm14, %v4279_v38, 0.0 }
0x13af   : > { %3081 = vrot.lane.b32.xlu1 %v5160_v6, %s5596_s5  ;;  %s3582_s5 = sshll.u32 %s484_s21, 4  ;;  %s3583_s5 = int_to_ptr.vmem [resolvable:$true] %s3582_s5 }
0x13b0   : > { %3198 = vmatpush.bf16.msrb.mxu3 %v3942_v60 }
0x13b4   : > { %3199 = vmatpush.bf16.msrb.mxu3 %v3941_v17 }
0x13b5   : > { %3001 = vadd.xlane.f32.xlu0 %v3000_v40 }
0x13b7   : > { %4078 = vrot.lane.b32.xlu1 %v4077_v9, %s5597_s25 }
0x13bf   : > { %4088 = vrot.lane.b32.xlu1 %v4087_v7, %s5598_s19 }
0x13c9   : > { %4073 = vrot.lane.b32.xlu0 %v4072_v15, %s5598_s19 }
0x1401   : > { %v2999_v6 = vpop.xlane.xlu1 %2998 }
0x1402   : > { %4280 = vrcp.f32 %v2999_v6 }
0x1408   : > { %v4281_v45 = vpop.eup %4280 }
0x1409   : > { %v3011_v26 = vmul.f32 %v4281_v45, %v4273_v29  ;;  %v2996_v39 = vpop.xlane.xlu1 %2995 }
0x140a   : > { %4282 = vrcp.f32 %v2996_v39 }
0x140b   : > { %v3015_v1 = vpack.c.bf16 %v3011_v26, %v3011_v26 }
0x140d   : > { %3833 = vmatmul.msk.bf16.vlgmr.msrb.gmra.mxu0 %vm677_vm14, %v3015_v1 }
0x1410   : > { %v4283_v42 = vpop.eup %4282 }
0x1411   : > { %v3010_v62 = vmul.f32 %v4283_v42, %v4275_v31 }
0x1413   : > { %v3014_v9 = vpack.c.bf16 %v3010_v62, %v3010_v62 }
0x1415   : > { %3832 = vmatmul.msk.bf16.vlgmr.msra.gmra.mxu3 %vm677_vm14, %v3014_v9 }
0x1420   : > { %v3005_v0 = vpop.xlane.xlu0 %3004 }
0x1421   : > { %4284 = vrcp.f32 %v3005_v0  ;;  %v3082_v27 = vpop.permute.xlu1 %3081 }
0x1422   : > { %v3087_v3 = vsel %vm822_vm15, %v3082_v27, 0 }
0x1423   : > { %3096 = vmatpush.bf16.msra.mxu2 %v3087_v3 }
0x1427   : > { %v4285_v14 = vpop.eup %4284 }
0x1428   : > { %v3013_v15 = vmul.f32 %v4285_v14, %v4277_v36  ;;  %v3002_v7 = vpop.xlane.xlu0 %3001 }
0x1429   : > { %4286 = vrcp.f32 %v3002_v7  ;;  %v4079_v10 = vpop.permute.xlu1 %4078 }
0x142a   : > { %v3017_v41 = vpack.c.bf16 %v3013_v15, %v3013_v15  ;;  %v4080_v23 = vunpack.i.l.bf16 %v4079_v10 }
0x142c   : > { %3835 = vmatmul.msk.bf16.vlgmr.msra.gmra.mxu2 %vm677_vm14, %v3017_v41 }
0x142f   : > { %v4287_v46 = vpop.eup %4286 }
0x1430   : > { %v3012_v51 = vmul.f32 %v4287_v46, %v4279_v38 }
0x1432   : > { %v3016_v54 = vpack.c.bf16 %v3012_v51, %v3012_v51 }
0x1434   : > { %3834 = vmatmul.msk.bf16.vlgmr.msra.gmra.mxu1 %vm677_vm14, %v3016_v54 }
0x143b   : > { %v4074_v18 = vpop.permute.xlu0 %4073 }
0x143c   : > { %v4076_v61 = vunpack.i.h.bf16 %v4074_v18  ;;  %v4075_v21 = vunpack.i.l.bf16 %v4074_v18 }
0x143e   : > { %v3151_v49 = vsel %vm677_vm14, %v5226_v44, %v4076_v61  ;;  %v3150_v56 = vsel %vm677_vm14, %v5224_v43, %v4075_v21  ;;  %v4089_v44 = vpop.permute.xlu1 %4088 }
0x143f   : > { %v3154_v31 = vsel %vm1626_vm1, %v3150_v56, %v4080_v23  ;;  %v4091_v52 = vunpack.i.h.bf16 %v4089_v44  ;;  %v4090_v43 = vunpack.i.l.bf16 %v4089_v44  ;;  %v3943_v56 = vld [vmem:[%s5550_s9 + $0x10] sm:$0xff] }
0x1441   : > { %v3153_v25 = vsel %vm677_vm14, %v5238_v50, %v4091_v52  ;;  %v3152_v48 = vsel %vm677_vm14, %v5235_v24, %v4090_v43  ;;  %v4113_v50 = vld [vmem:[%s5545_s4 + $0x1] ss:$0 sm:$0xff] }
0x148a   : > { %v3056_v55 = vpop.f32.mrf.mxu0 }
0x1492   : > { %v3058_v53 = vpop.f32.mrf.mxu0 }
0x1498   : > { %v3035_v59 = vpop.f32.mrf.mxu3 }
0x1499   : > { %v4082_v34 = vpack.i.bf16 %v3056_v55, %v3035_v59 }
0x149b   : > { %4083 = vrot.lane.b32.xlu2 %v4082_v34, %s5599_s23 }
0x14a0   : > { %v3037_v2 = vpop.f32.mrf.mxu3 }
0x14a3   : > { %4093 = vrot.lane.b32.xlu2 %v4092_v58, %s5597_s25  ;;  %v4081_v58 = vunpack.i.h.bf16 %v4079_v10  ;;  %s3584_s25 = sshll.u32 %s3581_s2, 4  ;;  %s3585_s25 = int_to_ptr.hbm [resolvable:$true] %s3584_s25 }
0x14a4   : > { %s4420_s29 = sshra.s32 %s3585_s25, 4  ;;  %s4421_s29 = int_to_ptr.hbm [resolvable:$true] %s4420_s29 }
0x14a5   : > { %v3155_v32 = vsel %vm1626_vm1, %v3151_v49, %v4081_v58  ;;  %s4422_s20 = scalar_lea.hbm %s4421_s29, 32  ;;  %p4427_p3 = scmp.lt.s32.totalorder %s4421_s29, %s5554_s13 }
0x14a6   : > { %p4423_p0 = scmp.ne.s32.totalorder %s4421_s29, %s4422_s20  ;;  %p4428_p4 = scmp.lt.s32.totalorder %s4426_s27, %s4422_s20 }
0x14a8   : > { %p4424_p1 = pnand %p4423_p0, %p4607_p5  ;;  %p4429_p7 = por %p4428_p4, %p4427_p3 }
0x14aa   : > { %p4425_p2 = pneg %p4424_p1 }
0x14ac   : > { %p4430_p8 = pnand %p4429_p7, %p4425_p2 }
0x14af   : > { %v3098_v5 = vpop.f32.mrf.mxu2 }
0x14b1   : > { %v3077_v57 = vpop.f32.mrf.mxu1 }
0x14b2   : > { %v4097_v11 = vpack.i.bf16 %v3098_v5, %v3077_v57 }
0x14b4   : > { %4098 = vrot.lane.b32.xlu0 %v4097_v11, %s5599_s23 }
0x14b7   : > { %v3100_v12 = vpop.f32.mrf.mxu2 }
0x14b9   : > { %v3079_v63 = vpop.f32.mrf.mxu1 }
0x14f5   : > { %v4084_v4 = vpop.permute.xlu2 %4083 }
0x14f6   : > { %v4086_v29 = vunpack.i.h.bf16 %v4084_v4  ;;  %v4085_v30 = vunpack.i.l.bf16 %v4084_v4 }
0x14f8   : > { %v3158_v16 = vsel %vm1631_vm2, %v3154_v31, %v4085_v30  ;;  %v3159_v35 = vsel %vm1631_vm2, %v3155_v32, %v4086_v29 }
0x14f9   : > { %v3162_v37 = vpack.c.bf16 %v3159_v35, %v3158_v16 }
0x14fb   : > { %3849 = vmatmul.msk.bf16.vlgmr.msrb.gmra.mxu3 %vm499_vm0, %v3162_v37 }
0x14fd   : > { %v4094_v47 = vpop.permute.xlu2 %4093 }
0x14fe   : > { %v4096_v8 = vunpack.i.h.bf16 %v4094_v47  ;;  %v4095_v20 = vunpack.i.l.bf16 %v4094_v47 }
0x1500   : > { %v3156_v6 = vsel %vm1626_vm1, %v3152_v48, %v4095_v20  ;;  %v3157_v45 = vsel %vm1626_vm1, %v3153_v25, %v4096_v8 }
0x1526   : > { %v4099_v36 = vpop.permute.xlu0 %4098 }
0x1527   : > { %v4101_v38 = vunpack.i.h.bf16 %v4099_v36  ;;  %v4100_v40 = vunpack.i.l.bf16 %v4099_v36 }
0x1529   : > { %v3161_v26 = vsel %vm1631_vm2, %v3157_v45, %v4101_v38  ;;  %v3160_v39 = vsel %vm1631_vm2, %v3156_v6, %v4100_v40  ;;  %v4114_v38 = vld [vmem:[#allocation7 + $0x1] ss:$0 sm:$0xff] }
0x152a   : > { %v3163_v1 = vpack.c.bf16 %v3161_v26, %v3160_v39  ;;  %v4115_v39 = vld [vmem:[%s5549_s8 + $0x1] ss:$0 sm:$0xff] }
0x152c   : > { %3850 = vmatmul.msk.bf16.gmra.mxu3 %vm499_vm0, %v3163_v1 }
0x157e   : > { %v3201_v42 = vpop.f32.mrf.mxu3 }
0x157f   : > { %v3202_v62 = vadd.f32 %v4113_v50, %v3201_v42 }
0x1581   : > { %v5416_v24 = vadd.f32 %v3202_v62, %v5087_v13 }
0x1583   : > { %v3219_v9 = vsel %vm499_vm0, %v5416_v24, 0.0  ;;  %v3235_v0 = vmul.f32 %v5416_v24, %v5416_v24 }
0x1584   : > { %3220 = vadd.xlane.f32.xlu1 %v3219_v9 }
0x1585   : > { %v3239_v27 = vsel %vm499_vm0, %v3235_v0, 0.0 }
0x1586   : > { %v3203_v3 = vpop.f32.mrf.mxu3  ;;  %3240 = vadd.xlane.f32.xlu0 %v3239_v27 }
0x1587   : > { %v3204_v14 = vadd.f32 %v4113_v50, %v3203_v3 }
0x1589   : > { %v5424_v15 = vadd.f32 %v3204_v14, %v5095_v19 }
0x158b   : > { %v3222_v7 = vsel %vm499_vm0, %v5424_v15, 0.0  ;;  %v3236_v13 = vmul.f32 %v5424_v15, %v5424_v15 }
0x158c   : > { %3223 = vadd.xlane.f32.xlu2 %v3222_v7 }
0x158d   : > { %v3242_v41 = vsel %vm499_vm0, %v3236_v13, 0.0 }
0x158e   : > { %3243 = vadd.xlane.f32.xlu1 %v3242_v41 }
0x15af   : > { %v3206_v46 = vpop.f32.mrf.mxu3 }
0x15b0   : > { %v3207_v51 = vadd.f32 %v4113_v50, %v3206_v46 }
0x15b2   : > { %v5432_v54 = vadd.f32 %v3207_v51, %v5103_v28 }
0x15b4   : > { %v3225_v55 = vsel %vm499_vm0, %v5432_v54, 0.0  ;;  %v3237_v19 = vmul.f32 %v5432_v54, %v5432_v54 }
0x15b5   : > { %3226 = vadd.xlane.f32.xlu2 %v3225_v55 }
0x15b6   : > { %v3245_v53 = vsel %vm499_vm0, %v3237_v19, 0.0 }
0x15b7   : > { %v3208_v59 = vpop.f32.mrf.mxu3  ;;  %3246 = vadd.xlane.f32.xlu1 %v3245_v53 }
0x15b8   : > { %v3209_v34 = vadd.f32 %v4113_v50, %v3208_v59 }
0x15ba   : > { %v5440_v60 = vadd.f32 %v3209_v34, %v5111_v33  ;;  %v3944_v33 = vld [vmem:[%s5550_s9 + $0x18] sm:$0xff] }
0x15bb   : > { %3386 = vmatpush.bf16.msra.mxu0 %v3944_v33 }
0x15bc   : > { %v3228_v2 = vsel %vm499_vm0, %v5440_v60, 0.0  ;;  %v3238_v28 = vmul.f32 %v5440_v60, %v5440_v60 }
0x15bd   : > { %3229 = vadd.xlane.f32.xlu0 %v3228_v2 }
0x15be   : > { %v3248_v5 = vsel %vm499_vm0, %v3238_v28, 0.0 }
0x15bf   : > { %3249 = vadd.xlane.f32.xlu2 %v3248_v5  ;;  %3387 = vmatpush.bf16.msra.mxu0 %v3943_v56 }
0x15f7   : > { %v3221_v57 = vpop.xlane.xlu1 %3220 }
0x15f8   : > { %v3231_v11 = vmul.f32 %v3221_v57, %v4693_v22 }
0x15f9   : > { %v3241_v12 = vpop.xlane.xlu0 %3240 }
0x15fa   : > { %v3255_v63 = vmul.f32 %v3231_v11, %v3231_v11  ;;  %v3251_v17 = vmul.f32 %v3241_v12, %v4693_v22  ;;  %v3267_v25 = vsub.f32 %v5416_v24, %v3231_v11 }
0x15fc   : > { %v3259_v18 = vsub.f32 %v3251_v17, %v3255_v63 }
0x15fe   : > { %v3263_v61 = vmax.f32 %v3259_v18, 0.0 }
0x15ff   : > { %v3224_v21 = vpop.xlane.xlu2 %3223 }
0x1600   : > { %v3271_v10 = vadd.f32 1e-12, %v3263_v61  ;;  %v3232_v49 = vmul.f32 %v3224_v21, %v4693_v22 }
0x1601   : > { %v3244_v58 = vpop.xlane.xlu1 %3243 }
0x1602   : > { %4288 = vrsqrt.f32 %v3271_v10  ;;  %v3256_v23 = vmul.f32 %v3232_v49, %v3232_v49  ;;  %v3252_v4 = vmul.f32 %v3244_v58, %v4693_v22  ;;  %vm3281_vm15 = vweird.f32 %v3271_v10 }
0x1603   : > { %v3268_v45 = vsub.f32 %v5424_v15, %v3232_v49 }
0x1604   : > { %v3260_v29 = vsub.f32 %v3252_v4, %v3256_v23 }
0x1606   : > { %v3264_v30 = vmax.f32 %v3260_v29, 0.0 }
0x1608   : > { %v4289_v31 = vpop.eup %4288  ;;  %v3272_v16 = vadd.f32 1e-12, %v3264_v30 }
0x1609   : > { %v3276_v32 = vmul.f32 %v4289_v31, %v3271_v10  ;;  %vm3282_vm14 = vweird.f32 %v4289_v31 }
0x160a   : > { %4290 = vrsqrt.f32 %v3272_v16  ;;  %vm3283_vm1 = vmor %vm3281_vm15, %vm3282_vm14  ;;  %vm3291_vm10 = vweird.f32 %v3272_v16 }
0x160b   : > { %v3277_v35 = vmul.f32 %v4289_v31, %v3276_v32 }
0x160d   : > { %v3278_v37 = vmul.f32 0.5, %v3277_v35 }
0x160f   : > { %v3279_v44 = vsub.f32 1.5, %v3278_v37 }
0x1610   : > { %v4291_v47 = vpop.eup %4290 }
0x1611   : > { %v3280_v52 = vmul.f32 %v4289_v31, %v3279_v44  ;;  %v3286_v43 = vmul.f32 %v4291_v47, %v3272_v16  ;;  %vm3292_vm2 = vweird.f32 %v4291_v47  ;;  %v3952_v44 = vld [vmem:[%s5552_s11 + $0x78] sm:$0xff] }
0x1612   : > { %vm3293_vm11 = vmor %vm3291_vm10, %vm3292_vm2  ;;  %3533 = vmatpush.bf16.msrb.mxu1 %v3952_v44 }
0x1613   : > { %v3287_v8 = vmul.f32 %v4291_v47, %v3286_v43  ;;  %v3284_v20 = vsel %vm3283_vm1, %v4289_v31, %v3280_v52  ;;  %v3950_v52 = vld [vmem:[%s5552_s11 + $0x68] sm:$0xff]  ;;  %v3949_v43 = vld [vmem:[%s5552_s11 + $0x60] sm:$0xff] }
0x1614   : > { %v3315_v40 = vmul.f32 %v3284_v20, %v3267_v25  ;;  %v4116_v20 = vld [vmem:[%s5551_s10 + $0x1] ss:$0 sm:$0xff]  ;;  %v3947_v25 = vld [vmem:[%s5552_s11 + $0x50] sm:$0xff] }
0x1615   : > { %v3288_v36 = vmul.f32 0.5, %v3287_v8  ;;  %v3948_v8 = vld [vmem:[%s5552_s11 + $0x58] sm:$0xff] }
0x1616   : > { %v3322_v1 = vmul.f32 %v4114_v38, %v3315_v40  ;;  %v3946_v40 = vld [vmem:[%s5552_s11 + $0x48] sm:$0xff] }
0x1617   : > { %v3289_v48 = vsub.f32 1.5, %v3288_v36 }
0x1618   : > { %v3329_v62 = vadd.f32 %v4115_v39, %v3322_v1 }
0x1619   : > { %v3290_v6 = vmul.f32 %v4291_v47, %v3289_v48 }
0x161b   : > { %v3294_v26 = vsel %vm3293_vm11, %v4291_v47, %v3290_v6  ;;  %v3951_v47 = vld [vmem:[%s5552_s11 + $0x70] sm:$0xff] }
0x161c   : > { %v3316_v50 = vmul.f32 %v3294_v26, %v3268_v45  ;;  %3534 = vmatpush.bf16.msrb.mxu1 %v3951_v47  ;;  %v3945_v26 = vld [vmem:[%s5552_s11 + $0x40] sm:$0xff] }
0x161e   : > { %v3323_v42 = vmul.f32 %v4114_v38, %v3316_v50 }
0x1620   : > { %v3330_v9 = vadd.f32 %v4115_v39, %v3323_v42  ;;  %3535 = vmatpush.bf16.msrb.mxu1 %v3950_v52 }
0x1622   : > { %v3333_v0 = vpack.c.bf16 %v3330_v9, %v3329_v62 }
0x1624   : > { %3881 = vmatmul.msk.bf16.vlgmr.msra.gmra.mxu0 %vm499_vm0, %v3333_v0  ;;  %3536 = vmatpush.bf16.msrb.mxu1 %v3949_v43 }
0x1628   : > { %v3227_v27 = vpop.xlane.xlu2 %3226  ;;  %3537 = vmatpush.bf16.msrb.mxu1 %v3948_v8 }
0x1629   : > { %v3233_v3 = vmul.f32 %v3227_v27, %v4693_v22 }
0x162a   : > { %v3247_v14 = vpop.xlane.xlu1 %3246 }
0x162b   : > { %v3257_v7 = vmul.f32 %v3233_v3, %v3233_v3  ;;  %v3253_v13 = vmul.f32 %v3247_v14, %v4693_v22 }
0x162c   : > { %3538 = vmatpush.bf16.msrb.mxu1 %v3947_v25 }
0x162d   : > { %v3261_v41 = vsub.f32 %v3253_v13, %v3257_v7 }
0x162f   : > { %v3265_v46 = vmax.f32 %v3261_v41, 0.0 }
0x1630   : > { %v3230_v51 = vpop.xlane.xlu0 %3229  ;;  %3539 = vmatpush.bf16.msrb.mxu1 %v3946_v40 }
0x1631   : > { %v3273_v55 = vadd.f32 1e-12, %v3265_v46  ;;  %v3234_v19 = vmul.f32 %v3230_v51, %v4693_v22 }
0x1632   : > { %v3250_v53 = vpop.xlane.xlu2 %3249 }
0x1633   : > { %4292 = vrsqrt.f32 %v3273_v55  ;;  %v3258_v59 = vmul.f32 %v3234_v19, %v3234_v19  ;;  %v3254_v34 = vmul.f32 %v3250_v53, %v4693_v22  ;;  %vm3301_vm13 = vweird.f32 %v3273_v55 }
0x1634   : > { %v3269_v22 = vsub.f32 %v5432_v54, %v3233_v3  ;;  %v3270_v4 = vsub.f32 %v5440_v60, %v3234_v19  ;;  %3540 = vmatpush.bf16.msrb.mxu1 %v3945_v26 }
0x1635   : > { %v3262_v2 = vsub.f32 %v3254_v34, %v3258_v59 }
0x1637   : > { %v3266_v28 = vmax.f32 %v3262_v2, 0.0 }
0x1639   : > { %v4293_v5 = vpop.eup %4292  ;;  %v3274_v11 = vadd.f32 1e-12, %v3266_v28 }
0x163a   : > { %v3296_v57 = vmul.f32 %v4293_v5, %v3273_v55  ;;  %vm3302_vm12 = vweird.f32 %v4293_v5 }
0x163b   : > { %4294 = vrsqrt.f32 %v3274_v11  ;;  %vm3303_vm3 = vmor %vm3301_vm13, %vm3302_vm12  ;;  %vm3311_vm5 = vweird.f32 %v3274_v11 }
0x163c   : > { %v3297_v12 = vmul.f32 %v4293_v5, %v3296_v57 }
0x163e   : > { %v3298_v63 = vmul.f32 0.5, %v3297_v12 }
0x1640   : > { %v3299_v17 = vsub.f32 1.5, %v3298_v63 }
0x1641   : > { %v4295_v18 = vpop.eup %4294 }
0x1642   : > { %v3300_v33 = vmul.f32 %v4293_v5, %v3299_v17  ;;  %v3306_v61 = vmul.f32 %v4295_v18, %v3274_v11  ;;  %vm3312_vm4 = vweird.f32 %v4295_v18 }
0x1643   : > { %vm3313_vm6 = vmor %vm3311_vm5, %vm3312_vm4 }
0x1644   : > { %v3307_v21 = vmul.f32 %v4295_v18, %v3306_v61  ;;  %v3304_v10 = vsel %vm3303_vm3, %v4293_v5, %v3300_v33 }
0x1645   : > { %v3317_v58 = vmul.f32 %v3304_v10, %v3269_v22 }
0x1646   : > { %v3308_v49 = vmul.f32 0.5, %v3307_v21 }
0x1647   : > { %v3324_v31 = vmul.f32 %v4114_v38, %v3317_v58 }
0x1648   : > { %v3309_v56 = vsub.f32 1.5, %v3308_v49 }
0x1649   : > { %v3331_v16 = vadd.f32 %v4115_v39, %v3324_v31 }
0x164a   : > { %v3310_v23 = vmul.f32 %v4295_v18, %v3309_v56 }
0x164c   : > { %v3314_v29 = vsel %vm3313_vm6, %v4295_v18, %v3310_v23 }
0x164d   : > { %v3318_v30 = vmul.f32 %v3314_v29, %v3270_v4 }
0x164f   : > { %v3325_v32 = vmul.f32 %v4114_v38, %v3318_v30 }
0x1651   : > { %v3332_v35 = vadd.f32 %v4115_v39, %v3325_v32 }
0x1653   : > { %v3334_v37 = vpack.c.bf16 %v3332_v35, %v3331_v16 }
0x1655   : > { %3882 = vmatmul.msk.bf16.gmra.mxu0 %vm499_vm0, %v3334_v37 }
0x16a1   : > { %v3389_v36 = vpop.f32.mrf.mxu0 }
0x16a2   : > { %v3390_v48 = vadd.f32 %v4116_v20, %v3389_v36 }
0x16a4   : > { %v3883_v38 = vmul.f32 -1.702, %v3390_v48 }
0x16a6   : > { %v3407_v6 = vmul.f32 1.442695, %v3883_v38 }
0x16a8   : > { %4296 = vpow2.f32 %v3407_v6 }
0x16a9   : > { %v3391_v45 = vpop.f32.mrf.mxu0 }
0x16aa   : > { %v3392_v39 = vadd.f32 %v4116_v20, %v3391_v45 }
0x16ac   : > { %v3884_v1 = vmul.f32 -1.702, %v3392_v39 }
0x16ae   : > { %v4297_v50 = vpop.eup %4296  ;;  %v3409_v42 = vmul.f32 1.442695, %v3884_v1 }
0x16af   : > { %v3415_v62 = vadd.f32 1.0, %v4297_v50 }
0x16b0   : > { %4298 = vpow2.f32 %v3409_v42 }
0x16b1   : > { %4300 = vrcp.f32 %v3415_v62  ;;  %v3430_v51 = vand.u32 2147483648, %v3415_v62  ;;  %vm3424_vm8 = vweird.f32 %v3415_v62  ;;  %v3428_v55 = vand.u32 2147483647, %v3415_v62 }
0x16b3   : > { %v3431_v28 = vor.u32 1.1754944e-38, %v3430_v51  ;;  %vm3429_vm15 = vcmp.eq.f32.partialorder %v3428_v55, 8.507059e+37 }
0x16b6   : > { %v4299_v9 = vpop.eup %4298 }
0x16b7   : > { %v4301_v0 = vpop.eup %4300  ;;  %v3416_v27 = vadd.f32 1.0, %v4299_v9  ;;  %v4117_v9 = vld [vmem:[%s5553_s12 + $0x1] ss:$0 sm:$0xff] }
0x16b8   : > { %v3420_v3 = vmul.f32 %v4301_v0, %v3415_v62  ;;  %vm3425_vm7 = vweird.f32 %v4301_v0 }
0x16b9   : > { %4302 = vrcp.f32 %v3416_v27  ;;  %vm3426_vm9 = vmor %vm3424_vm8, %vm3425_vm7  ;;  %v3445_v53 = vand.u32 2147483648, %v3416_v27  ;;  %v3443_v2 = vand.u32 2147483647, %v3416_v27  ;;  %vm3439_vm1 = vweird.f32 %v3416_v27 }
0x16ba   : > { %v3421_v14 = vsub.f32 1.0, %v3420_v3 }
0x16bb   : > { %v3446_v11 = vor.u32 1.1754944e-38, %v3445_v53  ;;  %vm3444_vm10 = vcmp.eq.f32.partialorder %v3443_v2, 8.507059e+37 }
0x16bc   : > { %v3422_v7 = vmul.f32 %v4301_v0, %v3421_v14 }
0x16be   : > { %v3423_v41 = vadd.f32 %v4301_v0, %v3422_v7 }
0x16bf   : > { %v4303_v13 = vpop.eup %4302 }
0x16c0   : > { %v3435_v46 = vmul.f32 %v4303_v13, %v3416_v27  ;;  %v3427_v59 = vsel %vm3426_vm9, %v4301_v0, %v3423_v41  ;;  %vm3440_vm14 = vweird.f32 %v4303_v13 }
0x16c1   : > { %v3432_v57 = vsel %vm3429_vm15, %v3431_v28, %v3427_v59  ;;  %vm3441_vm2 = vmor %vm3439_vm1, %vm3440_vm14 }
0x16c2   : > { %v3436_v19 = vsub.f32 1.0, %v3435_v46  ;;  %v3479_v17 = vmul.f32 %v3432_v57, %v3390_v48 }
0x16c4   : > { %v3437_v34 = vmul.f32 %v4303_v13, %v3436_v19 }
0x16c6   : > { %v3438_v5 = vadd.f32 %v4303_v13, %v3437_v34 }
0x16c8   : > { %v3442_v12 = vsel %vm3441_vm2, %v4303_v13, %v3438_v5 }
0x16c9   : > { %v3447_v63 = vsel %vm3444_vm10, %v3446_v11, %v3442_v12 }
0x16ca   : > { %v3480_v18 = vmul.f32 %v3447_v63, %v3392_v39 }
0x16cc   : > { %v3483_v33 = vpack.c.bf16 %v3480_v18, %v3479_v17 }
0x16ce   : > { %3541 = vmatmul.bf16.vlgmr.msrb.gmra.mxu1 %v3483_v33 }
0x16d2   : > { %v3394_v61 = vpop.f32.mrf.mxu0 }
0x16d3   : > { %v3395_v21 = vadd.f32 %v4116_v20, %v3394_v61 }
0x16d5   : > { %v3885_v10 = vmul.f32 -1.702, %v3395_v21 }
0x16d7   : > { %v3411_v49 = vmul.f32 1.442695, %v3885_v10 }
0x16d9   : > { %4304 = vpow2.f32 %v3411_v49 }
0x16da   : > { %v3396_v22 = vpop.f32.mrf.mxu0 }
0x16db   : > { %v3397_v56 = vadd.f32 %v4116_v20, %v3396_v22 }
0x16dd   : > { %v3886_v58 = vmul.f32 -1.702, %v3397_v56 }
0x16df   : > { %v4305_v23 = vpop.eup %4304  ;;  %v3413_v4 = vmul.f32 1.442695, %v3886_v58 }
0x16e0   : > { %v3417_v29 = vadd.f32 1.0, %v4305_v23 }
0x16e1   : > { %4306 = vpow2.f32 %v3413_v4 }
0x16e2   : > { %4308 = vrcp.f32 %v3417_v29  ;;  %v3460_v43 = vand.u32 2147483648, %v3417_v29  ;;  %vm3454_vm12 = vweird.f32 %v3417_v29  ;;  %v3458_v8 = vand.u32 2147483647, %v3417_v29 }
0x16e4   : > { %v3461_v40 = vor.u32 1.1754944e-38, %v3460_v43  ;;  %vm3459_vm4 = vcmp.eq.f32.partialorder %v3458_v8, 8.507059e+37 }
0x16e7   : > { %v4307_v30 = vpop.eup %4306 }
0x16e8   : > { %v4309_v31 = vpop.eup %4308  ;;  %v3418_v32 = vadd.f32 1.0, %v4307_v30 }
0x16e9   : > { %v3450_v16 = vmul.f32 %v4309_v31, %v3417_v29  ;;  %vm3455_vm11 = vweird.f32 %v4309_v31 }
0x16ea   : > { %4310 = vrcp.f32 %v3418_v32  ;;  %vm3456_vm13 = vmor %vm3454_vm12, %vm3455_vm11  ;;  %v3475_v36 = vand.u32 2147483648, %v3418_v32  ;;  %v3473_v38 = vand.u32 2147483647, %v3418_v32  ;;  %vm3469_vm5 = vweird.f32 %v3418_v32 }
0x16eb   : > { %v3451_v35 = vsub.f32 1.0, %v3450_v16 }
0x16ec   : > { %v3476_v26 = vor.u32 1.1754944e-38, %v3475_v36  ;;  %vm3474_vm7 = vcmp.eq.f32.partialorder %v3473_v38, 8.507059e+37 }
0x16ed   : > { %v3452_v37 = vmul.f32 %v4309_v31, %v3451_v35 }
0x16ef   : > { %v3453_v47 = vadd.f32 %v4309_v31, %v3452_v37 }
0x16f0   : > { %v4311_v44 = vpop.eup %4310 }
0x16f1   : > { %v3465_v52 = vmul.f32 %v4311_v44, %v3418_v32  ;;  %v3457_v25 = vsel %vm3456_vm13, %v4309_v31, %v3453_v47  ;;  %vm3470_vm3 = vweird.f32 %v4311_v44 }
0x16f2   : > { %v3462_v45 = vsel %vm3459_vm4, %v3461_v40, %v3457_v25  ;;  %vm3471_vm6 = vmor %vm3469_vm5, %vm3470_vm3 }
0x16f3   : > { %v3466_v20 = vsub.f32 1.0, %v3465_v52  ;;  %v3481_v50 = vmul.f32 %v3462_v45, %v3395_v21 }
0x16f5   : > { %v3467_v48 = vmul.f32 %v4311_v44, %v3466_v20 }
0x16f7   : > { %v3468_v6 = vadd.f32 %v4311_v44, %v3467_v48 }
0x16f9   : > { %v3472_v39 = vsel %vm3471_vm6, %v4311_v44, %v3468_v6 }
0x16fa   : > { %v3477_v1 = vsel %vm3474_vm7, %v3476_v26, %v3472_v39 }
0x16fb   : > { %v3482_v42 = vmul.f32 %v3477_v1, %v3397_v56 }
0x16fd   : > { %v3484_v62 = vpack.c.bf16 %v3482_v42, %v3481_v50 }
0x16ff   : > { %3546 = vmatmul.bf16.gmra.mxu1 %v3484_v62 }
0x174b   : > { %v3542_v0 = vpop.f32.mrf.mxu1 }
0x174c   : > { %v3552_v27 = vadd.f32 %v3542_v0, %v5416_v24 }
0x174e   : > { %v3561_v3 = vadd.f32 %v4117_v9, %v3552_v27 }
0x1750   : > { %3565 = vst.msk [vmem:[%s484_s21] sm:$0xff] %vm499_vm0, %v3561_v3 }
0x1753   : > { %v3544_v14 = vpop.f32.mrf.mxu1 }
0x1754   : > { %v3553_v7 = vadd.f32 %v3544_v14, %v5424_v15 }
0x1756   : > { %v3562_v13 = vadd.f32 %v4117_v9, %v3553_v7 }
0x1758   : > { %3566 = vst.msk [vmem:[%s484_s21 + $0x8] sm:$0xff] %vm499_vm0, %v3562_v13 }
0x177c   : > { %v3547_v41 = vpop.f32.mrf.mxu1 }
0x177d   : > { %v3554_v46 = vadd.f32 %v3547_v41, %v5432_v54 }
0x177f   : > { %v3563_v51 = vadd.f32 %v4117_v9, %v3554_v46 }
0x1781   : > { %3567 = vst.msk [vmem:[%s484_s21 + $0x10] sm:$0xff] %vm499_vm0, %v3563_v51 }
0x1784   : > { %v3549_v24 = vpop.f32.mrf.mxu1 }
0x1785   : > { %v3555_v15 = vadd.f32 %v3549_v24, %v5440_v60 }
0x1787   : > { %v3564_v55 = vadd.f32 %v4117_v9, %v3555_v15 }
0x1789   : > { %3568 = vst.msk [vmem:[%s484_s21 + $0x18] sm:$0xff] %vm499_vm0, %v3564_v55 }
0x178a   : > { %4433 = shalt.err (!%p4430_p8)
}
0x178b   : > { %s4498_s16 = smov 128  }
0x178c   : > { %3966 = dma.vmem_to_hbm [thread:$0]  (%p4607_p5), %s3583_s5, 512, %s3585_s25, %s3570_s14, %s4498_s16, %s4498_s16, %s5598_s19  }
0x178d PF: > { %s5600_s21 = sld [smem:[#allocation12_spill]]  ;;  %p3988_p9 = scmp.ge.s32.totalorder %s4476_s28, 2 }
0x178f   : > { %p3979_p10 = pnand %p3988_p9, %p4611_p6 }
0x1791   : > { %p3980_p11 = pneg %p3979_p10 }
0x1793   : > { %s3599_s30 = sand.u32 1, %s5600_s21  }
0x1794   : > { %s3600_s2 = scalar_lea.sflag [#allocation4], %s3599_s30 }
0x1795   : > { %4459 = dma.done.wait (%p3980_p11), %s3600_s2, 512  }
0x1796   : > { %4461 = vsyncadd (%p3980_p11), %s3600_s2, 4294966784  ;;  %s5602_s28 = sld [smem:[#allocation14_spill]]  ;;  %s5605_s25 = smov %s4468_s26 }
0x1797   : > { %s5603_s29 = sld [smem:[#allocation13_spill]] }
0x1798   : > { %s5604_s27 = sld [smem:[#allocation15_spill]] }
0x179c   : > { %p25_p12 = scmp.ge.s32.totalorder %s5602_s28, 4  }
0x179d   : > { %s5606_s26 = smov %s5603_s29 }
0x179e   :  { %27 = sbr.rel (!%p25_p12) target bundleno = 8 (0x8), region = 132 }
0x17a3   :  { %3606 = vsyncpa [#allocation3], 1 }
0x17a4   :  { %3608 = vsyncpa [#allocation3 + $0x1], 1 }
0x17a5   :  { %3609 = vsyncpa [#allocation6], 1 }
0x17a6   :  { %3610 = vsyncpa [#allocation4], 1 }
0x17a7   :  { %3612 = vsyncpa [#allocation4 + $0x1], 1 }

</bundles_post_ra>
